<compile_context>
chip_gen: v6e
topology: v6e:2x2x1
jax: 0.10.0
libtpu: 0.0.40
codegen_flags: <defaults>
</compile_context>

<pallas_src>
import functools
import math

import jax
import jax.numpy as jnp
from jax.experimental import pallas as pl
from jax.experimental.pallas import tpu as pltpu


# Matmul operand precision: bf16 operands, f32 accumulation.
_MM_DTYPE = jnp.bfloat16
_LN_EPS = 1e-5
_NEG_INF = -1e9


# ----------------------------------------------------------------------------
# In-kernel helpers
# ----------------------------------------------------------------------------
def _layer_norm(y, gamma, beta):
    """LayerNorm over the last dim, f32 statistics."""
    mean = jnp.mean(y, axis=-1, keepdims=True)
    var = jnp.mean(jnp.square(y - mean), axis=-1, keepdims=True)
    return (y - mean) * jax.lax.rsqrt(var + _LN_EPS) * gamma + beta


def _attend(x_res, q, k, v, mask, wo, gamma, beta, attn_ref, *, n_heads, dk):
    """Head-batched scaled-dot-product attention + residual + LayerNorm.

    q: (Lq, H*dk) f32; k, v: (Lk, H*dk) f32; mask: (Lq, Lk) bool (True=allowed).
    Writes attention probabilities into attn_ref[0] as (H, Lq, Lk) and returns
    LayerNorm(residual + context @ Wo), shape (Lq, H*dk) f32.
    """
    lq, d = q.shape
    lk = k.shape[0]
    scale = 1.0 / math.sqrt(dk)

    q3 = q.reshape(lq, n_heads, dk).astype(_MM_DTYPE)
    k3 = k.reshape(lk, n_heads, dk).astype(_MM_DTYPE)
    v3 = v.reshape(lk, n_heads, dk).astype(_MM_DTYPE)

    # One batched contraction over all heads; no per-head slices, no k.T copy.
    s = jnp.einsum("qhd,khd->hqk", q3, k3,
                   preferred_element_type=jnp.float32) * scale        # (H,Lq,Lk)
    s = jnp.where(mask[None, :, :], s, _NEG_INF)
    s = s - jnp.max(s, axis=-1, keepdims=True)
    e = jnp.exp(s)
    p = e * pl.reciprocal(jnp.sum(e, axis=-1, keepdims=True), approx=True)
    attn_ref[0] = p                                                    # (H,Lq,Lk)

    ctx = jnp.einsum("hqk,khd->qhd", p.astype(_MM_DTYPE), v3,
                     preferred_element_type=jnp.float32).reshape(lq, d)
    o = jnp.dot(ctx.astype(_MM_DTYPE), wo, preferred_element_type=jnp.float32)
    return _layer_norm(o + x_res, gamma, beta)


# ----------------------------------------------------------------------------
# Fused decoder-layer kernel (self-attn + cross-attn + FFN for one batch elem)
# ----------------------------------------------------------------------------
def _decoder_layer_kernel(
        x_ref, enc_ref, dec_tok_ref, enc_tok_ref,
        sa_wqkv_ref, sa_wo_ref, sa_g_ref, sa_b_ref,
        ca_wq_ref, ca_wkv_ref, ca_wo_ref, ca_g_ref, ca_b_ref,
        ff_w1_ref, ff_b1_ref, ff_w2_ref, ff_b2_ref, ff_g_ref, ff_b_ref,
        out_ref, mattn_ref, attn_ref, *, n_heads, dk):
    d = n_heads * dk
    x = x_ref[0]                       # (L, D)  f32, also the residual
    enc = enc_ref[0]                   # (Le, D) f32
    lq = x.shape[0]
    lk = enc.shape[0]

    # Masks rebuilt in-kernel from token ids (no O(L^2) mask DMA).
    row = jax.lax.broadcasted_iota(jnp.int32, (lq, lq), 0)
    col = jax.lax.broadcasted_iota(jnp.int32, (lq, lq), 1)
    dec_key_ok = jnp.broadcast_to(dec_tok_ref[0] != 0, (lq, lq))
    self_mask = (row >= col) & dec_key_ok                      # causal & not-PAD
    cross_mask = jnp.broadcast_to(enc_tok_ref[0] != 0, (lq, lk))  # key not PAD

    # ---- masked self-attention (fused [Wq|Wk|Wv] projection) ----
    qkv = jnp.dot(x.astype(_MM_DTYPE), sa_wqkv_ref[...],
                  preferred_element_type=jnp.float32)          # (L, 3D)
    y1 = _attend(x, qkv[:, :d], qkv[:, d:2 * d], qkv[:, 2 * d:], self_mask,
                 sa_wo_ref[...], sa_g_ref[...], sa_b_ref[...],
                 mattn_ref, n_heads=n_heads, dk=dk)

    # ---- encoder-decoder cross attention (fused [Wk|Wv] projection) ----
    q2 = jnp.dot(y1.astype(_MM_DTYPE), ca_wq_ref[...],
                 preferred_element_type=jnp.float32)           # (L, D)
    kv2 = jnp.dot(enc.astype(_MM_DTYPE), ca_wkv_ref[...],
                  preferred_element_type=jnp.float32)          # (Le, 2D)
    y2 = _attend(y1, q2, kv2[:, :d], kv2[:, d:], cross_mask,
                 ca_wo_ref[...], ca_g_ref[...], ca_b_ref[...],
                 attn_ref, n_heads=n_heads, dk=dk)

    # ---- feed-forward (Linear -> ReLU -> Linear) + residual + LayerNorm ----
    h = jnp.dot(y2.astype(_MM_DTYPE), ff_w1_ref[...],
                preferred_element_type=jnp.float32) + ff_b1_ref[...]
    h = jnp.maximum(h, 0.0)
    o = jnp.dot(h.astype(_MM_DTYPE), ff_w2_ref[...],
                preferred_element_type=jnp.float32) + ff_b2_ref[...]
    out_ref[0] = _layer_norm(o + y2, ff_g_ref[...], ff_b_ref[...])


# ----------------------------------------------------------------------------
# Pallas wrapper: one call per decoder layer
# ----------------------------------------------------------------------------
def decoder_layer(x, enc_outputs, dec_tok, enc_tok, lp, n_heads):
    """x: (B,L,D) f32; enc_outputs: (B,Le,D) f32; dec_tok/enc_tok: (B,1,L*) i32."""
    B, L, D = x.shape
    Le = enc_outputs.shape[1]
    F = lp["ff_w1"].shape[1]
    H = n_heads
    dk = D // H
    kernel = functools.partial(_decoder_layer_kernel, n_heads=H, dk=dk)

    def full(shape):
        return pl.BlockSpec(shape, lambda b, _s=shape: (0,) * len(_s))

    out, mattn, attn = pl.pallas_call(
        kernel,
        out_shape=(
            jax.ShapeDtypeStruct((B, L, D), jnp.float32),
            jax.ShapeDtypeStruct((B, H, L, L), jnp.float32),
            jax.ShapeDtypeStruct((B, H, L, Le), jnp.float32),
        ),
        grid=(B,),
        in_specs=[
            pl.BlockSpec((1, L, D), lambda b: (b, 0, 0)),      # decoder acts
            pl.BlockSpec((1, Le, D), lambda b: (b, 0, 0)),     # encoder outputs
            pl.BlockSpec((1, 1, L), lambda b: (b, 0, 0)),      # decoder tokens
            pl.BlockSpec((1, 1, Le), lambda b: (b, 0, 0)),     # encoder tokens
            full((D, 3 * D)),                                  # sa [Wq|Wk|Wv]
            full((D, D)), full((1, D)), full((1, D)),          # sa Wo, ln g/b
            full((D, D)), full((D, 2 * D)),                    # ca Wq, [Wk|Wv]
            full((D, D)), full((1, D)), full((1, D)),          # ca Wo, ln g/b
            full((D, F)), full((1, F)),                        # ff W1, b1
            full((F, D)), full((1, D)),                        # ff W2, b2
            full((1, D)), full((1, D)),                        # ff ln g/b
        ],
        out_specs=(
            pl.BlockSpec((1, L, D), lambda b: (b, 0, 0)),
            pl.BlockSpec((1, H, L, L), lambda b: (b, 0, 0, 0)),
            pl.BlockSpec((1, H, L, Le), lambda b: (b, 0, 0, 0)),
        ),
        compiler_params=pltpu.CompilerParams(
            dimension_semantics=("parallel",)),
    )(x, enc_outputs, dec_tok, enc_tok,
      lp["sa_wqkv"], lp["sa_wo"], lp["sa_g"], lp["sa_b"],
      lp["ca_wq"], lp["ca_wkv"], lp["ca_wo"], lp["ca_g"], lp["ca_b"],
      lp["ff_w1"], lp["ff_b1"], lp["ff_w2"], lp["ff_b2"],
      lp["ff_g"], lp["ff_b"])
    return out, mattn, attn


# ----------------------------------------------------------------------------
# Plain-JAX glue: embeddings, RoPE, parameter init, decoder driver
# ----------------------------------------------------------------------------
def rope(x):
    """Rotary positional encoding applied to (B, L, D) embeddings."""
    B, L, D = x.shape
    half = D // 2
    inv_freq = 1.0 / (10000.0 ** (jnp.arange(half, dtype=jnp.float32) / half))
    pos = jnp.arange(L, dtype=jnp.float32)
    ang = pos[:, None] * inv_freq[None, :]            # (L, half)
    cos, sin = jnp.cos(ang), jnp.sin(ang)
    x1, x2 = x[..., :half], x[..., half:]
    return jnp.concatenate([x1 * cos - x2 * sin, x1 * sin + x2 * cos], axis=-1)


def init_decoder_params(key, vocab, emb_dim, ff_dim, n_layers, n_heads):
    def dense(k, shape):
        return (0.02 * jax.random.normal(k, shape, jnp.float32)).astype(_MM_DTYPE)

    def layer_params(k):
        ks = jax.random.split(k, 10)
        d, f = emb_dim, ff_dim
        return {
            # masked self-attention: fused [Wq | Wk | Wv]
            "sa_wqkv": jnp.concatenate(
                [dense(ks[0], (d, d)), dense(ks[1], (d, d)), dense(ks[2], (d, d))],
                axis=1),
            "sa_wo": dense(ks[3], (d, d)),
            "sa_g": jnp.ones((1, d), jnp.float32),
            "sa_b": jnp.zeros((1, d), jnp.float32),
            # encoder-decoder attention: Wq and fused [Wk | Wv]
            "ca_wq": dense(ks[4], (d, d)),
            "ca_wkv": jnp.concatenate(
                [dense(ks[5], (d, d)), dense(ks[6], (d, d))], axis=1),
            "ca_wo": dense(ks[7], (d, d)),
            "ca_g": jnp.ones((1, d), jnp.float32),
            "ca_b": jnp.zeros((1, d), jnp.float32),
            # feed-forward
            "ff_w1": dense(ks[8], (d, f)),
            "ff_b1": jnp.zeros((1, f), jnp.float32),
            "ff_w2": dense(ks[9], (f, d)),
            "ff_b2": jnp.zeros((1, d), jnp.float32),
            "ff_g": jnp.ones((1, d), jnp.float32),
            "ff_b": jnp.zeros((1, d), jnp.float32),
        }

    keys = jax.random.split(key, 1 + n_layers)
    emb_table = 0.02 * jax.random.normal(keys[0], (vocab, emb_dim), jnp.float32)
    layers = [layer_params(keys[1 + i]) for i in range(n_layers)]
    return {"emb": emb_table, "layers": layers}


def decoder_forward(params, inputs, enc_inputs, enc_outputs, n_heads):
    emb_dim = params["emb"].shape[1]

    # Embedding lookup (scaled, annotated-transformer style) + RoPE: glue.
    embedding = jnp.take(params["emb"], inputs, axis=0) * math.sqrt(emb_dim)
    outputs = rope(embedding)

    # Token ids (B,1,L) int32; the attention masks (causal & key!=PAD for
    # self-attention, key!=PAD for cross-attention) are rebuilt in-kernel,
    # so no O(Lq*Lk) mask is materialized or DMA'd.
    dec_tok = inputs[:, None, :].astype(jnp.int32)
    enc_tok = enc_inputs[:, None, :].astype(jnp.int32)

    attentions, masked_attentions = [], []
    for lp in params["layers"]:
        outputs, masked_attention, attention = decoder_layer(
            outputs, enc_outputs, dec_tok, enc_tok, lp, n_heads)
        masked_attentions.append(masked_attention)
        attentions.append(attention)
    return outputs, masked_attentions, attentions


# ----------------------------------------------------------------------------
# Demo
# ----------------------------------------------------------------------------
if __name__ == "__main__":
    vocab, emb_dim, ff_dim = 50, 32, 64
    n_layers, n_heads = 2, 4
    B, dec_len, enc_len = 2, 8, 8

    key = jax.random.PRNGKey(0)
    k_par, k_dec, k_enc, k_out = jax.random.split(key, 4)

    params = init_decoder_params(k_par, vocab, emb_dim, ff_dim, n_layers, n_heads)

    inputs = jax.random.randint(k_dec, (B, dec_len), 1, vocab, dtype=jnp.int32)
    enc_inputs = jax.random.randint(k_enc, (B, enc_len), 1, vocab, dtype=jnp.int32)
    # introduce PAD (token 0) positions to exercise the stop-word mask
    inputs = inputs.at[0, -2:].set(0)
    enc_inputs = enc_inputs.at[1, -3:].set(0)
    enc_outputs = jax.random.normal(k_out, (B, enc_len, emb_dim), jnp.float32)

    out, masked_attns, attns = decoder_forward(
        params, inputs, enc_inputs, enc_outputs, n_heads)

    jax.block_until_ready(out)
    jax.block_until_ready(masked_attns)
    jax.block_until_ready(attns)

    assert out.shape == (B, dec_len, emb_dim)
    assert len(attns) == n_layers and len(masked_attns) == n_layers
    assert attns[0].shape == (B, n_heads, dec_len, enc_len)
    assert masked_attns[0].shape == (B, n_heads, dec_len, dec_len)
    assert bool(jnp.all(jnp.isfinite(out)))
    print("KERNEL_OK")
</pallas_src>

<mosaic_0001>
module attributes {stable_mosaic.version = 11 : i64} {
  func.func @_decoder_layer_kernel(%arg0: i32, %arg1: memref<1x8x32xf32, #tpu.memory_space<vmem>>, %arg2: memref<1x8x32xf32, #tpu.memory_space<vmem>>, %arg3: memref<1x1x8xi32, #tpu.memory_space<vmem>>, %arg4: memref<1x1x8xi32, #tpu.memory_space<vmem>>, %arg5: memref<32x96xbf16, #tpu.memory_space<vmem>>, %arg6: memref<32x32xbf16, #tpu.memory_space<vmem>>, %arg7: memref<1x32xf32, #tpu.memory_space<vmem>>, %arg8: memref<1x32xf32, #tpu.memory_space<vmem>>, %arg9: memref<32x32xbf16, #tpu.memory_space<vmem>>, %arg10: memref<32x64xbf16, #tpu.memory_space<vmem>>, %arg11: memref<32x32xbf16, #tpu.memory_space<vmem>>, %arg12: memref<1x32xf32, #tpu.memory_space<vmem>>, %arg13: memref<1x32xf32, #tpu.memory_space<vmem>>, %arg14: memref<32x64xbf16, #tpu.memory_space<vmem>>, %arg15: memref<1x64xf32, #tpu.memory_space<vmem>>, %arg16: memref<64x32xbf16, #tpu.memory_space<vmem>>, %arg17: memref<1x32xf32, #tpu.memory_space<vmem>>, %arg18: memref<1x32xf32, #tpu.memory_space<vmem>>, %arg19: memref<1x32xf32, #tpu.memory_space<vmem>>, %arg20: memref<1x8x32xf32, #tpu.memory_space<vmem>>, %arg21: memref<1x4x8x8xf32, #tpu.memory_space<vmem>>, %arg22: memref<1x4x8x8xf32, #tpu.memory_space<vmem>>) attributes {dimension_semantics = [#tpu.dimension_semantics<parallel>], iteration_bounds = array<i64: 2>, scalar_prefetch = 0 : i64, scratch_operands = 0 : i64, tpu.core_type = #tpu.core_type<tc>, window_params = [{transform_indices = @transform_0, window_bounds = array<i64: 1, 8, 32>}, {transform_indices = @transform_1, window_bounds = array<i64: 1, 8, 32>}, {transform_indices = @transform_2, window_bounds = array<i64: 1, 1, 8>}, {transform_indices = @transform_3, window_bounds = array<i64: 1, 1, 8>}, {pipeline_mode = #tpu.pipeline_mode<synchronous>, transform_indices = @transform_4, window_bounds = array<i64: 32, 96>}, {pipeline_mode = #tpu.pipeline_mode<synchronous>, transform_indices = @transform_5, window_bounds = array<i64: 32, 32>}, {pipeline_mode = #tpu.pipeline_mode<synchronous>, transform_indices = @transform_6, window_bounds = array<i64: 1, 32>}, {pipeline_mode = #tpu.pipeline_mode<synchronous>, transform_indices = @transform_7, window_bounds = array<i64: 1, 32>}, {pipeline_mode = #tpu.pipeline_mode<synchronous>, transform_indices = @transform_8, window_bounds = array<i64: 32, 32>}, {pipeline_mode = #tpu.pipeline_mode<synchronous>, transform_indices = @transform_9, window_bounds = array<i64: 32, 64>}, {pipeline_mode = #tpu.pipeline_mode<synchronous>, transform_indices = @transform_10, window_bounds = array<i64: 32, 32>}, {pipeline_mode = #tpu.pipeline_mode<synchronous>, transform_indices = @transform_11, window_bounds = array<i64: 1, 32>}, {pipeline_mode = #tpu.pipeline_mode<synchronous>, transform_indices = @transform_12, window_bounds = array<i64: 1, 32>}, {pipeline_mode = #tpu.pipeline_mode<synchronous>, transform_indices = @transform_13, window_bounds = array<i64: 32, 64>}, {pipeline_mode = #tpu.pipeline_mode<synchronous>, transform_indices = @transform_14, window_bounds = array<i64: 1, 64>}, {pipeline_mode = #tpu.pipeline_mode<synchronous>, transform_indices = @transform_15, window_bounds = array<i64: 64, 32>}, {pipeline_mode = #tpu.pipeline_mode<synchronous>, transform_indices = @transform_16, window_bounds = array<i64: 1, 32>}, {pipeline_mode = #tpu.pipeline_mode<synchronous>, transform_indices = @transform_17, window_bounds = array<i64: 1, 32>}, {pipeline_mode = #tpu.pipeline_mode<synchronous>, transform_indices = @transform_18, window_bounds = array<i64: 1, 32>}, {transform_indices = @transform_19, window_bounds = array<i64: 1, 8, 32>}, {transform_indices = @transform_20, window_bounds = array<i64: 1, 4, 8, 8>}, {transform_indices = @transform_21, window_bounds = array<i64: 1, 4, 8, 8>}]} {
    %c0 = arith.constant 0 : index
    %c0_0 = arith.constant 0 : index
    %c0_1 = arith.constant 0 : index
    %0 = vector.load %arg1[%c0, %c0_0, %c0_1] : memref<1x8x32xf32, #tpu.memory_space<vmem>>, vector<1x8x32xf32>
    %1 = vector.shape_cast %0 : vector<1x8x32xf32> to vector<8x32xf32>
    %c0_2 = arith.constant 0 : index
    %c0_3 = arith.constant 0 : index
    %c0_4 = arith.constant 0 : index
    %2 = vector.load %arg2[%c0_2, %c0_3, %c0_4] : memref<1x8x32xf32, #tpu.memory_space<vmem>>, vector<1x8x32xf32>
    %3 = vector.shape_cast %2 : vector<1x8x32xf32> to vector<8x32xf32>
    %4 = tpu.iota {dimensions = array<i32: 0>} : vector<8x8xi32>
    %5 = tpu.iota {dimensions = array<i32: 1>} : vector<8x8xi32>
    %c0_5 = arith.constant 0 : index
    %c0_6 = arith.constant 0 : index
    %c0_7 = arith.constant 0 : index
    %6 = vector.load %arg3[%c0_5, %c0_6, %c0_7] : memref<1x1x8xi32, #tpu.memory_space<vmem>>, vector<1x1x8xi32>
    %7 = vector.shape_cast %6 : vector<1x1x8xi32> to vector<1x8xi32>
    %c0_i32 = arith.constant 0 : i32
    %8 = vector.broadcast %c0_i32 : i32 to vector<1x8xi32>
    %9 = arith.cmpi ne, %7, %8 : vector<1x8xi32>
    %10 = vector.shape_cast %9 : vector<1x8xi1> to vector<1x8xi1>
    %11 = vector.broadcast %10 : vector<1x8xi1> to vector<8x8xi1>
    %12 = arith.cmpi sge, %4, %5 : vector<8x8xi32>
    %13 = arith.andi %12, %11 : vector<8x8xi1>
    %c0_8 = arith.constant 0 : index
    %c0_9 = arith.constant 0 : index
    %c0_10 = arith.constant 0 : index
    %14 = vector.load %arg4[%c0_8, %c0_9, %c0_10] : memref<1x1x8xi32, #tpu.memory_space<vmem>>, vector<1x1x8xi32>
    %15 = vector.shape_cast %14 : vector<1x1x8xi32> to vector<1x8xi32>
    %c0_i32_11 = arith.constant 0 : i32
    %16 = vector.broadcast %c0_i32_11 : i32 to vector<1x8xi32>
    %17 = arith.cmpi ne, %15, %16 : vector<1x8xi32>
    %18 = vector.shape_cast %17 : vector<1x8xi1> to vector<1x8xi1>
    %19 = vector.broadcast %18 : vector<1x8xi1> to vector<8x8xi1>
    %20 = arith.truncf %1 : vector<8x32xf32> to vector<8x32xbf16>
    %c0_12 = arith.constant 0 : index
    %c0_13 = arith.constant 0 : index
    %21 = vector.load %arg5[%c0_12, %c0_13] : memref<32x96xbf16, #tpu.memory_space<vmem>>, vector<32x96xbf16>
    %cst = arith.constant dense<0.000000e+00> : vector<8x96xf32>
    %22 = tpu.matmul %20, %21, %cst {dimension_numbers = #tpu.dot_dimension_numbers<[1], [0], [0], [1], [0, 0, 1, 1], [], []>} : vector<8x32xbf16>, vector<32x96xbf16>, vector<8x96xf32> -> vector<8x96xf32>
    %23 = vector.extract_strided_slice %22 {offsets = [0, 0], sizes = [8, 32], strides = [1, 1]} : vector<8x96xf32> to vector<8x32xf32>
    %24 = vector.extract_strided_slice %22 {offsets = [0, 32], sizes = [8, 32], strides = [1, 1]} : vector<8x96xf32> to vector<8x32xf32>
    %25 = vector.extract_strided_slice %22 {offsets = [0, 64], sizes = [8, 32], strides = [1, 1]} : vector<8x96xf32> to vector<8x32xf32>
    %c0_14 = arith.constant 0 : index
    %c0_15 = arith.constant 0 : index
    %26 = vector.load %arg6[%c0_14, %c0_15] : memref<32x32xbf16, #tpu.memory_space<vmem>>, vector<32x32xbf16>
    %c0_16 = arith.constant 0 : index
    %c0_17 = arith.constant 0 : index
    %27 = vector.load %arg7[%c0_16, %c0_17] : memref<1x32xf32, #tpu.memory_space<vmem>>, vector<1x32xf32>
    %c0_18 = arith.constant 0 : index
    %c0_19 = arith.constant 0 : index
    %28 = vector.load %arg8[%c0_18, %c0_19] : memref<1x32xf32, #tpu.memory_space<vmem>>, vector<1x32xf32>
    %29 = vector.shape_cast %23 : vector<8x32xf32> to vector<8x4x8xf32>
    %30 = arith.truncf %29 : vector<8x4x8xf32> to vector<8x4x8xbf16>
    %31 = vector.shape_cast %24 : vector<8x32xf32> to vector<8x4x8xf32>
    %32 = arith.truncf %31 : vector<8x4x8xf32> to vector<8x4x8xbf16>
    %33 = vector.shape_cast %25 : vector<8x32xf32> to vector<8x4x8xf32>
    %34 = arith.truncf %33 : vector<8x4x8xf32> to vector<8x4x8xbf16>
    "tpu.trace_start"() <{level = 10 : i32, message = "qhd,khd->hqk"}> : () -> ()
    %cst_20 = arith.constant dense<0.000000e+00> : vector<4x8x8xf32>
    %35 = tpu.matmul %30, %32, %cst_20 {dimension_numbers = #tpu.dot_dimension_numbers<[2], [2], [0], [0], [0, 1, 0, 0, 1, 0], [1], [1]>} : vector<8x4x8xbf16>, vector<8x4x8xbf16>, vector<4x8x8xf32> -> vector<4x8x8xf32>
    "tpu.trace_stop"() : () -> ()
    %cst_21 = arith.constant 0.353553385 : f32
    %36 = vector.broadcast %cst_21 : f32 to vector<4x8x8xf32>
    %37 = arith.mulf %35, %36 : vector<4x8x8xf32>
    %38 = vector.shape_cast %13 : vector<8x8xi1> to vector<1x8x8xi1>
    %cst_22 = arith.constant -1.000000e+09 : f32
    %39 = vector.shape_cast %38 : vector<1x8x8xi1> to vector<1x8x8xi1>
    %40 = vector.broadcast %39 : vector<1x8x8xi1> to vector<4x8x8xi1>
    %41 = vector.broadcast %cst_22 : f32 to vector<4x8x8xf32>
    %42 = arith.select %40, %37, %41 : vector<4x8x8xi1>, vector<4x8x8xf32>
    %cst_23 = arith.constant dense<0xFF800000> : vector<4x8xf32>
    %43 = vector.multi_reduction <maximumf>, %42, %cst_23 [2] : vector<4x8x8xf32> to vector<4x8xf32>
    %44 = vector.shape_cast %43 : vector<4x8xf32> to vector<4x8x1xf32>
    %45 = vector.broadcast %44 : vector<4x8x1xf32> to vector<4x8x8xf32>
    %46 = arith.subf %42, %45 : vector<4x8x8xf32>
    %47 = math.exp %46 : vector<4x8x8xf32>
    %cst_24 = arith.constant dense<0.000000e+00> : vector<4x8xf32>
    %48 = vector.multi_reduction <add>, %47, %cst_24 [2] : vector<4x8x8xf32> to vector<4x8xf32>
    %49 = vector.shape_cast %48 : vector<4x8xf32> to vector<4x8x1xf32>
    %50 = tpu.reciprocal %49 {approx = true} : vector<4x8x1xf32> -> vector<4x8x1xf32>
    %51 = vector.broadcast %50 : vector<4x8x1xf32> to vector<4x8x8xf32>
    %52 = arith.mulf %47, %51 : vector<4x8x8xf32>
    %c0_25 = arith.constant 0 : index
    %c0_26 = arith.constant 0 : index
    %c0_27 = arith.constant 0 : index
    %c0_28 = arith.constant 0 : index
    %53 = vector.load %arg21[%c0_25, %c0_26, %c0_27, %c0_28] : memref<1x4x8x8xf32, #tpu.memory_space<vmem>>, vector<1x4x8x8xf32>
    %54 = vector.shape_cast %53 : vector<1x4x8x8xf32> to vector<4x8x8xf32>
    %55 = vector.shape_cast %52 : vector<4x8x8xf32> to vector<1x4x8x8xf32>
    tpu.vector_store %arg21[%c0_25, %c0_26, %c0_27, %c0_28], %55 {strides = array<i32>} : memref<1x4x8x8xf32, #tpu.memory_space<vmem>>, vector<1x4x8x8xf32>,
    %56 = arith.truncf %52 : vector<4x8x8xf32> to vector<4x8x8xbf16>
    "tpu.trace_start"() <{level = 10 : i32, message = "hqk,khd->qhd"}> : () -> ()
    %cst_29 = arith.constant dense<0.000000e+00> : vector<4x8x8xf32>
    %57 = tpu.matmul %34, %56, %cst_29 {dimension_numbers = #tpu.dot_dimension_numbers<[0], [2], [2], [1], [0, 1, 0, 2, 1, 1], [1], [0]>} : vector<8x4x8xbf16>, vector<4x8x8xbf16>, vector<4x8x8xf32> -> vector<4x8x8xf32>
    %58 = tpu.transpose %57, [2, 0, 1] : vector<4x8x8xf32> -> vector<8x4x8xf32>
    "tpu.trace_stop"() : () -> ()
    %59 = vector.shape_cast %58 : vector<8x4x8xf32> to vector<8x32xf32>
    %60 = arith.truncf %59 : vector<8x32xf32> to vector<8x32xbf16>
    %cst_30 = arith.constant dense<0.000000e+00> : vector<8x32xf32>
    %61 = tpu.matmul %60, %26, %cst_30 {dimension_numbers = #tpu.dot_dimension_numbers<[1], [0], [0], [1], [0, 0, 1, 1], [], []>} : vector<8x32xbf16>, vector<32x32xbf16>, vector<8x32xf32> -> vector<8x32xf32>
    %62 = arith.addf %61, %1 : vector<8x32xf32>
    %cst_31 = arith.constant dense<0.000000e+00> : vector<8xf32>
    %63 = vector.multi_reduction <add>, %62, %cst_31 [1] : vector<8x32xf32> to vector<8xf32>
    %64 = vector.shape_cast %63 : vector<8xf32> to vector<8x1xf32>
    %cst_32 = arith.constant 3.200000e+01 : f32
    %65 = vector.broadcast %cst_32 : f32 to vector<8x1xf32>
    %66 = arith.divf %64, %65 : vector<8x1xf32>
    %67 = vector.broadcast %66 : vector<8x1xf32> to vector<8x32xf32>
    %68 = arith.subf %62, %67 : vector<8x32xf32>
    %69 = arith.mulf %68, %68 : vector<8x32xf32>
    %cst_33 = arith.constant dense<0.000000e+00> : vector<8xf32>
    %70 = vector.multi_reduction <add>, %69, %cst_33 [1] : vector<8x32xf32> to vector<8xf32>
    %71 = vector.shape_cast %70 : vector<8xf32> to vector<8x1xf32>
    %cst_34 = arith.constant 3.200000e+01 : f32
    %72 = vector.broadcast %cst_34 : f32 to vector<8x1xf32>
    %73 = arith.divf %71, %72 : vector<8x1xf32>
    %74 = vector.broadcast %66 : vector<8x1xf32> to vector<8x32xf32>
    %75 = arith.subf %62, %74 : vector<8x32xf32>
    %cst_35 = arith.constant 9.99999974E-6 : f32
    %76 = vector.broadcast %cst_35 : f32 to vector<8x1xf32>
    %77 = arith.addf %73, %76 : vector<8x1xf32>
    %78 = math.rsqrt %77 : vector<8x1xf32>
    %79 = vector.broadcast %78 : vector<8x1xf32> to vector<8x32xf32>
    %80 = arith.mulf %75, %79 : vector<8x32xf32>
    %81 = vector.broadcast %27 : vector<1x32xf32> to vector<8x32xf32>
    %82 = arith.mulf %80, %81 : vector<8x32xf32>
    %83 = vector.broadcast %28 : vector<1x32xf32> to vector<8x32xf32>
    %84 = arith.addf %82, %83 : vector<8x32xf32>
    %85 = arith.truncf %84 : vector<8x32xf32> to vector<8x32xbf16>
    %c0_36 = arith.constant 0 : index
    %c0_37 = arith.constant 0 : index
    %86 = vector.load %arg9[%c0_36, %c0_37] : memref<32x32xbf16, #tpu.memory_space<vmem>>, vector<32x32xbf16>
    %cst_38 = arith.constant dense<0.000000e+00> : vector<8x32xf32>
    %87 = tpu.matmul %85, %86, %cst_38 {dimension_numbers = #tpu.dot_dimension_numbers<[1], [0], [0], [1], [0, 0, 1, 1], [], []>} : vector<8x32xbf16>, vector<32x32xbf16>, vector<8x32xf32> -> vector<8x32xf32>
    %88 = arith.truncf %3 : vector<8x32xf32> to vector<8x32xbf16>
    %c0_39 = arith.constant 0 : index
    %c0_40 = arith.constant 0 : index
    %89 = vector.load %arg10[%c0_39, %c0_40] : memref<32x64xbf16, #tpu.memory_space<vmem>>, vector<32x64xbf16>
    %cst_41 = arith.constant dense<0.000000e+00> : vector<8x64xf32>
    %90 = tpu.matmul %88, %89, %cst_41 {dimension_numbers = #tpu.dot_dimension_numbers<[1], [0], [0], [1], [0, 0, 1, 1], [], []>} : vector<8x32xbf16>, vector<32x64xbf16>, vector<8x64xf32> -> vector<8x64xf32>
    %91 = vector.extract_strided_slice %90 {offsets = [0, 0], sizes = [8, 32], strides = [1, 1]} : vector<8x64xf32> to vector<8x32xf32>
    %92 = vector.extract_strided_slice %90 {offsets = [0, 32], sizes = [8, 32], strides = [1, 1]} : vector<8x64xf32> to vector<8x32xf32>
    %c0_42 = arith.constant 0 : index
    %c0_43 = arith.constant 0 : index
    %93 = vector.load %arg11[%c0_42, %c0_43] : memref<32x32xbf16, #tpu.memory_space<vmem>>, vector<32x32xbf16>
    %c0_44 = arith.constant 0 : index
    %c0_45 = arith.constant 0 : index
    %94 = vector.load %arg12[%c0_44, %c0_45] : memref<1x32xf32, #tpu.memory_space<vmem>>, vector<1x32xf32>
    %c0_46 = arith.constant 0 : index
    %c0_47 = arith.constant 0 : index
    %95 = vector.load %arg13[%c0_46, %c0_47] : memref<1x32xf32, #tpu.memory_space<vmem>>, vector<1x32xf32>
    %96 = vector.shape_cast %87 : vector<8x32xf32> to vector<8x4x8xf32>
    %97 = arith.truncf %96 : vector<8x4x8xf32> to vector<8x4x8xbf16>
    %98 = vector.shape_cast %91 : vector<8x32xf32> to vector<8x4x8xf32>
    %99 = arith.truncf %98 : vector<8x4x8xf32> to vector<8x4x8xbf16>
    %100 = vector.shape_cast %92 : vector<8x32xf32> to vector<8x4x8xf32>
    %101 = arith.truncf %100 : vector<8x4x8xf32> to vector<8x4x8xbf16>
    "tpu.trace_start"() <{level = 10 : i32, message = "qhd,khd->hqk"}> : () -> ()
    %cst_48 = arith.constant dense<0.000000e+00> : vector<4x8x8xf32>
    %102 = tpu.matmul %97, %99, %cst_48 {dimension_numbers = #tpu.dot_dimension_numbers<[2], [2], [0], [0], [0, 1, 0, 0, 1, 0], [1], [1]>} : vector<8x4x8xbf16>, vector<8x4x8xbf16>, vector<4x8x8xf32> -> vector<4x8x8xf32>
    "tpu.trace_stop"() : () -> ()
    %cst_49 = arith.constant 0.353553385 : f32
    %103 = vector.broadcast %cst_49 : f32 to vector<4x8x8xf32>
    %104 = arith.mulf %102, %103 : vector<4x8x8xf32>
    %105 = vector.shape_cast %19 : vector<8x8xi1> to vector<1x8x8xi1>
    %cst_50 = arith.constant -1.000000e+09 : f32
    %106 = vector.shape_cast %105 : vector<1x8x8xi1> to vector<1x8x8xi1>
    %107 = vector.broadcast %106 : vector<1x8x8xi1> to vector<4x8x8xi1>
    %108 = vector.broadcast %cst_50 : f32 to vector<4x8x8xf32>
    %109 = arith.select %107, %104, %108 : vector<4x8x8xi1>, vector<4x8x8xf32>
    %cst_51 = arith.constant dense<0xFF800000> : vector<4x8xf32>
    %110 = vector.multi_reduction <maximumf>, %109, %cst_51 [2] : vector<4x8x8xf32> to vector<4x8xf32>
    %111 = vector.shape_cast %110 : vector<4x8xf32> to vector<4x8x1xf32>
    %112 = vector.broadcast %111 : vector<4x8x1xf32> to vector<4x8x8xf32>
    %113 = arith.subf %109, %112 : vector<4x8x8xf32>
    %114 = math.exp %113 : vector<4x8x8xf32>
    %cst_52 = arith.constant dense<0.000000e+00> : vector<4x8xf32>
    %115 = vector.multi_reduction <add>, %114, %cst_52 [2] : vector<4x8x8xf32> to vector<4x8xf32>
    %116 = vector.shape_cast %115 : vector<4x8xf32> to vector<4x8x1xf32>
    %117 = tpu.reciprocal %116 {approx = true} : vector<4x8x1xf32> -> vector<4x8x1xf32>
    %118 = vector.broadcast %117 : vector<4x8x1xf32> to vector<4x8x8xf32>
    %119 = arith.mulf %114, %118 : vector<4x8x8xf32>
    %c0_53 = arith.constant 0 : index
    %c0_54 = arith.constant 0 : index
    %c0_55 = arith.constant 0 : index
    %c0_56 = arith.constant 0 : index
    %120 = vector.load %arg22[%c0_53, %c0_54, %c0_55, %c0_56] : memref<1x4x8x8xf32, #tpu.memory_space<vmem>>, vector<1x4x8x8xf32>
    %121 = vector.shape_cast %120 : vector<1x4x8x8xf32> to vector<4x8x8xf32>
    %122 = vector.shape_cast %119 : vector<4x8x8xf32> to vector<1x4x8x8xf32>
    tpu.vector_store %arg22[%c0_53, %c0_54, %c0_55, %c0_56], %122 {strides = array<i32>} : memref<1x4x8x8xf32, #tpu.memory_space<vmem>>, vector<1x4x8x8xf32>,
    %123 = arith.truncf %119 : vector<4x8x8xf32> to vector<4x8x8xbf16>
    "tpu.trace_start"() <{level = 10 : i32, message = "hqk,khd->qhd"}> : () -> ()
    %cst_57 = arith.constant dense<0.000000e+00> : vector<4x8x8xf32>
    %124 = tpu.matmul %101, %123, %cst_57 {dimension_numbers = #tpu.dot_dimension_numbers<[0], [2], [2], [1], [0, 1, 0, 2, 1, 1], [1], [0]>} : vector<8x4x8xbf16>, vector<4x8x8xbf16>, vector<4x8x8xf32> -> vector<4x8x8xf32>
    %125 = tpu.transpose %124, [2, 0, 1] : vector<4x8x8xf32> -> vector<8x4x8xf32>
    "tpu.trace_stop"() : () -> ()
    %126 = vector.shape_cast %125 : vector<8x4x8xf32> to vector<8x32xf32>
    %127 = arith.truncf %126 : vector<8x32xf32> to vector<8x32xbf16>
    %cst_58 = arith.constant dense<0.000000e+00> : vector<8x32xf32>
    %128 = tpu.matmul %127, %93, %cst_58 {dimension_numbers = #tpu.dot_dimension_numbers<[1], [0], [0], [1], [0, 0, 1, 1], [], []>} : vector<8x32xbf16>, vector<32x32xbf16>, vector<8x32xf32> -> vector<8x32xf32>
    %129 = arith.addf %128, %84 : vector<8x32xf32>
    %cst_59 = arith.constant dense<0.000000e+00> : vector<8xf32>
    %130 = vector.multi_reduction <add>, %129, %cst_59 [1] : vector<8x32xf32> to vector<8xf32>
    %131 = vector.shape_cast %130 : vector<8xf32> to vector<8x1xf32>
    %cst_60 = arith.constant 3.200000e+01 : f32
    %132 = vector.broadcast %cst_60 : f32 to vector<8x1xf32>
    %133 = arith.divf %131, %132 : vector<8x1xf32>
    %134 = vector.broadcast %133 : vector<8x1xf32> to vector<8x32xf32>
    %135 = arith.subf %129, %134 : vector<8x32xf32>
    %136 = arith.mulf %135, %135 : vector<8x32xf32>
    %cst_61 = arith.constant dense<0.000000e+00> : vector<8xf32>
    %137 = vector.multi_reduction <add>, %136, %cst_61 [1] : vector<8x32xf32> to vector<8xf32>
    %138 = vector.shape_cast %137 : vector<8xf32> to vector<8x1xf32>
    %cst_62 = arith.constant 3.200000e+01 : f32
    %139 = vector.broadcast %cst_62 : f32 to vector<8x1xf32>
    %140 = arith.divf %138, %139 : vector<8x1xf32>
    %141 = vector.broadcast %133 : vector<8x1xf32> to vector<8x32xf32>
    %142 = arith.subf %129, %141 : vector<8x32xf32>
    %cst_63 = arith.constant 9.99999974E-6 : f32
    %143 = vector.broadcast %cst_63 : f32 to vector<8x1xf32>
    %144 = arith.addf %140, %143 : vector<8x1xf32>
    %145 = math.rsqrt %144 : vector<8x1xf32>
    %146 = vector.broadcast %145 : vector<8x1xf32> to vector<8x32xf32>
    %147 = arith.mulf %142, %146 : vector<8x32xf32>
    %148 = vector.broadcast %94 : vector<1x32xf32> to vector<8x32xf32>
    %149 = arith.mulf %147, %148 : vector<8x32xf32>
    %150 = vector.broadcast %95 : vector<1x32xf32> to vector<8x32xf32>
    %151 = arith.addf %149, %150 : vector<8x32xf32>
    %152 = arith.truncf %151 : vector<8x32xf32> to vector<8x32xbf16>
    %c0_64 = arith.constant 0 : index
    %c0_65 = arith.constant 0 : index
    %153 = vector.load %arg14[%c0_64, %c0_65] : memref<32x64xbf16, #tpu.memory_space<vmem>>, vector<32x64xbf16>
    %cst_66 = arith.constant dense<0.000000e+00> : vector<8x64xf32>
    %154 = tpu.matmul %152, %153, %cst_66 {dimension_numbers = #tpu.dot_dimension_numbers<[1], [0], [0], [1], [0, 0, 1, 1], [], []>} : vector<8x32xbf16>, vector<32x64xbf16>, vector<8x64xf32> -> vector<8x64xf32>
    %c0_67 = arith.constant 0 : index
    %c0_68 = arith.constant 0 : index
    %155 = vector.load %arg15[%c0_67, %c0_68] : memref<1x64xf32, #tpu.memory_space<vmem>>, vector<1x64xf32>
    %156 = vector.broadcast %155 : vector<1x64xf32> to vector<8x64xf32>
    %157 = arith.addf %154, %156 : vector<8x64xf32>
    %cst_69 = arith.constant 0.000000e+00 : f32
    %158 = vector.broadcast %cst_69 : f32 to vector<8x64xf32>
    %159 = arith.maximumf %157, %158 : vector<8x64xf32>
    %160 = arith.truncf %159 : vector<8x64xf32> to vector<8x64xbf16>
    %c0_70 = arith.constant 0 : index
    %c0_71 = arith.constant 0 : index
    %161 = vector.load %arg16[%c0_70, %c0_71] : memref<64x32xbf16, #tpu.memory_space<vmem>>, vector<64x32xbf16>
    %cst_72 = arith.constant dense<0.000000e+00> : vector<8x32xf32>
    %162 = tpu.matmul %160, %161, %cst_72 {dimension_numbers = #tpu.dot_dimension_numbers<[1], [0], [0], [1], [0, 0, 1, 1], [], []>} : vector<8x64xbf16>, vector<64x32xbf16>, vector<8x32xf32> -> vector<8x32xf32>
    %c0_73 = arith.constant 0 : index
    %c0_74 = arith.constant 0 : index
    %163 = vector.load %arg17[%c0_73, %c0_74] : memref<1x32xf32, #tpu.memory_space<vmem>>, vector<1x32xf32>
    %164 = vector.broadcast %163 : vector<1x32xf32> to vector<8x32xf32>
    %165 = arith.addf %162, %164 : vector<8x32xf32>
    %166 = arith.addf %165, %151 : vector<8x32xf32>
    %c0_75 = arith.constant 0 : index
    %c0_76 = arith.constant 0 : index
    %167 = vector.load %arg18[%c0_75, %c0_76] : memref<1x32xf32, #tpu.memory_space<vmem>>, vector<1x32xf32>
    %c0_77 = arith.constant 0 : index
    %c0_78 = arith.constant 0 : index
    %168 = vector.load %arg19[%c0_77, %c0_78] : memref<1x32xf32, #tpu.memory_space<vmem>>, vector<1x32xf32>
    %cst_79 = arith.constant dense<0.000000e+00> : vector<8xf32>
    %169 = vector.multi_reduction <add>, %166, %cst_79 [1] : vector<8x32xf32> to vector<8xf32>
    %170 = vector.shape_cast %169 : vector<8xf32> to vector<8x1xf32>
    %cst_80 = arith.constant 3.200000e+01 : f32
    %171 = vector.broadcast %cst_80 : f32 to vector<8x1xf32>
    %172 = arith.divf %170, %171 : vector<8x1xf32>
    %173 = vector.broadcast %172 : vector<8x1xf32> to vector<8x32xf32>
    %174 = arith.subf %166, %173 : vector<8x32xf32>
    %175 = arith.mulf %174, %174 : vector<8x32xf32>
    %cst_81 = arith.constant dense<0.000000e+00> : vector<8xf32>
    %176 = vector.multi_reduction <add>, %175, %cst_81 [1] : vector<8x32xf32> to vector<8xf32>
    %177 = vector.shape_cast %176 : vector<8xf32> to vector<8x1xf32>
    %cst_82 = arith.constant 3.200000e+01 : f32
    %178 = vector.broadcast %cst_82 : f32 to vector<8x1xf32>
    %179 = arith.divf %177, %178 : vector<8x1xf32>
    %180 = vector.broadcast %172 : vector<8x1xf32> to vector<8x32xf32>
    %181 = arith.subf %166, %180 : vector<8x32xf32>
    %cst_83 = arith.constant 9.99999974E-6 : f32
    %182 = vector.broadcast %cst_83 : f32 to vector<8x1xf32>
    %183 = arith.addf %179, %182 : vector<8x1xf32>
    %184 = math.rsqrt %183 : vector<8x1xf32>
    %185 = vector.broadcast %184 : vector<8x1xf32> to vector<8x32xf32>
    %186 = arith.mulf %181, %185 : vector<8x32xf32>
    %187 = vector.broadcast %167 : vector<1x32xf32> to vector<8x32xf32>
    %188 = arith.mulf %186, %187 : vector<8x32xf32>
    %189 = vector.broadcast %168 : vector<1x32xf32> to vector<8x32xf32>
    %190 = arith.addf %188, %189 : vector<8x32xf32>
    %c0_84 = arith.constant 0 : index
    %c0_85 = arith.constant 0 : index
    %c0_86 = arith.constant 0 : index
    %191 = vector.load %arg20[%c0_84, %c0_85, %c0_86] : memref<1x8x32xf32, #tpu.memory_space<vmem>>, vector<1x8x32xf32>
    %192 = vector.shape_cast %191 : vector<1x8x32xf32> to vector<8x32xf32>
    %193 = vector.shape_cast %190 : vector<8x32xf32> to vector<1x8x32xf32>
    tpu.vector_store %arg20[%c0_84, %c0_85, %c0_86], %193 {strides = array<i32>} : memref<1x8x32xf32, #tpu.memory_space<vmem>>, vector<1x8x32xf32>,
    return
  }
  func.func @transform_0(%arg0: i32) -> (i32, i32, i32) {
    %c0_i32 = arith.constant 0 : i32
    %c0_i32_0 = arith.constant 0 : i32
    %c0_i32_1 = arith.constant 0 : i32
    return %arg0, %c0_i32, %c0_i32_0 : i32, i32, i32
  }
  func.func @transform_1(%arg0: i32) -> (i32, i32, i32) {
    %c0_i32 = arith.constant 0 : i32
    %c0_i32_0 = arith.constant 0 : i32
    %c0_i32_1 = arith.constant 0 : i32
    return %arg0, %c0_i32, %c0_i32_0 : i32, i32, i32
  }
  func.func @transform_2(%arg0: i32) -> (i32, i32, i32) {
    %c0_i32 = arith.constant 0 : i32
    %c0_i32_0 = arith.constant 0 : i32
    %c0_i32_1 = arith.constant 0 : i32
    return %arg0, %c0_i32, %c0_i32_0 : i32, i32, i32
  }
  func.func @transform_3(%arg0: i32) -> (i32, i32, i32) {
    %c0_i32 = arith.constant 0 : i32
    %c0_i32_0 = arith.constant 0 : i32
    %c0_i32_1 = arith.constant 0 : i32
    return %arg0, %c0_i32, %c0_i32_0 : i32, i32, i32
  }
  func.func @transform_4(%arg0: i32) -> (i32, i32) {
    %c0_i32 = arith.constant 0 : i32
    %c0_i32_0 = arith.constant 0 : i32
    %c0_i32_1 = arith.constant 0 : i32
    return %c0_i32, %c0_i32_0 : i32, i32
  }
  func.func @transform_5(%arg0: i32) -> (i32, i32) {
    %c0_i32 = arith.constant 0 : i32
    %c0_i32_0 = arith.constant 0 : i32
    %c0_i32_1 = arith.constant 0 : i32
    return %c0_i32, %c0_i32_0 : i32, i32
  }
  func.func @transform_6(%arg0: i32) -> (i32, i32) {
    %c0_i32 = arith.constant 0 : i32
    %c0_i32_0 = arith.constant 0 : i32
    %c0_i32_1 = arith.constant 0 : i32
    return %c0_i32, %c0_i32_0 : i32, i32
  }
  func.func @transform_7(%arg0: i32) -> (i32, i32) {
    %c0_i32 = arith.constant 0 : i32
    %c0_i32_0 = arith.constant 0 : i32
    %c0_i32_1 = arith.constant 0 : i32
    return %c0_i32, %c0_i32_0 : i32, i32
  }
  func.func @transform_8(%arg0: i32) -> (i32, i32) {
    %c0_i32 = arith.constant 0 : i32
    %c0_i32_0 = arith.constant 0 : i32
    %c0_i32_1 = arith.constant 0 : i32
    return %c0_i32, %c0_i32_0 : i32, i32
  }
  func.func @transform_9(%arg0: i32) -> (i32, i32) {
    %c0_i32 = arith.constant 0 : i32
    %c0_i32_0 = arith.constant 0 : i32
    %c0_i32_1 = arith.constant 0 : i32
    return %c0_i32, %c0_i32_0 : i32, i32
  }
  func.func @transform_10(%arg0: i32) -> (i32, i32) {
    %c0_i32 = arith.constant 0 : i32
    %c0_i32_0 = arith.constant 0 : i32
    %c0_i32_1 = arith.constant 0 : i32
    return %c0_i32, %c0_i32_0 : i32, i32
  }
  func.func @transform_11(%arg0: i32) -> (i32, i32) {
    %c0_i32 = arith.constant 0 : i32
    %c0_i32_0 = arith.constant 0 : i32
    %c0_i32_1 = arith.constant 0 : i32
    return %c0_i32, %c0_i32_0 : i32, i32
  }
  func.func @transform_12(%arg0: i32) -> (i32, i32) {
    %c0_i32 = arith.constant 0 : i32
    %c0_i32_0 = arith.constant 0 : i32
    %c0_i32_1 = arith.constant 0 : i32
    return %c0_i32, %c0_i32_0 : i32, i32
  }
  func.func @transform_13(%arg0: i32) -> (i32, i32) {
    %c0_i32 = arith.constant 0 : i32
    %c0_i32_0 = arith.constant 0 : i32
    %c0_i32_1 = arith.constant 0 : i32
    return %c0_i32, %c0_i32_0 : i32, i32
  }
  func.func @transform_14(%arg0: i32) -> (i32, i32) {
    %c0_i32 = arith.constant 0 : i32
    %c0_i32_0 = arith.constant 0 : i32
    %c0_i32_1 = arith.constant 0 : i32
    return %c0_i32, %c0_i32_0 : i32, i32
  }
  func.func @transform_15(%arg0: i32) -> (i32, i32) {
    %c0_i32 = arith.constant 0 : i32
    %c0_i32_0 = arith.constant 0 : i32
    %c0_i32_1 = arith.constant 0 : i32
    return %c0_i32, %c0_i32_0 : i32, i32
  }
  func.func @transform_16(%arg0: i32) -> (i32, i32) {
    %c0_i32 = arith.constant 0 : i32
    %c0_i32_0 = arith.constant 0 : i32
    %c0_i32_1 = arith.constant 0 : i32
    return %c0_i32, %c0_i32_0 : i32, i32
  }
  func.func @transform_17(%arg0: i32) -> (i32, i32) {
    %c0_i32 = arith.constant 0 : i32
    %c0_i32_0 = arith.constant 0 : i32
    %c0_i32_1 = arith.constant 0 : i32
    return %c0_i32, %c0_i32_0 : i32, i32
  }
  func.func @transform_18(%arg0: i32) -> (i32, i32) {
    %c0_i32 = arith.constant 0 : i32
    %c0_i32_0 = arith.constant 0 : i32
    %c0_i32_1 = arith.constant 0 : i32
    return %c0_i32, %c0_i32_0 : i32, i32
  }
  func.func @transform_19(%arg0: i32) -> (i32, i32, i32) {
    %c0_i32 = arith.constant 0 : i32
    %c0_i32_0 = arith.constant 0 : i32
    %c0_i32_1 = arith.constant 0 : i32
    return %arg0, %c0_i32, %c0_i32_0 : i32, i32, i32
  }
  func.func @transform_20(%arg0: i32) -> (i32, i32, i32, i32) {
    %c0_i32 = arith.constant 0 : i32
    %c0_i32_0 = arith.constant 0 : i32
    %c0_i32_1 = arith.constant 0 : i32
    %c0_i32_2 = arith.constant 0 : i32
    return %arg0, %c0_i32, %c0_i32_0, %c0_i32_1 : i32, i32, i32, i32
  }
  func.func @transform_21(%arg0: i32) -> (i32, i32, i32, i32) {
    %c0_i32 = arith.constant 0 : i32
    %c0_i32_0 = arith.constant 0 : i32
    %c0_i32_1 = arith.constant 0 : i32
    %c0_i32_2 = arith.constant 0 : i32
    return %arg0, %c0_i32, %c0_i32_0, %c0_i32_1 : i32, i32, i32, i32
  }
}

</mosaic_0001>

<bundles_post_ra>
// kernel: tpu_custom_call.1
= control target key start
LH: loop header
LB: loop body
LE: loop exit
PB: predicated region body
PF: predicated region fallthrough
CT: control target
= control target key end

     0   :  { %s7373_s0 = inlined_call_operand.vmem [shape: f32[2,8,32], index: 0, kind: input, shape index: {}]   ;;  %s7374_s1 = inlined_call_operand.vmem [shape: f32[2,8,32], index: 1, kind: input, shape index: {}]   ;;  %s7375_s2 = inlined_call_operand.hbm [shape: s32[2,1,8], index: 2, kind: input, shape index: {}]   ;;  %s7376_s3 = inlined_call_operand.hbm [shape: s32[2,1,8], index: 3, kind: input, shape index: {}]   ;;  %s7377_s4 = inlined_call_operand.vmem [shape: bf16[32,96], index: 4, kind: input, shape index: {}]   ;;  %s7378_s5 = inlined_call_operand.hbm [shape: bf16[32,32], index: 5, kind: input, shape index: {}]   ;;  %s7379_s6 = inlined_call_operand.hbm [shape: f32[1,32], index: 6, kind: input, shape index: {}]   ;;  %s7380_s7 = inlined_call_operand.hbm [shape: f32[1,32], index: 7, kind: input, shape index: {}]   ;;  %s7381_s8 = inlined_call_operand.hbm [shape: bf16[32,32], index: 8, kind: input, shape index: {}]   ;;  %s7382_s9 = inlined_call_operand.vmem [shape: bf16[32,64], index: 9, kind: input, shape index: {}]   ;;  %s7383_s10 = inlined_call_operand.hbm [shape: bf16[32,32], index: 10, kind: input, shape index: {}]   ;;  %s7384_s11 = inlined_call_operand.vmem [shape: f32[1,32], index: 11, kind: input, shape index: {}]   ;;  %s7385_s12 = inlined_call_operand.vmem [shape: f32[1,32], index: 12, kind: input, shape index: {}]   ;;  %s7386_s13 = inlined_call_operand.hbm [shape: bf16[32,64], index: 13, kind: input, shape index: {}]   ;;  %s7387_s14 = inlined_call_operand.vmem [shape: f32[1,64], index: 14, kind: input, shape index: {}]   ;;  %s7388_s15 = inlined_call_operand.vmem [shape: bf16[64,32], index: 15, kind: input, shape index: {}]   ;;  %s7389_s16 = inlined_call_operand.vmem [shape: f32[1,32], index: 16, kind: input, shape index: {}]   ;;  %s7390_s17 = inlined_call_operand.vmem [shape: f32[1,32], index: 17, kind: input, shape index: {}]   ;;  %s7391_s18 = inlined_call_operand.vmem [shape: f32[1,32], index: 18, kind: input, shape index: {}]   ;;  %s7392_s19 = inlined_call_operand.hbm [shape: f32[2,8,32], index: 19, kind: output, shape index: {0}]   ;;  %s7393_s20 = inlined_call_operand.hbm [shape: f32[2,4,8,8], index: 20, kind: output, shape index: {1}]   ;;  %s7394_s21 = inlined_call_operand.hbm [shape: f32[2,4,8,8], index: 21, kind: output, shape index: {2}]  }
   0x1   :  { %7418 = sst [smem:[#allocation31_spill]] %s7373_s0 }
   0x2   :  { %7419 = sst [smem:[#allocation32_spill]] %s7374_s1 }
   0x3   :  { %7420 = sst [smem:[#allocation33_spill]] %s7375_s2 }
   0x4   :  { %7421 = sst [smem:[#allocation34_spill]] %s7376_s3 }
   0x5   :  { %7422 = sst [smem:[#allocation35_spill]] %s7377_s4 }
   0x6   :  { %7423 = sst [smem:[#allocation36_spill]] %s7378_s5 }
   0x7   :  { %7424 = sst [smem:[#allocation37_spill]] %s7379_s6 }
   0x8   :  { %7425 = sst [smem:[#allocation38_spill]] %s7380_s7 }
   0x9   :  { %7426 = sst [smem:[#allocation39_spill]] %s7381_s8 }
   0xa   :  { %7427 = sst [smem:[#allocation40_spill]] %s7383_s10 }
   0xb   :  { %7428 = sst [smem:[#allocation41_spill]] %s7386_s13 }
   0xc   :  { %7429 = sst [smem:[#allocation42_spill]] %s7390_s17 }
   0xd   :  { %7430 = sst [smem:[#allocation43_spill]] %s7391_s18 }
   0xe   :  { %7431 = sst [smem:[#allocation44_spill]] %s7392_s19 }
   0xf   :  { %7432 = sst [smem:[#allocation45_spill]] %s7393_s20 }
  0x10   :  { %7433 = sst [smem:[#allocation46_spill]] %s7394_s21 }
  0x11   :  { %27 = vsyncpa [#allocation3], 0 }
  0x12   :  { %29 = vsyncpa [#allocation3 + $0x1], 0 }
  0x13   :  { %30 = vsyncpa [#allocation6], 0 }
  0x14   :  { %32 = vsyncpa [#allocation6 + $0x1], 0 }
  0x15   :  { %33 = vsyncpa [#allocation9], 0 }
  0x16   :  { %34 = vsyncpa [#allocation12], 0 }
  0x17   :  { %35 = vsyncpa [#allocation15], 0 }
  0x18   :  { %36 = vsyncpa [#allocation4], 0 }
  0x19   :  { %38 = vsyncpa [#allocation4 + $0x1], 0 }
  0x1a   :  { %39 = vsyncpa [#allocation18], 0 }
  0x1b   :  { %41 = vsyncpa [#allocation18 + $0x1], 0  ;;  %s6418_s2 = smov 0   ;;  %s6420_s25 = smov 0  }
  0x1c   :  { %s6422_s26 = smov 0   ;;  %s6424_s27 = smov 0  }
  0x1d LB: > { %7434 = sst [smem:[#allocation28_spill]] %s6275_s26  ;;  %s6281_s3 = smov [#allocation7]   ;;  %s6279_s27 = sphi %s6424_s27, %s7486_s27   ;;  %s6275_s26 = sphi %s6422_s26, %s7488_s26   ;;  %s6271_s25 = sphi %s6420_s25, %s7490_s25   ;;  %s6267_s2 = sphi %s6418_s2, %s7489_s2  }
  0x1e   : > { %s564_s28 = sshll.u32 %s6281_s3, 4  ;;  %s6439_s29 = sadd.s32 4294967295, %s6279_s27   ;;  %s565_s28 = int_to_ptr.vmem [resolvable:$true] %s564_s28 }
  0x1f   : > { %p5430_p0 = scmp.ge.s32.totalorder %s6279_s27, 1  ;;  %p7401_p1 = scmp.eq.s32.totalorder %s6439_s29, 0 }
  0x20   : > { %p549_p2 = scmp.lt.s32.totalorder %s6279_s27, 3  ;;  %s6282_s4 = smov [#allocation8]  }
  0x21   : > { %s578_s30 = sshll.u32 %s6282_s4, 4  ;;  %s6283_s22 = smov [#allocation11]   ;;  %s579_s30 = int_to_ptr.vmem [resolvable:$true] %s578_s30 }
  0x22   : > { %p6444_p3 = pnand %p5430_p0, %p549_p2  ;;  %s599_s23 = sshll.u32 %s6283_s22, 4  ;;  %s6457_s23 = int_to_ptr.vmem [resolvable:$true] %s599_s23 }
  0x23   : > { %s5938_s24 = scalar_lea.vmem %s565_s28, 256  ;;  %p5946_p11 = scmp.lt.s32.totalorder %s565_s28, %s565_s28 }
  0x24   : > { %s7435_s0 = scalar_select %p6444_p3, 1, 0 }
  0x25   : > { %p5768_p5 = pneg %p6444_p3  ;;  %p5939_p8 = scmp.ne.s32.totalorder %s565_s28, %s5938_s24 }
  0x26   : > { %p5947_p12 = scmp.lt.s32.totalorder %s5938_s24, %s5938_s24 }
  0x27   : > { %p6453_p6 = pnand %p5768_p5, %p7401_p1 }
  0x28   : > { %p5948_p13 = por %p5947_p12, %p5946_p11 }
  0x29   : > { %p6461_p7 = pneg %p6453_p6 }
  0x2b   : > { %p5941_p9 = pnand %p5939_p8, %p6461_p7 }
  0x2d   : > { %p5942_p10 = pneg %p5941_p9 }
  0x2f   : > { %p5949_p0 = pnand %p5948_p13, %p5942_p10 }
  0x31   : > { %5952 = shalt.err (!%p5949_p0)
}
  0x32   : > { %s6284_s3 = smov 64   ;;  %s6285_s4 = smov 4  }
  0x33   : > { %s7438_s18 = sld [smem:[#allocation36_spill]]  ;;  %s5964_s17 = scalar_lea.vmem %s579_s30, 16 }
  0x34   : > { %p5965_p2 = scmp.ne.s32.totalorder %s579_s30, %s5964_s17  ;;  %s5971_s24 = scalar_lea.vmem %s579_s30, 32 }
  0x35   : > { %p5972_p9 = scmp.lt.s32.totalorder %s579_s30, %s579_s30  ;;  %p5973_p10 = scmp.lt.s32.totalorder %s5971_s24, %s5964_s17 }
  0x36   : > { %p5967_p5 = pnand %p5965_p2, %p6461_p7 }
  0x37   : > { %p5974_p11 = por %p5973_p10, %p5972_p9 }
  0x38   : > { %p5968_p8 = pneg %p5967_p5 }
  0x39   : > { %5771 = dma.hbm_to_vmem [thread:$0]  (!%p6453_p6), %s7438_s18, 256, %s565_s28, [#allocation6], %s6284_s3, %s6284_s3, %s6285_s4  }
  0x3a   : > { %p5975_p12 = pnand %p5974_p11, %p5968_p8 }
  0x3c   : > { %5978 = shalt.err (!%p5975_p12)
}
  0x3d   : > { %s7439_s6 = sld [smem:[#allocation37_spill]]  ;;  %s5990_s18 = scalar_lea.vmem %s6457_s23, 256 }
  0x3e   : > { %p5991_p13 = scmp.ne.s32.totalorder %s6457_s23, %s5990_s18  ;;  %p5998_p5 = scmp.lt.s32.totalorder %s6457_s23, %s6457_s23 }
  0x3f   : > { %p5999_p9 = scmp.lt.s32.totalorder %s5990_s18, %s5990_s18 }
  0x40   : > { %p5993_p0 = pnand %p5991_p13, %p6461_p7 }
  0x41   : > { %p6000_p8 = por %p5999_p9, %p5998_p5 }
  0x42   : > { %p5994_p2 = pneg %p5993_p0 }
  0x43   : > { %5774 = dma.hbm_to_vmem [thread:$0]  (!%p6453_p6), %s7439_s6, 16, %s579_s30, [#allocation9]  }
  0x44   : > { %p6001_p10 = pnand %p6000_p8, %p5994_p2 }
  0x46   : > { %6004 = shalt.err (!%p6001_p10)
}
  0x47   : > { %s7440_s8 = sld [smem:[#allocation39_spill]]  ;;  %s6286_s20 = smov [#allocation10]  }
  0x48   : > { %s589_s21 = sshll.u32 %s6286_s20, 4  ;;  %s6287_s28 = smov [#allocation13]   ;;  %s590_s21 = int_to_ptr.vmem [resolvable:$true] %s589_s21 }
  0x49   : > { %s615_s30 = sshll.u32 %s6287_s28, 4  ;;  %s6016_s22 = scalar_lea.vmem %s590_s21, 16  ;;  %s616_s30 = int_to_ptr.vmem [resolvable:$true] %s615_s30 }
  0x4a   : > { %p6017_p11 = scmp.ne.s32.totalorder %s590_s21, %s6016_s22  ;;  %s6023_s24 = scalar_lea.vmem %s590_s21, 32 }
  0x4b   : > { %p6024_p0 = scmp.lt.s32.totalorder %s590_s21, %s590_s21  ;;  %p6025_p2 = scmp.lt.s32.totalorder %s6023_s24, %s6016_s22 }
  0x4c   : > { %p6019_p12 = pnand %p6017_p11, %p6461_p7 }
  0x4d   : > { %5780 = dma.hbm_to_vmem [thread:$0]  (!%p6453_p6), %s7440_s8, 256, %s6457_s23, [#allocation12], %s6284_s3, %s6284_s3, %s6285_s4  }
  0x4e   : > { %p6020_p13 = pneg %p6019_p12  ;;  %p6026_p5 = por %p6025_p2, %p6024_p0 }
  0x50   : > { %p6027_p9 = pnand %p6026_p5, %p6020_p13 }
  0x52   : > { %6030 = shalt.err (!%p6027_p9)
}
  0x53   : > { %s7441_s7 = sld [smem:[#allocation38_spill]]  ;;  %s6042_s17 = scalar_lea.vmem %s616_s30, 256 }
  0x54   : > { %p6043_p8 = scmp.ne.s32.totalorder %s616_s30, %s6042_s17  ;;  %p6050_p12 = scmp.lt.s32.totalorder %s616_s30, %s616_s30 }
  0x55   : > { %p6051_p4 = scmp.lt.s32.totalorder %s6042_s17, %s6042_s17 }
  0x56   : > { %p6045_p10 = pnand %p6043_p8, %p6461_p7 }
  0x57   : > { %p6052_p1 = por %p6051_p4, %p6050_p12 }
  0x58   : > { %p6046_p11 = pneg %p6045_p10 }
  0x59   : > { %5777 = dma.hbm_to_vmem [thread:$0]  (!%p6453_p6), %s7441_s7, 16, %s590_s21, [#allocation9]  }
  0x5a   : > { %p6053_p3 = pnand %p6052_p1, %p6046_p11 }
  0x5c   : > { %6056 = shalt.err (!%p6053_p3)
}
  0x5d   : > { %s7442_s10 = sld [smem:[#allocation40_spill]]  ;;  %s6288_s21 = smov [#allocation14]  }
  0x5e   : > { %s634_s28 = sshll.u32 %s6288_s21, 4  ;;  %s635_s28 = int_to_ptr.vmem [resolvable:$true] %s634_s28 }
  0x5f   : > { %s6068_s22 = scalar_lea.vmem %s635_s28, 256  ;;  %p6076_p1 = scmp.lt.s32.totalorder %s635_s28, %s635_s28 }
  0x60   : > { %p6069_p13 = scmp.ne.s32.totalorder %s635_s28, %s6068_s22  ;;  %p6077_p3 = scmp.lt.s32.totalorder %s6068_s22, %s6068_s22 }
  0x62   : > { %p6071_p0 = pnand %p6069_p13, %p6461_p7  ;;  %p6078_p2 = por %p6077_p3, %p6076_p1 }
  0x63   : > { %5783 = dma.hbm_to_vmem [thread:$0]  (!%p6453_p6), %s7442_s10, 256, %s616_s30, [#allocation12], %s6284_s3, %s6284_s3, %s6285_s4  }
  0x64   : > { %p6072_p4 = pneg %p6071_p0 }
  0x66   : > { %p6079_p5 = pnand %p6078_p2, %p6072_p4 }
  0x68   : > { %6082 = shalt.err (!%p6079_p5)
}
  0x69   : > { %s7443_s13 = sld [smem:[#allocation41_spill]]  ;;  %s7403_s5 = sadd.s32 4294967294, %s6279_s27  }
  0x6a   : > { %s6526_s1 = sadd.s32 1, %s6279_s27   ;;  %s106_s23 = sadd.s32 1, %s6275_s26 }
  0x6b   : > { %7444 = sst [smem:[#allocation29_spill]] %s6526_s1  ;;  %s103_s18 = ssub.s32 %s6279_s27, %s6526_s1 }
  0x6c   : > { %p104_p7 = scmp.eq.s32.totalorder %s103_s18, 0  ;;  %p113_p9 = scmp.ne.s32.totalorder %s6275_s26, %s6271_s25 }
  0x6d   : > { %p114_p8 = scmp.eq.s32.totalorder %s6279_s27, 0  ;;  %p119_p10 = scmp.ne.s32.totalorder %s6271_s25, %s6267_s2 }
  0x6e   : > { %s6537_s17 = scalar_select %p104_p7, %s6275_s26, %s106_s23  }
  0x6f   : > { %5786 = dma.hbm_to_vmem [thread:$0]  (!%p6453_p6), %s7443_s13, 256, %s635_s28, [#allocation15], %s6284_s3, %s6284_s3, %s6285_s4  }
  0x70   : > { %7445 = sst [smem:[#allocation30_spill]] %s6537_s17  ;;  %p6539_p11 = por %p114_p8, %p113_p9 }
  0x71   : > { %p7447_p12 = scmp.eq.s32.totalorder %s6439_s29, 0  ;;  %p484_p13 = scmp.eq.s32.totalorder %s6439_s29, 1 }
  0x72   : > { %p490_p0 = scmp.eq.s32.totalorder %s7403_s5, 1  ;;  %p5810_p4 = scmp.lt.s32.totalorder %s6279_s27, 2 }
  0x73   : > { %p6545_p6 = por %p7447_p12, %p119_p10  ;;  %s6554_s4 = sand.u32 1, %s6275_s26  }
  0x74   : > { %p6556_p1 = por %p484_p13, %p113_p9  ;;  %p6560_p3 = por %p490_p0, %p119_p10 }
  0x75   : > { %s7448_s3 = scalar_select %p6545_p6, 1, 0 }
  0x76   : > { %s7449_s20 = scalar_select %p6556_p1, 1, 0 }
  0x77   : > { %s7450_s21 = scalar_select %p6560_p3, 1, 0 }
  0x78   : > { %s5438_s28 = sshll.u32 %s6279_s27, 4  ;;  %s680_s22 = scalar_lea.vmem [#allocation2], %s6554_s4 }
  0x79   : > { %s687_s24 = sshll.u32 %s680_s22, 4  ;;  %s7451_s23 = sld [smem:[#allocation33_spill]]  ;;  %s6571_s24 = int_to_ptr.vmem [resolvable:$true] %s687_s24 }
  0x7a   : > { %p6575_p2 = pnand %p5810_p4, %p6539_p11  ;;  %s7453_s10 = sld [smem:[#allocation34_spill]] }
  0x7b   : > { %s694_s30 = sand.u32 1, %s6279_s27   ;;  %s678_s18 = scalar_lea.sflag [#allocation3], %s6554_s4 }
  0x7c   : > { %p6085_p7 = pneg %p6575_p2 }
  0x7f   : > { %s6569_s5 = scalar_lea.hbm %s7451_s23, %s5438_s28  ;;  %s6088_s26 = scalar_lea.hbm %s7451_s23, 32 }
  0x80   : > { %s6582_s22 = scalar_lea.hbm %s7453_s10, %s5438_s28  ;;  %s6083_s13 = scalar_lea.hbm %s6569_s5, 16 }
  0x81   : > { %p6084_p5 = scmp.ne.s32.totalorder %s6569_s5, %s6083_s13  ;;  %p6089_p10 = scmp.lt.s32.totalorder %s6569_s5, %s7451_s23 }
  0x82   : > { %p6090_p11 = scmp.lt.s32.totalorder %s6088_s26, %s6083_s13 }
  0x83   : > { %p6086_p9 = pnand %p6085_p7, %p6084_p5 }
  0x84   : > { %p6091_p12 = por %p6090_p11, %p6089_p10 }
  0x85   : > { %p6087_p8 = pneg %p6086_p9 }
  0x87   : > { %p6092_p13 = pnand %p6091_p12, %p6087_p8 }
  0x89   : > { %6095 = shalt.err (!%p6092_p13)
}
  0x8a   : > { %s6096_s8 = scalar_lea.vmem %s6571_s24, 16  ;;  %s6289_s17 = smov [#allocation2]  }
  0x8b   : > { %p6097_p0 = scmp.ne.s32.totalorder %s6571_s24, %s6096_s8  ;;  %s6101_s28 = sshll.u32 %s6289_s17, 4  ;;  %s6102_s28 = int_to_ptr.vmem [resolvable:$false] %s6101_s28 }
  0x8c   : > { %s6103_s19 = scalar_lea.vmem %s6102_s28, 32  ;;  %p6104_p9 = scmp.lt.s32.totalorder %s6571_s24, %s6102_s28 }
  0x8d   : > { %p6099_p4 = pnand %p6097_p0, %p6085_p7  ;;  %p6105_p3 = scmp.lt.s32.totalorder %s6103_s19, %s6096_s8 }
  0x8f   : > { %p6100_p5 = pneg %p6099_p4  ;;  %p6106_p1 = por %p6105_p3, %p6104_p9 }
  0x91   : > { %p6107_p10 = pnand %p6106_p1, %p6100_p5 }
  0x93   : > { %6110 = shalt.err (!%p6107_p10)
}
  0x94   : > { %5790 = dma.hbm_to_vmem [thread:$0]  (!%p6575_p2), %s6569_s5, 16, %s6571_s24, %s678_s18  }
  0x95   : > { %s697_s13 = scalar_lea.vmem [#allocation5], %s6554_s4  ;;  %s695_s1 = scalar_lea.sflag [#allocation6], %s694_s30 }
  0x96   : > { %s704_s26 = sshll.u32 %s697_s13, 4  ;;  %s6111_s7 = scalar_lea.hbm %s6582_s22, 16  ;;  %s705_s26 = int_to_ptr.vmem [resolvable:$true] %s704_s26 }
  0x97   : > { %p6112_p3 = scmp.ne.s32.totalorder %s6582_s22, %s6111_s7  ;;  %s6116_s28 = scalar_lea.hbm %s7453_s10, 32 }
  0x98   : > { %p6117_p11 = scmp.lt.s32.totalorder %s6582_s22, %s7453_s10  ;;  %p6118_p12 = scmp.lt.s32.totalorder %s6116_s28, %s6111_s7 }
  0x99   : > { %p6114_p1 = pnand %p6112_p3, %p6085_p7 }
  0x9a   : > { %p6119_p13 = por %p6118_p12, %p6117_p11 }
  0x9b   : > { %p6115_p8 = pneg %p6114_p1 }
  0x9d   : > { %p6120_p0 = pnand %p6119_p13, %p6115_p8 }
  0x9f   : > { %6123 = shalt.err (!%p6120_p0)
}
  0xa0   : > { %s6124_s5 = scalar_lea.vmem %s705_s26, 16  ;;  %s6290_s4 = smov [#allocation5]  }
  0xa1   : > { %p6125_p4 = scmp.ne.s32.totalorder %s705_s26, %s6124_s5  ;;  %s6129_s24 = sshll.u32 %s6290_s4, 4  ;;  %s6130_s24 = int_to_ptr.vmem [resolvable:$false] %s6129_s24 }
  0xa2   : > { %s6131_s30 = scalar_lea.vmem %s6130_s24, 32  ;;  %p6132_p10 = scmp.lt.s32.totalorder %s705_s26, %s6130_s24 }
  0xa3   : > { %p6127_p5 = pnand %p6125_p4, %p6085_p7  ;;  %p6133_p3 = scmp.lt.s32.totalorder %s6131_s30, %s6124_s5 }
  0xa5   : > { %p6128_p9 = pneg %p6127_p5  ;;  %p6134_p1 = por %p6133_p3, %p6132_p10 }
  0xa7   : > { %p6135_p6 = pnand %p6134_p1, %p6128_p9 }
  0xa9   : > { %6138 = shalt.err (!%p6135_p6)
}
  0xaa   : > { %5793 = dma.hbm_to_vmem [thread:$0]  (!%p6575_p2), %s6582_s22, 16, %s705_s26, %s695_s1  }
  0xab   : > { %p7454_p8 = scmp.ne.s32.totalorder %s7435_s0, 0 }
  0xac   : > { %s6634_s23 = sand.u32 (!%p7454_p8), 1, %s6271_s25   ;;  %p7455_p7 = scmp.ne.s32.totalorder (!%p7454_p8), %s7448_s3, 0 }
  0xad   : > { %713 = sbr.rel (%p7454_p8) target bundleno = 5285 (0x14a5), region = 96  ;;  %s716_s18 = scalar_lea.sflag (!%p7454_p8), [#allocation3], %s6634_s23 }
  0xae   : > { %s718_s13 = scalar_lea.vmem (!%p7454_p8), [#allocation2], %s6634_s23 }
  0xb2   : > { %6234 = dma.done.wait (%p7455_p7), %s716_s18, 16  }
  0xb3   : > { %6236 = vsyncadd (%p7455_p7), %s716_s18, 4294967280  ;;  %s7410_s6 = sand.u32 1, %s6439_s29  }
  0xb4   : > { %s724_s0 = scalar_lea.sflag [#allocation6], %s7410_s6 }
  0xb5   : > { %6238 = dma.done.wait (%p7455_p7), %s724_s0, 16  }
  0xb6   : > { %6240 = vsyncadd (%p7455_p7), %s724_s0, 4294967280  ;;  %p7456_p6 = scmp.eq.s32.totalorder %s6439_s29, 0 }
  0xb8   : > { %6242 = dma.done.wait (%p7456_p6), [#allocation6], 256   ;;  %p7457_p2 = pmov %p7456_p6 }
  0xba   : > { %6244 = vsyncadd (%p7457_p2), [#allocation6], 4294967040  ;;  %p7458_p11 = pmov %p7457_p2 }
  0xbb   : > { %p7459_p12 = pmov %p7457_p2 }
  0xbc   : > { %6246 = dma.done.wait (%p7458_p11), [#allocation9], 32  }
  0xbd   : > { %6248 = vsyncadd (%p7459_p12), [#allocation9], 4294967264  ;;  %p7460_p13 = pmov %p7457_p2 }
  0xbe   : > { %p7461_p0 = pmov %p7457_p2 }
  0xbf   : > { %6250 = dma.done.wait (%p7460_p13), [#allocation12], 512  }
  0xc0   : > { %6252 = vsyncadd (%p7461_p0), [#allocation12], 4294966784  ;;  %p7462_p4 = pmov %p7461_p0 }
  0xc1   : > { %p7463_p5 = pmov %p7461_p0 }
  0xc2   : > { %6254 = dma.done.wait (%p7462_p4), [#allocation15], 256  }
  0xc3   : > { %6256 = vsyncadd (%p7463_p5), [#allocation15], 4294967040  ;;  %p830_p9 = scmp.lt.s32.totalorder %s6439_s29, 1  ;;  %v6291_v0 = vmov 0.0   ;;  %vm6292_vm0 = vmmov 0   ;;  %s7464_s8 = sld [smem:[#allocation31_spill]]  ;;  %v841_v12 = vlaneseq }
  0xc4   : > { %5578 = vmatprep.subr.bf16.mxu0 %v6291_v0  ;;  %5582 = vmatprep.mubr.msk.bf16.mxu0 %vm6292_vm0, %v6291_v0  ;;  %s7465_s5 = sld [smem:[#allocation35_spill]]  ;;  %vm874_vm1 = vcmask 261120   ;;  %s6293_s30 = smov 104   ;;  %v6297_v13 = vmov 1983009808   ;;  %vm1670_vm2 = vcmask 1043456  }
  0xc5   : > { %s6671_s3 = scalar_select %p830_p9, %s6439_s29, 1  ;;  %5592 = vmatprep.subr.bf16.mxu1 %v6291_v0  ;;  %5594 = vmatprep.mubr.msk.bf16.mxu1 %vm6292_vm0, %v6291_v0  ;;  %v937_v14 = vunpack.c.l.s4 %v6297_v13  ;;  %v6719_v15 = vshrl.u32 %v841_v12, 7  ;;  %v6298_v18 = vmov 1934713408   ;;  %vm1666_vm3 = vcmask 64512  }
  0xc6   : > { %s6294_s18 = smov 120   ;;  %s6295_s0 = smov 96   ;;  %v969_v19 = vunpack.c.l.s4 %v6298_v18  ;;  %vm2793_vm8 = vcmask 130048   ;;  %vm2795_vm9 = vcmask 195584   ;;  %vm5069_vm12 = vcmask 523264  }
  0xc7   : > { %s5450_s26 = sshll.u32 %s6671_s3, 3  ;;  %s6296_s1 = smov 112   ;;  %v938_v16 = vunpack.c.0.s8 %v937_v14 }
  0xc8   : > { %v970_v22 = vunpack.c.0.s8 %v969_v19  ;;  %s6300_s7 = smov 64   ;;  %s7414_s28 = smov 16  }
  0xc9   : > { %s6682_s17 = scalar_lea.vmem %s7464_s8, %s5450_s26  ;;  %v6722_v21 = vsub.s32 %v938_v16, %v6719_v15  ;;  %s7411_s19 = smov 8  }
  0xca   : > { %v5872_v1 = vld [vmem:[%s7465_s5 + $0x8] sm:$0xff]   ;;  %v5873_v2 = vld [vmem:[%s7465_s5] sm:$0xff]   ;;  %v6729_v33 = vsub.s32 %v970_v22, %v6719_v15  ;;  %s7413_s4 = smov 24   ;;  %s7469_s6 = scalar_lea.vmem [#allocation5], %s6634_s23 }
  0xcb   : > { %5579 = vmatpush3.bf16.msra.mxu0 %v5872_v1  ;;  %v839_v3 = vld [vmem:[%s6682_s17] sm:$0xff]  ;;  %s7470_s22 = sshll.u32 %s6634_s23, 5  ;;  %s7474_s24 = sld [smem:[#allocation45_spill]] }
  0xcc   : > { %5580 = vmatprep.subr.bf16.mxu0 %v6291_v0  ;;  %v857_v4 = vpack.c.bf16 %v839_v3, %v839_v3  ;;  %s7159_s3 = scalar_lea.vmem [#allocation19], %s7470_s22  ;;  %s7475_s22 = sand.u32 1, %s6439_s29  }
  0xcd   : > { %p7476_p3 = scmp.ne.s32.totalorder %s7449_s20, 0 }
  0xcf   : > { %5581 = vmatpush3.bf16.msra.mxu0 %v5873_v2 }
  0xd0   : > { %5586 = vmatprep.subr.bf16.mxu0 %v6291_v0 }
  0xd2   : > { %5583 = vmatmul.mubr.msk.bf16.vlgmr.msra.gmra.mxu0 %vm874_vm1, %v857_v4 }
  0xd3   : > { %5588 = vmatprep.mubr.msk.bf16.mxu0 %vm6292_vm0, %v6291_v0 }
 0x192   : > { %v6696_v5 = vpop.f32.mrf.mxu0 }
 0x193   : > { %931 = vrot.lane.b32.xlu1 %v6696_v5, %s6293_s30  ;;  %925 = vrot.lane.b32.xlu0 %v6696_v5, %s6294_s18 }
 0x194   : > { %v5584_v6 = vpop.f32.mrf.mxu0 }
 0x196   : > { %v915_v7 = vpop.f32.mrf.mxu0 }
 0x197   : > { %1010 = vrot.lane.b32.xlu1 %v6696_v5, %s6295_s0  ;;  %928 = vrot.lane.b32.xlu0 %v6696_v5, %s6296_s1 }
 0x198   : > { %v5585_v8 = vpop.f32.mrf.mxu0 }
 0x205   : > { %v6706_v9 = vpop.permute.xlu0 %925  ;;  %v6710_v10 = vpop.permute.xlu1 %931 }
 0x206   : > { %1012 = vrot.lane.b32.xlu0 %v6706_v9, %s6295_s0 }
 0x209   : > { %v6712_v11 = vpop.permute.xlu0 %928  ;;  %v1011_v17 = vpop.permute.xlu1 %1010 }
 0x20a   : > { %1016 = vrot.lane.b32.xlu0 %v6710_v10, %s6295_s0  ;;  %1014 = vrot.lane.b32.xlu1 %v6712_v11, %s6295_s0 }
 0x278   : > { %v1013_v20 = vpop.permute.xlu0 %1012 }
 0x27c   : > { %v1015_v23 = vpop.permute.xlu1 %1014  ;;  %v1017_v24 = vpop.permute.xlu0 %1016 }
 0x27d   : > { %v1022_v25 = vcombine.low %v1011_v17, %v1015_v23  ;;  %v1023_v26 = vcombine.high %v1011_v17, %v1015_v23  ;;  %v1038_v27 = vcombine.low %v1013_v20, %v1017_v24  ;;  %v1039_v28 = vcombine.high %v1013_v20, %v1017_v24 }
 0x27f   : > { %v1030_v29 = vrot.slane %v1022_v25, %v6722_v21  ;;  %v1037_v30 = vrot.slane %v1023_v26, %v6722_v21  ;;  %v1046_v31 = vrot.slane %v1038_v27, %v6722_v21  ;;  %v1053_v32 = vrot.slane %v1039_v28, %v6722_v21 }
 0x280   : > { %v6299_v28 = vmov 0  }
 0x281   : > { %v1055_v34 = vcombine.high %v1030_v29, %v1046_v31  ;;  %v1054_v35 = vcombine.low %v1030_v29, %v1046_v31  ;;  %v1070_v36 = vcombine.low %v1037_v30, %v1053_v32  ;;  %v1071_v39 = vcombine.high %v1037_v30, %v1053_v32 }
 0x283   : > { %v1069_v37 = vrot.slane %v1055_v34, %v6729_v33  ;;  %v1062_v38 = vrot.slane %v1054_v35, %v6729_v33  ;;  %v1078_v42 = vrot.slane %v1070_v36, %v6729_v33  ;;  %v1085_v44 = vrot.slane %v1071_v39, %v6729_v33 }
 0x285   : > { %v1092_v40 = vpack.c.bf16 %v1069_v37, %v1069_v37  ;;  %v1090_v41 = vpack.c.bf16 %v1062_v38, %v1062_v38  ;;  %v1087_v43 = vcombine.high %v1069_v37, %v6291_v0  ;;  %v1094_v45 = vpack.c.bf16 %v1078_v42, %v1078_v42 }
 0x286   : > { %v1088_v47 = vcombine.high %v1078_v42, %v6291_v0  ;;  %v1086_v48 = vcombine.high %v1062_v38, %v6291_v0  ;;  %v1089_v51 = vcombine.high %v1085_v44, %v6291_v0  ;;  %v1096_v53 = vpack.c.bf16 %v1085_v44, %v1085_v44 }
 0x287   : > { %1280 = vxpose.xlu0.c.b16.start.end [1/1] (short) (narrow) %v1092_v40, 16  ;;  %1248 = vxpose.xlu1.c.b16.start.end [1/1] (short) (narrow) %v1090_v41, 16  ;;  %v1093_v46 = vpack.c.bf16 %v1087_v43, %v1087_v43  ;;  %v934_v44 = vcombine.low %v6696_v5, %v6712_v11 }
 0x288   : > { %v1095_v49 = vpack.c.bf16 %v1088_v47, %v1088_v47  ;;  %v1091_v50 = vpack.c.bf16 %v1086_v48, %v1086_v48  ;;  %v1097_v52 = vpack.c.bf16 %v1089_v51, %v1089_v51  ;;  %v951_v47 = vcombine.high %v6706_v9, %v6710_v10 }
 0x289   : > { %v942_v48 = vrot.slane %v934_v44, %v6722_v21 }
 0x28a   : > { %v965_v51 = vrot.slane %v951_v47, %v6722_v21 }
 0x28b   : > { %1312 = vxpose.xlu0.c.b16.start.end [1/1] (short) (narrow) %v1094_v45, 16  ;;  %1296 = vxpose.xlu1.c.b16.start.end [1/1] (short) (narrow) %v1093_v46, 16  ;;  %v935_v45 = vcombine.high %v6696_v5, %v6712_v11  ;;  %v950_v46 = vcombine.low %v6706_v9, %v6710_v10 }
 0x28f   : > { %1328 = vxpose.xlu1.c.b16.start.end [1/1] (short) (narrow) %v1095_v49, 16  ;;  %1264 = vxpose.xlu0.c.b16.start.end [1/1] (short) (narrow) %v1091_v50, 16  ;;  %v949_v49 = vrot.slane %v935_v45, %v6722_v21  ;;  %v958_v50 = vrot.slane %v950_v46, %v6722_v21 }
 0x293   : > { %1360 = vxpose.xlu1.c.b16.start.end [1/1] (short) (narrow) %v1097_v52, 16  ;;  %1344 = vxpose.xlu0.c.b16.start.end [1/1] (short) (narrow) %v1096_v53, 16  ;;  %v966_v52 = vcombine.low %v942_v48, %v958_v50  ;;  %v967_v53 = vcombine.high %v942_v48, %v958_v50 }
 0x2e9   : > { %v1288_v54 = vpop.trf.xlu0  ;;  %v1256_v55 = vpop.trf.xlu1 }
 0x2ed   : > { %v1320_v56 = vpop.trf.xlu0  ;;  %v1304_v57 = vpop.trf.xlu1 }
 0x2ee   : > { %v1376_v60 = vcombine.low %v1256_v55, %v1320_v56  ;;  %v983_v55 = vcombine.high %v949_v49, %v965_v51  ;;  %v981_v56 = vrot.slane %v967_v53, %v6729_v33 }
 0x2f0   : > { %v1383_v3 = vrot.slane %v1376_v60, %v6722_v21 }
 0x2f1   : > { %v1336_v58 = vpop.trf.xlu1  ;;  %v1272_v59 = vpop.trf.xlu0 }
 0x2f2   : > { %v1410_v61 = vcombine.low %v1272_v59, %v1336_v58 }
 0x2f4   : > { %v1417_v4 = vrot.slane %v1410_v61, %v6722_v21  ;;  %v999_v61 = vcombine.high %v981_v56, %v6291_v0 }
 0x2f5   : > { %v1368_v62 = vpop.trf.xlu1  ;;  %v1352_v63 = vpop.trf.xlu0 }
 0x2f6   : > { %v1418_v1 = vcombine.low %v1304_v57, %v1368_v62  ;;  %v1384_v2 = vcombine.low %v1288_v54, %v1352_v63  ;;  %v982_v54 = vcombine.low %v949_v49, %v965_v51 }
 0x2f8   : > { %v1425_v6 = vrot.slane %v1418_v1, %v6722_v21  ;;  %v1391_v7 = vrot.slane %v1384_v2, %v6722_v21  ;;  %v990_v57 = vrot.slane %v982_v54, %v6729_v33 }
 0x2fa   : > { %v1426_v8 = vcombine.low %v1417_v4, %v1425_v6  ;;  %v1427_v13 = vcombine.high %v1417_v4, %v1425_v6  ;;  %v1392_v14 = vcombine.low %v1383_v3, %v1391_v7  ;;  %v1393_v16 = vcombine.high %v1383_v3, %v1391_v7 }
 0x2fb   : > { %v1000_v62 = vcombine.high %v990_v57, %v6291_v0 }
 0x2fc   : > { %v1400_v17 = vrot.slane %v1392_v14, %v6729_v33  ;;  %v1434_v18 = vrot.slane %v1426_v8, %v6729_v33  ;;  %v1407_v19 = vrot.slane %v1393_v16, %v6729_v33  ;;  %v1441_v20 = vrot.slane %v1427_v13, %v6729_v33 }
 0x2fe   : > { %v1446_v22 = vpack.i.b16 %v1434_v18, %v1400_v17  ;;  %v1448_v23 = vshrl.u32 %v1400_v17, 16  ;;  %v1449_v24 = vshrl.u32 %v1434_v18, 16  ;;  %v1464_v25 = vshrl.u32 %v1407_v19, 16 }
 0x2ff   : > { %v1465_v27 = vshrl.u32 %v1441_v20, 16  ;;  %v1408_v29 = vcombine.high %v1400_v17, %v6299_v28  ;;  %v1442_v30 = vcombine.high %v1434_v18, %v6299_v28  ;;  %v1462_v31 = vpack.i.b16 %v1441_v20, %v1407_v19 }
 0x300   : > { %1476 = vxpose.xlu0.c.b16.start.end [1/1] (short) (narrow) %v1446_v22, 16  ;;  %v1450_v26 = vpack.i.b16 %v1449_v24, %v1448_v23  ;;  %v1409_v32 = vcombine.high %v1407_v19, %v6299_v28  ;;  %v1443_v37 = vcombine.high %v1441_v20, %v6299_v28 }
 0x301   : > { %v1466_v34 = vpack.i.b16 %v1465_v27, %v1464_v25  ;;  %v1456_v35 = vshrl.u32 %v1408_v29, 16  ;;  %v1457_v36 = vshrl.u32 %v1442_v30, 16  ;;  %v1454_v38 = vpack.i.b16 %v1442_v30, %v1408_v29 }
 0x302   : > { %1492 = vxpose.xlu1.c.b16.start.end [1/1] (short) (narrow) %v1450_v26, 16  ;;  %v1472_v40 = vshrl.u32 %v1409_v32, 16  ;;  %v1473_v41 = vshrl.u32 %v1443_v37, 16  ;;  %v1470_v42 = vpack.i.b16 %v1443_v37, %v1409_v32 }
 0x303   : > { %v1458_v39 = vpack.i.b16 %v1457_v36, %v1456_v35 }
 0x304   : > { %1540 = vxpose.xlu0.c.b16.start.end [1/1] (short) (narrow) %v1462_v31, 16  ;;  %v1474_v43 = vpack.i.b16 %v1473_v41, %v1472_v40 }
 0x306   : > { %1556 = vxpose.xlu1.c.b16.start.end [1/1] (short) (narrow) %v1466_v34, 16 }
 0x308   : > { %1508 = vxpose.xlu0.c.b16.start.end [1/1] (short) (narrow) %v1454_v38, 16 }
 0x30a   : > { %1524 = vxpose.xlu1.c.b16.start.end [1/1] (short) (narrow) %v1458_v39, 16 }
 0x30c   : > { %1572 = vxpose.xlu0.c.b16.start.end [1/1] (short) (narrow) %v1470_v42, 16 }
 0x30e   : > { %1588 = vxpose.xlu1.c.b16.start.end [1/1] (short) (narrow) %v1474_v43, 16 }
 0x312   : > { %1100 = vrot.lane.b32.xlu1 %v6706_v9, %s6300_s7  ;;  %v997_v9 = vrot.slane %v983_v55, %v6729_v33 }
 0x314   : > { %v1001_v63 = vcombine.high %v997_v9, %v6291_v0  ;;  %v5456_v8 = vpack.c.bf16 %v997_v9, %v981_v56 }
 0x315   : > { %1098 = vrot.lane.b32.xlu0 %v6696_v5, %s6300_s7  ;;  %v974_v5 = vrot.slane %v966_v52, %v6729_v33 }
 0x316   : > { %v5458_v4 = vpack.c.bf16 %v1001_v63, %v999_v61  ;;  %v1201_v23 = vrot.slane %v5456_v8, %v6722_v21  ;;  %v850_v63 = vsub.s32 0, %v6719_v15 }
 0x317   : > { %v998_v60 = vcombine.high %v974_v5, %v6291_v0  ;;  %v5455_v7 = vpack.c.bf16 %v990_v57, %v974_v5 }
 0x318   : > { %v1226_v18 = vrot.slane %v5458_v4, %v6722_v21 }
 0x319   : > { %v5457_v3 = vpack.c.bf16 %v1000_v62, %v998_v60  ;;  %v1193_v22 = vrot.slane %v5455_v7, %v6722_v21  ;;  %v845_v62 = vld [vmem:[%s718_s13] sm:$0x1]  ;;  %s7415_s13 = sshll.u32 %s6634_s23, 5 }
 0x31a   : > { %vm846_vm4 = vcmp.ne.s32.totalorder %v845_v62, 0  ;;  %s6896_s8 = scalar_lea.vmem [#allocation17], %s7415_s13  ;;  %s5197_s13 = sshll.u32 %s7159_s3, 4  ;;  %s7300_s13 = int_to_ptr.vmem [resolvable:$true] %s5197_s13 }
 0x31b   : > { %v1218_v17 = vrot.slane %v5457_v3, %v6722_v21  ;;  %v1202_v34 = vcombine.low %v1193_v22, %v1201_v23 }
 0x31d   : > { %v1227_v29 = vcombine.low %v1218_v17, %v1226_v18  ;;  %v1209_v40 = vrot.slane %v1202_v34, %v6729_v33 }
 0x31f   : > { %v1234_v37 = vrot.slane %v1227_v29, %v6729_v33  ;;  %v1239_v53 = vshrl.u32 %v1209_v40, 16  ;;  %v1210_v9 = vcombine.high %v1209_v40, %v6299_v28 }
 0x321   : > { %v1240_v45 = vshrl.u32 %v1234_v37, 16  ;;  %v1238_v52 = vpack.i.b16 %v1234_v37, %v1209_v40  ;;  %v1235_v56 = vcombine.high %v1234_v37, %v6299_v28  ;;  %v1245_v60 = vshrl.u32 %v1210_v9, 16 }
 0x323   : > { %v1241_v5 = vpack.i.b16 %v1240_v45, %v1239_v53 }
 0x362   : > { %v1484_v58 = vpop.trf.xlu0 }
 0x364   : > { %v1500_v59 = vpop.trf.xlu1 }
 0x366   : > { %v1548_v1 = vpop.trf.xlu0 }
 0x367   : > { %v1604_v14 = vcombine.low %v1484_v58, %v1548_v1  ;;  %v1246_v58 = vshrl.u32 %v1235_v56, 16  ;;  %v847_v1 = vsel %vm846_vm4, 1, %v6299_v28 }
 0x368   : > { %v1564_v2 = vpop.trf.xlu1  ;;  %v851_v3 = vrot.slane %v847_v1, %v850_v63 }
 0x369   : > { %v1629_v19 = vcombine.low %v1500_v59, %v1564_v2  ;;  %v1611_v25 = vrot.slane %v1604_v14, %v6722_v21  ;;  %v1244_v59 = vpack.i.b16 %v1235_v56, %v1210_v9  ;;  %v1247_v61 = vpack.i.b16 %v1246_v58, %v1245_v60 }
 0x36a   : > { %v1516_v6 = vpop.trf.xlu0  ;;  %v844_v2 = vand.u32 127, %v841_v12  ;;  %vm852_vm5 = vcmp.eq.s32.totalorder %v851_v3, 1 }
 0x36b   : > { %v1636_v30 = vrot.slane %v1629_v19, %v6722_v21 }
 0x36c   : > { %v1532_v13 = vpop.trf.xlu1  ;;  %vm853_vm6 = vcmp.ge.s32.totalorder %v6719_v15, %v844_v2 }
 0x36d   : > { %vm6819_vm7 = vmand %vm853_vm6, %vm852_vm5 }
 0x36e   : > { %v1580_v16 = vpop.trf.xlu0 }
 0x36f   : > { %v1612_v20 = vcombine.low %v1516_v6, %v1580_v16 }
 0x370   : > { %v1596_v24 = vpop.trf.xlu1 }
 0x371   : > { %v1619_v26 = vrot.slane %v1612_v20, %v6722_v21  ;;  %v1637_v27 = vcombine.low %v1532_v13, %v1596_v24 }
 0x373   : > { %v1620_v31 = vcombine.low %v1611_v25, %v1619_v26  ;;  %v1644_v32 = vrot.slane %v1637_v27, %v6722_v21 }
 0x375   : > { %v1627_v35 = vrot.slane %v1620_v31, %v6729_v33  ;;  %v1645_v36 = vcombine.low %v1636_v30, %v1644_v32 }
 0x377   : > { %v1652_v38 = vrot.slane %v1645_v36, %v6729_v33  ;;  %v1628_v39 = vcombine.high %v1627_v35, %v6299_v28  ;;  %v1657_v42 = vshrl.u32 %v1627_v35, 16 }
 0x379   : > { %v1656_v41 = vpack.i.b16 %v1652_v38, %v1627_v35  ;;  %v1658_v43 = vshrl.u32 %v1652_v38, 16  ;;  %v1653_v44 = vcombine.high %v1652_v38, %v6299_v28  ;;  %v1663_v46 = vshrl.u32 %v1628_v39, 16 }
 0x37b   : > { %v1672_v47 = vsel %vm1670_vm2, %v1656_v41, 0  ;;  %v1659_v48 = vpack.i.b16 %v1658_v43, %v1657_v42  ;;  %v1662_v49 = vpack.i.b16 %v1653_v44, %v1628_v39  ;;  %v1664_v50 = vshrl.u32 %v1653_v44, 16 }
 0x37c   : > { %5587 = vmatpush3.bf16.msra.mxu0 %v1672_v47 }
 0x37d   : > { %v1718_v51 = vsel %vm1670_vm2, %v1659_v48, 0  ;;  %5598 = vmatprep.subr.bf16.mxu0 %v6291_v0  ;;  %v1665_v54 = vpack.i.b16 %v1664_v50, %v1663_v46  ;;  %v1764_v55 = vsel %vm1670_vm2, %v1662_v49, 0 }
 0x37e   : > { %5593 = vmatpush3.bf16.msra.mxu1 %v1718_v51 }
 0x37f   : > { %5589 = vmatmul.mubr.msk.bf16.vlgmr.msra.gmra.mxu0 %vm1666_vm3, %v1238_v52  ;;  %5604 = vmatprep.subr.bf16.mxu1 %v6291_v0  ;;  %v1810_v57 = vsel %vm1670_vm2, %v1665_v54, 0 }
 0x380   : > { %5599 = vmatpush3.bf16.msra.mxu0 %v1764_v55  ;;  %5600 = vmatprep.mubr.msk.bf16.mxu0 %vm6292_vm0, %v6291_v0 }
 0x381   : > { %5595 = vmatmul.mubr.msk.bf16.vlgmr.msra.gmra.mxu1 %vm1666_vm3, %v1241_v5  ;;  %5610 = vmatprep.subr.bf16.mxu0 %v6291_v0 }
 0x382   : > { %5605 = vmatpush3.bf16.msra.mxu1 %v1810_v57  ;;  %5606 = vmatprep.mubr.msk.bf16.mxu1 %vm6292_vm0, %v6291_v0 }
 0x383   : > { %5616 = vmatprep.subr.bf16.mxu1 %v6291_v0 }
 0x387   : > { %5601 = vmatmul.mubr.msk.bf16.vlgmr.msra.gmra.mxu0 %vm1666_vm3, %v1244_v59  ;;  %v1099_v40 = vpop.permute.xlu0 %1098 }
 0x388   : > { %5612 = vmatprep.mubr.msk.bf16.mxu0 %vm6292_vm0, %v6291_v0 }
 0x389   : > { %5607 = vmatmul.mubr.msk.bf16.vlgmr.msra.gmra.mxu1 %vm1666_vm3, %v1247_v61 }
 0x38a   : > { %5618 = vmatprep.mubr.msk.bf16.mxu1 %vm6292_vm0, %v6291_v0 }
 0x43f   : > { %v1708_v4 = vpop.f32.mrf.mxu0 }
 0x440   : > { %v1852_v7 = vmul.f32 0.35355338, %v1708_v4 }
 0x441   : > { %v5590_v8 = vpop.f32.mrf.mxu0  ;;  %v1754_v13 = vpop.f32.mrf.mxu1 }
 0x442   : > { %v1853_v14 = vmul.f32 0.35355338, %v1754_v13  ;;  %v6825_v16 = vsel %vm6819_vm7, %v1852_v7, -1e+09 }
 0x443   : > { %v1711_v12 = vpop.f32.mrf.mxu0  ;;  %v5596_v17 = vpop.f32.mrf.mxu1  ;;  %v1862_v18 = vsel %vm1666_vm3, %v6825_v16, -inf }
 0x444   : > { %1863 = vmax.xlane.f32.xlu0 %v1862_v18  ;;  %v6831_v19 = vsel %vm6819_vm7, %v1853_v14, -1e+09 }
 0x445   : > { %v5591_v20 = vpop.f32.mrf.mxu0  ;;  %v1757_v22 = vpop.f32.mrf.mxu1  ;;  %v1865_v23 = vsel %vm1666_vm3, %v6831_v19, -inf }
 0x446   : > { %1866 = vmax.xlane.f32.xlu1 %v1865_v23 }
 0x447   : > { %v5597_v24 = vpop.f32.mrf.mxu1  ;;  %v1800_v25 = vpop.f32.mrf.mxu0 }
 0x448   : > { %v1854_v35 = vmul.f32 0.35355338, %v1800_v25 }
 0x449   : > { %v5602_v26 = vpop.f32.mrf.mxu0  ;;  %v1846_v27 = vpop.f32.mrf.mxu1 }
 0x44a   : > { %v1855_v36 = vmul.f32 0.35355338, %v1846_v27  ;;  %v6841_v37 = vsel %vm6819_vm7, %v1854_v35, -1e+09 }
 0x44b   : > { %v1803_v29 = vpop.f32.mrf.mxu0  ;;  %v5608_v30 = vpop.f32.mrf.mxu1  ;;  %v1868_v39 = vsel %vm1666_vm3, %v6841_v37, -inf }
 0x44c   : > { %v6845_v38 = vsel %vm6819_vm7, %v1855_v36, -1e+09 }
 0x44d   : > { %v5603_v31 = vpop.f32.mrf.mxu0  ;;  %v1849_v32 = vpop.f32.mrf.mxu1 }
 0x44f   : > { %v5609_v34 = vpop.f32.mrf.mxu1 }
 0x457   : > { %1102 = vrot.lane.b32.xlu1 %v6712_v11, %s6300_s7  ;;  %v1871_v11 = vsel %vm1666_vm3, %v6845_v38, -inf }
 0x45a   : > { %1104 = vrot.lane.b32.xlu0 %v6710_v10, %s6300_s7  ;;  %v1101_v10 = vpop.permute.xlu1 %1100 }
 0x479   : > { %1869 = vmax.xlane.f32.xlu0 %v1868_v39 }
 0x47b   : > { %1872 = vmax.xlane.f32.xlu1 %v1871_v11 }
 0x4cd   : > { %v6851_v41 = vpop.xlane.xlu0 %1863 }
 0x4cf   : > { %v6853_v42 = vpop.xlane.xlu1 %1866 }
 0x4d1   : > { %v1105_v43 = vpop.permute.xlu0 %1104 }
 0x4d2   : > { %v1126_v44 = vcombine.low %v1101_v10, %v1105_v43  ;;  %v1127_v45 = vcombine.high %v1101_v10, %v1105_v43  ;;  %v1874_v10 = vsub.f32 %v6825_v16, %v6851_v41 }
 0x4d3   : > { %v1103_v46 = vpop.permute.xlu1 %1102 }
 0x4d4   : > { %v1110_v47 = vcombine.low %v1099_v40, %v1103_v46  ;;  %v1111_v48 = vcombine.high %v1099_v40, %v1103_v46  ;;  %v1134_v49 = vrot.slane %v1126_v44, %v6722_v21  ;;  %v1141_v51 = vrot.slane %v1127_v45, %v6722_v21 }
 0x4d5   : > { %v1875_v45 = vsub.f32 %v6831_v19, %v6853_v42 }
 0x4d6   : > { %v1118_v50 = vrot.slane %v1110_v47, %v6722_v21  ;;  %v1125_v52 = vrot.slane %v1111_v48, %v6722_v21 }
 0x4d8   : > { %v1142_v53 = vcombine.low %v1118_v50, %v1134_v49  ;;  %v1143_v54 = vcombine.high %v1118_v50, %v1134_v49  ;;  %v1158_v55 = vcombine.low %v1125_v52, %v1141_v51  ;;  %v1159_v57 = vcombine.high %v1125_v52, %v1141_v51 }
 0x4d9   : > { %v1878_v52 = vmul.f32 1.442695, %v1874_v10 }
 0x4da   : > { %v1150_v5 = vrot.slane %v1142_v53, %v6729_v33  ;;  %v1157_v56 = vrot.slane %v1143_v54, %v6729_v33  ;;  %v1166_v60 = vrot.slane %v1158_v55, %v6729_v33  ;;  %v1173_v2 = vrot.slane %v1159_v57, %v6729_v33 }
 0x4db   : > { %v1880_v55 = vmul.f32 1.442695, %v1875_v45  ;;  %5888 = vpow2.f32 %v1878_v52 }
 0x4dc   : > { %v1178_v9 = vpack.c.bf16 %v1150_v5, %v1150_v5  ;;  %v1174_v58 = vcombine.high %v1150_v5, %v6291_v0  ;;  %v1175_v59 = vcombine.high %v1157_v56, %v6291_v0  ;;  %v1176_v1 = vcombine.high %v1166_v60, %v6291_v0 }
 0x4dd   : > { %v1180_v3 = vpack.c.bf16 %v1157_v56, %v1157_v56  ;;  %v1177_v6 = vcombine.high %v1173_v2, %v6291_v0  ;;  %v1182_v7 = vpack.c.bf16 %v1166_v60, %v1166_v60  ;;  %v1184_v13 = vpack.c.bf16 %v1173_v2, %v1173_v2 }
 0x4de   : > { %1914 = vxpose.xlu1.c.b16.start.end [1/1] (short) (narrow) %v1178_v9, 16  ;;  %v1179_v61 = vpack.c.bf16 %v1174_v58, %v1174_v58  ;;  %v1181_v62 = vpack.c.bf16 %v1175_v59, %v1175_v59  ;;  %v1183_v4 = vpack.c.bf16 %v1176_v1, %v1176_v1  ;;  %5890 = vpow2.f32 %v1880_v55 }
 0x4df   : > { %v1185_v8 = vpack.c.bf16 %v1177_v6, %v1177_v6 }
 0x4e0   : > { %1930 = vxpose.xlu0.c.b16.start.end [1/1] (short) (narrow) %v1179_v61, 16 }
 0x4e2   : > { %1962 = vxpose.xlu1.c.b16.start.end [1/1] (short) (narrow) %v1181_v62, 16 }
 0x4e4   : > { %1946 = vxpose.xlu0.c.b16.start.end [1/1] (short) (narrow) %v1180_v3, 16 }
 0x4e6   : > { %1994 = vxpose.xlu1.c.b16.start.end [1/1] (short) (narrow) %v1183_v4, 16 }
 0x4e8   : > { %1978 = vxpose.xlu0.c.b16.start.end [1/1] (short) (narrow) %v1182_v7, 16 }
 0x4ea   : > { %2026 = vxpose.xlu1.c.b16.start.end [1/1] (short) (narrow) %v1185_v8, 16 }
 0x4ec   : > { %2010 = vxpose.xlu0.c.b16.start.end [1/1] (short) (narrow) %v1184_v13, 16 }
 0x502   : > { %v1870_v12 = vpop.xlane.xlu0 %1869 }
 0x503   : > { %v1876_v53 = vsub.f32 %v6841_v37, %v1870_v12 }
 0x504   : > { %v1873_v14 = vpop.xlane.xlu1 %1872 }
 0x505   : > { %v1877_v5 = vsub.f32 %v6845_v38, %v1873_v14  ;;  %v1882_v57 = vmul.f32 1.442695, %v1876_v53  ;;  %v5889_v38 = vpop.eup %5888 }
 0x506   : > { %v5891_v62 = vpop.eup %5890  ;;  %v1886_v1 = vsel %vm1666_vm3, %v5889_v38, 0.0 }
 0x507   : > { %v1884_v37 = vmul.f32 1.442695, %v1877_v5  ;;  %5892 = vpow2.f32 %v1882_v57  ;;  %v1889_v3 = vsel %vm1666_vm3, %v5891_v62, 0.0 }
 0x509   : > { %5894 = vpow2.f32 %v1884_v37 }
 0x514   : > { %v5893_v2 = vpop.eup %5892 }
 0x515   : > { %v1892_v6 = vsel %vm1666_vm3, %v5893_v2, 0.0 }
 0x516   : > { %v5895_v4 = vpop.eup %5894 }
 0x517   : > { %v1895_v7 = vsel %vm1666_vm3, %v5895_v4, 0.0 }
 0x540   : > { %v1922_v17 = vpop.trf.xlu1 }
 0x542   : > { %v1938_v18 = vpop.trf.xlu0 }
 0x544   : > { %v1970_v20 = vpop.trf.xlu1 }
 0x546   : > { %v1954_v22 = vpop.trf.xlu0 }
 0x548   : > { %v2002_v23 = vpop.trf.xlu1 }
 0x549   : > { %v2076_v25 = vcombine.low %v1938_v18, %v2002_v23 }
 0x54a   : > { %v1986_v24 = vpop.trf.xlu0 }
 0x54b   : > { %v2042_v27 = vcombine.low %v1922_v17, %v1986_v24  ;;  %v2083_v31 = vrot.slane %v2076_v25, %v6722_v21 }
 0x54c   : > { %v2034_v26 = vpop.trf.xlu1 }
 0x54d   : > { %v2084_v29 = vcombine.low %v1970_v20, %v2034_v26  ;;  %v2049_v35 = vrot.slane %v2042_v27, %v6722_v21 }
 0x54e   : > { %v2018_v30 = vpop.trf.xlu0 }
 0x54f   : > { %v2091_v32 = vrot.slane %v2084_v29, %v6722_v21  ;;  %v2050_v34 = vcombine.low %v1954_v22, %v2018_v30 }
 0x551   : > { %v2092_v36 = vcombine.low %v2083_v31, %v2091_v32  ;;  %v2057_v39 = vrot.slane %v2050_v34, %v6722_v21  ;;  %v2093_v46 = vcombine.high %v2083_v31, %v2091_v32 }
 0x553   : > { %v2058_v11 = vcombine.low %v2049_v35, %v2057_v39  ;;  %v2100_v40 = vrot.slane %v2092_v36, %v6729_v33  ;;  %v2059_v43 = vcombine.high %v2049_v35, %v2057_v39  ;;  %v2107_v56 = vrot.slane %v2093_v46, %v6729_v33 }
 0x555   : > { %v2066_v44 = vrot.slane %v2058_v11, %v6729_v33  ;;  %v2115_v47 = vshrl.u32 %v2100_v40, 16  ;;  %v2108_v51 = vcombine.high %v2100_v40, %v6299_v28  ;;  %v2073_v41 = vrot.slane %v2059_v43, %v6729_v33 }
 0x556   : > { %v2131_v60 = vshrl.u32 %v2107_v56, 16  ;;  %v2109_v13 = vcombine.high %v2107_v56, %v6299_v28 }
 0x557   : > { %v2112_v48 = vpack.i.b16 %v2100_v40, %v2066_v44  ;;  %v2114_v49 = vshrl.u32 %v2066_v44, 16  ;;  %v2074_v50 = vcombine.high %v2066_v44, %v6299_v28  ;;  %v2123_v42 = vshrl.u32 %v2108_v51, 16 }
 0x558   : > { %v2130_v58 = vshrl.u32 %v2073_v41, 16  ;;  %v2128_v59 = vpack.i.b16 %v2107_v56, %v2073_v41  ;;  %v2075_v8 = vcombine.high %v2073_v41, %v6299_v28  ;;  %v2139_v17 = vshrl.u32 %v2109_v13, 16 }
 0x559   : > { %2142 = vxpose.xlu0.c.b16.start.end [1/1] (short) (narrow) %v2112_v48, 16  ;;  %v2116_v54 = vpack.i.b16 %v2115_v47, %v2114_v49  ;;  %v2122_v16 = vshrl.u32 %v2074_v50, 16  ;;  %v2120_v19 = vpack.i.b16 %v2108_v51, %v2074_v50 }
 0x55a   : > { %v2132_v61 = vpack.i.b16 %v2131_v60, %v2130_v58  ;;  %v2138_v14 = vshrl.u32 %v2075_v8, 16  ;;  %v2136_v12 = vpack.i.b16 %v2109_v13, %v2075_v8 }
 0x55b   : > { %2158 = vxpose.xlu1.c.b16.start.end [1/1] (short) (narrow) %v2116_v54, 16  ;;  %v2124_v9 = vpack.i.b16 %v2123_v42, %v2122_v16 }
 0x55c   : > { %v2140_v18 = vpack.i.b16 %v2139_v17, %v2138_v14 }
 0x55d   : > { %2174 = vxpose.xlu0.c.b16.start.end [1/1] (short) (narrow) %v2120_v19, 16 }
 0x55f   : > { %2190 = vxpose.xlu1.c.b16.start.end [1/1] (short) (narrow) %v2124_v9, 16 }
 0x561   : > { %2206 = vxpose.xlu0.c.b16.start.end [1/1] (short) (narrow) %v2128_v59, 16 }
 0x563   : > { %2222 = vxpose.xlu1.c.b16.start.end [1/1] (short) (narrow) %v2132_v61, 16 }
 0x56e   : > { %1887 = vadd.xlane.f32.xlu0 %v1886_v1 }
 0x570   : > { %1890 = vadd.xlane.f32.xlu1 %v1889_v3 }
 0x572   : > { %1893 = vadd.xlane.f32.xlu0 %v1892_v6 }
 0x574   : > { %1896 = vadd.xlane.f32.xlu1 %v1895_v7 }
 0x59f   : > { %2238 = vxpose.xlu0.c.b16.start.end [1/1] (short) (narrow) %v2136_v12, 16 }
 0x5a1   : > { %2254 = vxpose.xlu1.c.b16.start.end [1/1] (short) (narrow) %v2140_v18, 16 }
 0x5bb   : > { %v2150_v20 = vpop.trf.xlu0 }
 0x5bd   : > { %v2166_v22 = vpop.trf.xlu1 }
 0x5bf   : > { %v2182_v23 = vpop.trf.xlu0 }
 0x5c1   : > { %v2198_v24 = vpop.trf.xlu1 }
 0x5c3   : > { %v2214_v25 = vpop.trf.xlu0 }
 0x5c4   : > { %v2270_v36 = vcombine.low %v2150_v20, %v2214_v25 }
 0x5c5   : > { %v2230_v26 = vpop.trf.xlu1 }
 0x5c6   : > { %v2295_v34 = vcombine.low %v2166_v22, %v2230_v26  ;;  %v2277_v47 = vrot.slane %v2270_v36, %v6722_v21 }
 0x5c8   : > { %v2302_v43 = vrot.slane %v2295_v34, %v6722_v21 }
 0x5f7   : > { %v1888_v27 = vpop.xlane.xlu0 %1887 }
 0x5f8   : > { %5896 = vrcp.f32 %v1888_v27 }
 0x5f9   : > { %v1891_v29 = vpop.xlane.xlu1 %1890 }
 0x5fa   : > { %5898 = vrcp.f32 %v1891_v29 }
 0x5fb   : > { %v1894_v30 = vpop.xlane.xlu0 %1893 }
 0x5fc   : > { %5900 = vrcp.f32 %v1894_v30 }
 0x5fd   : > { %v1897_v31 = vpop.xlane.xlu1 %1896 }
 0x5fe   : > { %5902 = vrcp.f32 %v1897_v31 }
 0x601   : > { %v2246_v32 = vpop.trf.xlu0 }
 0x602   : > { %v2278_v35 = vcombine.low %v2182_v23, %v2246_v32 }
 0x603   : > { %v2262_v39 = vpop.trf.xlu1 }
 0x604   : > { %v2303_v11 = vcombine.low %v2198_v24, %v2262_v39  ;;  %v2285_v10 = vrot.slane %v2278_v35, %v6722_v21 }
 0x605   : > { %v5897_v40 = vpop.eup %5896 }
 0x606   : > { %v2310_v44 = vrot.slane %v2303_v11, %v6722_v21  ;;  %v1902_v45 = vmul.f32 %v5897_v40, %v5889_v38  ;;  %v2286_v52 = vcombine.low %v2277_v47, %v2285_v10 }
 0x607   : > { %v5899_v46 = vpop.eup %5898 }
 0x608   : > { %v2311_v48 = vcombine.low %v2302_v43, %v2310_v44  ;;  %1906 = vst.msk [vmem:[%s6896_s8] sm:$0xff] %vm1666_vm3, %v1902_v45  ;;  %v1910_v49 = vpack.c.bf16 %v1902_v45, %v1902_v45  ;;  %v1903_v50 = vmul.f32 %v5899_v46, %v5891_v62  ;;  %v2293_v5 = vrot.slane %v2286_v52, %v6729_v33 }
 0x609   : > { %v5901_v51 = vpop.eup %5900 }
 0x60a   : > { %v2336_v53 = vsel %vm1666_vm3, %v1910_v49, 0  ;;  %1907 = vst.msk [vmem:[%s6896_s8 + $0x8] sm:$0xff] %vm1666_vm3, %v1903_v50  ;;  %v2318_v16 = vrot.slane %v2311_v48, %v6729_v33  ;;  %v1911_v41 = vpack.c.bf16 %v1903_v50, %v1903_v50  ;;  %v1904_v55 = vmul.f32 %v5901_v51, %v5893_v2  ;;  %v5874_v49 = vld [vmem:[#allocation7 + $0x8] sm:$0xff]  }
 0x60b   : > { %v5903_v54 = vpop.eup %5902  ;;  %5611 = vmatpush3.bf16.xpose.msra.mxu0 %v2336_v53  ;;  %v2323_v58 = vshrl.u32 %v2293_v5, 16  ;;  %v2294_v38 = vcombine.high %v2293_v5, %v6299_v28 }
 0x60c   : > { %5622 = vmatprep.subr.bf16.mxu0 %v6291_v0  ;;  %v2382_v19 = vsel %vm1666_vm3, %v1911_v41, 0  ;;  %1908 = vst.msk [vmem:[%s6896_s8 + $0x10] sm:$0xff] %vm1666_vm3, %v1904_v55  ;;  %v1905_v42 = vmul.f32 %v5903_v54, %v5895_v4  ;;  %v1912_v56 = vpack.c.bf16 %v1904_v55, %v1904_v55  ;;  %v2324_v57 = vshrl.u32 %v2318_v16, 16 }
 0x60d   : > { %5617 = vmatpush3.bf16.xpose.msra.mxu1 %v2382_v19  ;;  %v2322_v9 = vpack.i.b16 %v2318_v16, %v2293_v5  ;;  %v2319_v60 = vcombine.high %v2318_v16, %v6299_v28  ;;  %v2329_v3 = vshrl.u32 %v2294_v38, 16  ;;  %v5875_v5 = vld [vmem:[#allocation7] sm:$0xff]  }
 0x60e   : > { %5628 = vmatprep.subr.bf16.mxu1 %v6291_v0  ;;  %1909 = vst.msk [vmem:[%s6896_s8 + $0x18] sm:$0xff] %vm1666_vm3, %v1905_v42  ;;  %v1913_v37 = vpack.c.bf16 %v1905_v42, %v1905_v42  ;;  %v2428_v59 = vsel %vm1666_vm3, %v1912_v56, 0  ;;  %v2325_v61 = vpack.i.b16 %v2324_v57, %v2323_v58 }
 0x60f   : > { %v2330_v1 = vshrl.u32 %v2319_v60, 16  ;;  %v2328_v2 = vpack.i.b16 %v2319_v60, %v2294_v38 }
 0x610   : > { %v2474_v62 = vsel %vm1666_vm3, %v1913_v37, 0 }
 0x611   : > { %v2331_v4 = vpack.i.b16 %v2330_v1, %v2329_v3 }
 0x612   : > { %5613 = vmatmul.mubr.msk.bf16.vlgmr.msra.gmra.mxu0 %vm1666_vm3, %v2322_v9 }
 0x613   : > { %5623 = vmatpush3.bf16.xpose.msra.mxu0 %v2428_v59  ;;  %5624 = vmatprep.mubr.msk.bf16.mxu0 %vm6292_vm0, %v6291_v0 }
 0x614   : > { %5634 = vmatprep.subr.bf16.mxu0 %v6291_v0  ;;  %5619 = vmatmul.mubr.msk.bf16.vlgmr.msra.gmra.mxu1 %vm1666_vm3, %v2325_v61 }
 0x615   : > { %5629 = vmatpush3.bf16.xpose.msra.mxu1 %v2474_v62  ;;  %5630 = vmatprep.mubr.msk.bf16.mxu1 %vm6292_vm0, %v6291_v0 }
 0x616   : > { %5642 = vmatprep.subr.bf16.mxu1 %v6291_v0 }
 0x61a   : > { %5625 = vmatmul.mubr.msk.bf16.vlgmr.msra.gmra.mxu0 %vm1666_vm3, %v2328_v2 }
 0x61b   : > { %5638 = vmatprep.mubr.msk.bf16.mxu0 %vm6292_vm0, %v6291_v0  ;;  %5635 = vmatpush3.bf16.msra.mxu0 %v5874_v49 }
 0x61c   : > { %5631 = vmatmul.mubr.msk.bf16.vlgmr.msra.gmra.mxu1 %vm1666_vm3, %v2331_v4  ;;  %5636 = vmatprep.subr.bf16.mxu0 %v6291_v0 }
 0x61d   : > { %5646 = vmatprep.mubr.msk.bf16.mxu1 %vm6292_vm0, %v6291_v0 }
 0x61f   : > { %5637 = vmatpush3.bf16.msra.mxu0 %v5875_v5 }
 0x620   : > { %5650 = vmatprep.subr.bf16.mxu0 %v6291_v0 }
 0x6d2   : > { %v2372_v6 = vpop.f32.mrf.mxu0 }
 0x6d3   : > { %2516 = vxpose.xlu0.b32.start.end [1/1] (short) (narrow) %v2372_v6, 8 }
 0x6d4   : > { %v5614_v7 = vpop.f32.mrf.mxu0  ;;  %v2418_v8 = vpop.f32.mrf.mxu1 }
 0x6d5   : > { %2548 = vxpose.xlu1.b32.start.end [1/1] (short) (narrow) %v2418_v8, 8 }
 0x6d6   : > { %v2375_v13 = vpop.f32.mrf.mxu0  ;;  %v5620_v14 = vpop.f32.mrf.mxu1 }
 0x6d8   : > { %v5615_v12 = vpop.f32.mrf.mxu0  ;;  %v2421_v17 = vpop.f32.mrf.mxu1 }
 0x6d9   : > { %v5876_v17 = vld [vmem:[%s7382_s9 + $0x8] sm:$0xff]  }
 0x6da   : > { %v2464_v18 = vpop.f32.mrf.mxu0  ;;  %v5621_v20 = vpop.f32.mrf.mxu1 }
 0x6db   : > { %2580 = vxpose.xlu0.b32.start.end [1/1] (short) (narrow) %v2464_v18, 8  ;;  %v5877_v20 = vld [vmem:[%s7382_s9] sm:$0xff]  }
 0x6dc   : > { %v5626_v22 = vpop.f32.mrf.mxu0  ;;  %v2510_v23 = vpop.f32.mrf.mxu1 }
 0x6de   : > { %v2467_v24 = vpop.f32.mrf.mxu0  ;;  %v5632_v25 = vpop.f32.mrf.mxu1 }
 0x6df   : > { %2612 = vxpose.xlu0.b32.start.end [1/1] (short) (narrow) %v2510_v23, 8  ;;  %v5926_v25 = vld [vmem:[%s6682_s17] sm:$0xff]  ;;  %s7472_s17 = smov 8  }
 0x6e0   : > { %v5627_v26 = vpop.f32.mrf.mxu0  ;;  %v2513_v27 = vpop.f32.mrf.mxu1 }
 0x6e2   : > { %v5633_v29 = vpop.f32.mrf.mxu1 }
 0x74f   : > { %v2532_v30 = vpop.trf.xlu0 }
 0x751   : > { %v2564_v32 = vpop.trf.xlu1 }
 0x757   : > { %v2596_v31 = vpop.trf.xlu0 }
 0x758   : > { %v2644_v34 = vcombine.low %v2532_v30, %v2596_v31  ;;  %v2645_v35 = vcombine.high %v2532_v30, %v2596_v31 }
 0x75a   : > { %v2652_v40 = vrot.slane %v2644_v34, %v6722_v21  ;;  %v2659_v10 = vrot.slane %v2645_v35, %v6722_v21 }
 0x75b   : > { %v2628_v36 = vpop.trf.xlu0 }
 0x75c   : > { %v2660_v39 = vcombine.low %v2564_v32, %v2628_v36  ;;  %v2661_v11 = vcombine.high %v2564_v32, %v2628_v36 }
 0x75e   : > { %v2668_v43 = vrot.slane %v2660_v39, %v6722_v21  ;;  %v2675_v44 = vrot.slane %v2661_v11, %v6722_v21 }
 0x760   : > { %v2676_v45 = vcombine.low %v2652_v40, %v2668_v43  ;;  %v2677_v46 = vcombine.high %v2652_v40, %v2668_v43  ;;  %v2692_v47 = vcombine.low %v2659_v10, %v2675_v44  ;;  %v2693_v48 = vcombine.high %v2659_v10, %v2675_v44  ;;  %v5878_v44 = vld [vmem:[#allocation11 + $0x8] sm:$0xff]  }
 0x761   : > { %5643 = vmatpush3.bf16.msra.mxu1 %v5878_v44 }
 0x762   : > { %v2684_v50 = vrot.slane %v2676_v45, %v6729_v33  ;;  %v2691_v51 = vrot.slane %v2677_v46, %v6729_v33  ;;  %v2700_v52 = vrot.slane %v2692_v47, %v6729_v33  ;;  %v2707_v53 = vrot.slane %v2693_v48, %v6729_v33  ;;  %5644 = vmatprep.subr.bf16.mxu1 %v6291_v0  ;;  %v5879_v45 = vld [vmem:[#allocation11] sm:$0xff]  }
 0x764   : > { %v2712_v54 = vcombine.low %v2684_v50, %v2691_v51  ;;  %v5467_v16 = vcombine.high %v2684_v50, %v2691_v51  ;;  %v2728_v41 = vcombine.low %v2700_v52, %v2707_v53  ;;  %v5468_v55 = vcombine.high %v2700_v52, %v2707_v53 }
 0x765   : > { %5645 = vmatpush3.bf16.msra.mxu1 %v5879_v45 }
 0x766   : > { %v2719_v19 = vrot.slane %v2712_v54, %v6722_v21  ;;  %v2727_v42 = vrot.slane %v5467_v16, %v6722_v21  ;;  %v2735_v56 = vrot.slane %v2728_v41, %v6722_v21  ;;  %v2743_v57 = vrot.slane %v5468_v55, %v6722_v21  ;;  %5658 = vmatprep.subr.bf16.mxu1 %v6291_v0 }
 0x768   : > { %v2745_v9 = vcombine.high %v2719_v19, %v2727_v42  ;;  %v2761_v58 = vcombine.high %v2735_v56, %v2743_v57  ;;  %v2744_v37 = vcombine.low %v2719_v19, %v2727_v42  ;;  %v2760_v59 = vcombine.low %v2735_v56, %v2743_v57 }
 0x76a   : > { %v2759_v60 = vrot.slane %v2745_v9, %v6729_v33  ;;  %v2775_v61 = vrot.slane %v2761_v58, %v6729_v33  ;;  %v2752_v38 = vrot.slane %v2744_v37, %v6729_v33  ;;  %v2768_v62 = vrot.slane %v2760_v59, %v6729_v33 }
 0x76c   : > { %v2778_v1 = vcombine.low %v2759_v60, %v2775_v61  ;;  %v2777_v2 = vcombine.high %v2752_v38, %v2768_v62  ;;  %v2776_v3 = vcombine.low %v2752_v38, %v2768_v62  ;;  %v2779_v4 = vcombine.high %v2759_v60, %v2775_v61 }
 0x76e   : > { %2785 = vrot.lane.b32.xlu0 %v2778_v1, %s7414_s28  ;;  %2781 = vrot.lane.b32.xlu1 %v2777_v2, %s7411_s19 }
 0x772   : > { %2789 = vrot.lane.b32.xlu1 %v2779_v4, %s7413_s4  ;;  %s7468_s4 = sld [smem:[#allocation32_spill]] }
 0x778   : > { %s837_s28 = scalar_lea.vmem %s7468_s4, %s5450_s26  ;;  %s7471_s26 = smov 16  }
 0x779   : > { %v840_v22 = vld [vmem:[%s837_s28] sm:$0xff]  ;;  %s7416_s28 = sshll.u32 %s6439_s29, 9 }
 0x77a   : > { %v2941_v23 = vpack.c.bf16 %v840_v22, %v840_v22  ;;  %s7265_s7 = scalar_lea.hbm %s7474_s24, %s7416_s28 }
 0x7e0   : > { %v2782_v6 = vpop.permute.xlu1 %2781  ;;  %v2786_v7 = vpop.permute.xlu0 %2785 }
 0x7e1   : > { %v2792_v8 = vsel %vm1666_vm3, %v2776_v3, %v2782_v6  ;;  %v5472_v6 = vld [vmem:[#allocation8] ss:$0 sm:$0xff] }
 0x7e2   : > { %v2794_v14 = vsel %vm2793_vm8, %v2792_v8, %v2786_v7 }
 0x7e4   : > { %v2790_v13 = vpop.permute.xlu1 %2789 }
 0x7e5   : > { %v2796_v12 = vsel %vm2795_vm9, %v2794_v14, %v2790_v13  ;;  %v5473_v13 = vld [vmem:[#allocation10] ss:$0 sm:$0xff] }
 0x7e6   : > { %v2797_v18 = vpack.c.bf16 %v2796_v12, %v2796_v12 }
 0x7e8   : > { %5639 = vmatmul.mubr.msk.bf16.vlgmr.msra.gmra.mxu0 %vm874_vm1, %v2797_v18 }
 0x7e9   : > { %5651 = vmatpush3.bf16.msra.mxu0 %v5876_v17  ;;  %5654 = vmatprep.mubr.msk.bf16.mxu0 %vm6292_vm0, %v6291_v0 }
 0x7ea   : > { %5652 = vmatprep.subr.bf16.mxu0 %v6291_v0 }
 0x7ed   : > { %5653 = vmatpush3.bf16.msra.mxu0 %v5877_v20 }
 0x7ee   : > { %5664 = vmatprep.subr.bf16.mxu0 %v6291_v0 }
 0x7f0   : > { %5655 = vmatmul.mubr.msk.bf16.vlgmr.msra.gmra.mxu0 %vm874_vm1, %v2941_v23 }
 0x7f1   : > { %5666 = vmatprep.mubr.msk.bf16.mxu0 %vm6292_vm0, %v6291_v0 }
 0x8a8   : > { %v2847_v24 = vpop.f32.mrf.mxu0 }
 0x8a9   : > { %v2848_v26 = vadd.f32 %v5926_v25, %v2847_v24 }
 0x8aa   : > { %v5640_v27 = vpop.f32.mrf.mxu0 }
 0x8ab   : > { %v2853_v29 = vsel %vm874_vm1, %v2848_v26, 0.0 }
 0x8ac   : > { %2854 = vadd.xlane.f32.xlu1 %v2853_v29  ;;  %v2850_v30 = vpop.f32.mrf.mxu0 }
 0x8ae   : > { %v5641_v31 = vpop.f32.mrf.mxu0 }
 0x8b0   : > { %v6975_v32 = vpop.f32.mrf.mxu0 }
 0x8b2   : > { %v5656_v34 = vpop.f32.mrf.mxu0 }
 0x8b4   : > { %v2998_v35 = vpop.f32.mrf.mxu0 }
 0x8b6   : > { %v5657_v36 = vpop.f32.mrf.mxu0 }
 0x8bd   : > { %3094 = vrot.lane.b32.xlu1 %v6975_v32, %s6294_s18 }
 0x8c1   : > { %3100 = vrot.lane.b32.xlu1 %v6975_v32, %s6293_s30 }
 0x935   : > { %v2855_v39 = vpop.xlane.xlu1 %2854 }
 0x936   : > { %v2857_v11 = vmul.f32 0.03125, %v2855_v39 }
 0x938   : > { %v2858_v40 = vsub.f32 %v2848_v26, %v2857_v11 }
 0x939   : > { %v6986_v46 = vpop.permute.xlu1 %3094 }
 0x93a   : > { %v2859_v10 = vmul.f32 %v2858_v40, %v2858_v40 }
 0x93c   : > { %v2860_v43 = vsel %vm874_vm1, %v2859_v10, 0.0 }
 0x93d   : > { %2861 = vadd.xlane.f32.xlu0 %v2860_v43  ;;  %v6988_v47 = vpop.permute.xlu1 %3100 }
 0x93e   : > { %v3119_v49 = vcombine.low %v6986_v46, %v6988_v47  ;;  %v3120_v51 = vcombine.high %v6986_v46, %v6988_v47 }
 0x940   : > { %v3127_v54 = vrot.slane %v3119_v49, %v6722_v21  ;;  %v3134_v55 = vrot.slane %v3120_v51, %v6722_v21 }
 0x953   : > { %3097 = vrot.lane.b32.xlu0 %v6975_v32, %s6296_s1 }
 0x9c6   : > { %v2862_v48 = vpop.xlane.xlu0 %2861 }
 0x9c7   : > { %v2863_v50 = vmul.f32 0.03125, %v2862_v48 }
 0x9c9   : > { %v2864_v52 = vadd.f32 1e-05, %v2863_v50 }
 0x9ca   : > { %v6994_v53 = vpop.permute.xlu0 %3097 }
 0x9cb   : > { %5904 = vrsqrt.f32 %v2864_v52  ;;  %v3103_v16 = vcombine.low %v6975_v32, %v6994_v53  ;;  %v3104_v41 = vcombine.high %v6975_v32, %v6994_v53 }
 0x9cd   : > { %v3111_v5 = vrot.slane %v3103_v16, %v6722_v21  ;;  %v3118_v19 = vrot.slane %v3104_v41, %v6722_v21 }
 0x9cf   : > { %v3135_v42 = vcombine.low %v3111_v5, %v3127_v54  ;;  %v3136_v56 = vcombine.high %v3111_v5, %v3127_v54  ;;  %v3151_v57 = vcombine.low %v3118_v19, %v3134_v55  ;;  %v3152_v37 = vcombine.high %v3118_v19, %v3134_v55 }
 0x9d1   : > { %v3143_v9 = vrot.slane %v3135_v42, %v6729_v33  ;;  %v3150_v58 = vrot.slane %v3136_v56, %v6729_v33  ;;  %v3159_v38 = vrot.slane %v3151_v57, %v6729_v33  ;;  %v3166_v3 = vrot.slane %v3152_v37, %v6729_v33 }
 0x9d3   : > { %v3171_v59 = vpack.c.bf16 %v3143_v9, %v3143_v9  ;;  %v3167_v60 = vcombine.high %v3143_v9, %v6291_v0  ;;  %v3168_v61 = vcombine.high %v3150_v58, %v6291_v0  ;;  %v3169_v2 = vcombine.high %v3159_v38, %v6291_v0 }
 0x9d4   : > { %v3173_v8 = vpack.c.bf16 %v3150_v58, %v3150_v58  ;;  %v3170_v17 = vcombine.high %v3166_v3, %v6291_v0  ;;  %v3175_v18 = vpack.c.bf16 %v3159_v38, %v3159_v38  ;;  %v3177_v24 = vpack.c.bf16 %v3166_v3, %v3166_v3 }
 0x9d5   : > { %3329 = vxpose.xlu1.c.b16.start.end [1/1] (short) (narrow) %v3171_v59, 16  ;;  %v3172_v62 = vpack.c.bf16 %v3167_v60, %v3167_v60  ;;  %v3174_v1 = vpack.c.bf16 %v3168_v61, %v3168_v61  ;;  %v3176_v14 = vpack.c.bf16 %v3169_v2, %v3169_v2 }
 0x9d6   : > { %v3178_v23 = vpack.c.bf16 %v3170_v17, %v3170_v17 }
 0x9d7   : > { %3345 = vxpose.xlu0.c.b16.start.end [1/1] (short) (narrow) %v3172_v62, 16 }
 0x9d8   : > { %v5905_v4 = vpop.eup %5904 }
 0x9d9   : > { %v2866_v7 = vmul.f32 %v5905_v4, %v2858_v40  ;;  %3377 = vxpose.xlu1.c.b16.start.end [1/1] (short) (narrow) %v3174_v1, 16 }
 0x9db   : > { %3361 = vxpose.xlu0.c.b16.start.end [1/1] (short) (narrow) %v3173_v8, 16  ;;  %v2873_v12 = vmul.f32 %v5472_v6, %v2866_v7 }
 0x9dd   : > { %3409 = vxpose.xlu1.c.b16.start.end [1/1] (short) (narrow) %v3176_v14, 16  ;;  %v7012_v20 = vadd.f32 %v5473_v13, %v2873_v12 }
 0x9df   : > { %3393 = vxpose.xlu0.c.b16.start.end [1/1] (short) (narrow) %v3175_v18, 16  ;;  %v2881_v22 = vpack.c.bf16 %v7012_v20, %v7012_v20 }
 0x9e1   : > { %5647 = vmatmul.mubr.msk.bf16.vlgmr.msra.gmra.mxu1 %vm874_vm1, %v2881_v22  ;;  %3441 = vxpose.xlu1.c.b16.start.end [1/1] (short) (narrow) %v3178_v23, 16 }
 0x9e2   : > { %5660 = vmatprep.mubr.msk.bf16.mxu1 %vm6292_vm0, %v6291_v0 }
 0x9e3   : > { %3425 = vxpose.xlu0.c.b16.start.end [1/1] (short) (narrow) %v3177_v24, 16 }
 0xa37   : > { %v3337_v25 = vpop.trf.xlu1 }
 0xa39   : > { %v3353_v26 = vpop.trf.xlu0 }
 0xa3b   : > { %v3385_v27 = vpop.trf.xlu1 }
 0xa3d   : > { %v3369_v29 = vpop.trf.xlu0 }
 0xa3f   : > { %v3417_v30 = vpop.trf.xlu1 }
 0xa40   : > { %v3491_v31 = vcombine.low %v3353_v26, %v3417_v30 }
 0xa41   : > { %v3401_v34 = vpop.trf.xlu0 }
 0xa42   : > { %v3457_v35 = vcombine.low %v3337_v25, %v3401_v34  ;;  %v3498_v39 = vrot.slane %v3491_v31, %v6722_v21 }
 0xa43   : > { %v3449_v36 = vpop.trf.xlu1 }
 0xa44   : > { %v3499_v11 = vcombine.low %v3385_v27, %v3449_v36  ;;  %v3464_v10 = vrot.slane %v3457_v35, %v6722_v21 }
 0xa45   : > { %v3433_v40 = vpop.trf.xlu0 }
 0xa46   : > { %v3506_v43 = vrot.slane %v3499_v11, %v6722_v21  ;;  %v3465_v44 = vcombine.low %v3369_v29, %v3433_v40 }
 0xa48   : > { %v3507_v45 = vcombine.low %v3498_v39, %v3506_v43  ;;  %v3508_v48 = vcombine.high %v3498_v39, %v3506_v43  ;;  %v3472_v49 = vrot.slane %v3465_v44, %v6722_v21 }
 0xa4a   : > { %v3473_v50 = vcombine.low %v3464_v10, %v3472_v49  ;;  %v3474_v51 = vcombine.high %v3464_v10, %v3472_v49  ;;  %v3515_v52 = vrot.slane %v3507_v45, %v6729_v33  ;;  %v3522_v54 = vrot.slane %v3508_v48, %v6729_v33 }
 0xa4c   : > { %v3481_v16 = vrot.slane %v3473_v50, %v6729_v33  ;;  %v3523_v41 = vcombine.high %v3515_v52, %v6299_v28  ;;  %v3488_v55 = vrot.slane %v3474_v51, %v6729_v33  ;;  %v3530_v5 = vshrl.u32 %v3515_v52, 16 }
 0xa4d   : > { %v3524_v19 = vcombine.high %v3522_v54, %v6299_v28  ;;  %v3546_v61 = vshrl.u32 %v3522_v54, 16 }
 0xa4e   : > { %v3527_v42 = vpack.i.b16 %v3515_v52, %v3481_v16  ;;  %v3489_v56 = vcombine.high %v3481_v16, %v6299_v28  ;;  %v3543_v57 = vpack.i.b16 %v3522_v54, %v3488_v55  ;;  %v3529_v9 = vshrl.u32 %v3481_v16, 16 }
 0xa4f   : > { %v3490_v58 = vcombine.high %v3488_v55, %v6299_v28  ;;  %v3554_v37 = vshrl.u32 %v3524_v19, 16  ;;  %v3545_v60 = vshrl.u32 %v3488_v55, 16  ;;  %v3538_v6 = vshrl.u32 %v3523_v41, 16 }
 0xa50   : > { %3557 = vxpose.xlu0.c.b16.start.end [1/1] (short) (narrow) %v3527_v42, 16  ;;  %v3535_v59 = vpack.i.b16 %v3523_v41, %v3489_v56  ;;  %3621 = vxpose.xlu1.c.b16.start.end [1/1] (short) (narrow) %v3543_v57, 16  ;;  %v3531_v38 = vpack.i.b16 %v3530_v5, %v3529_v9  ;;  %v3537_v4 = vshrl.u32 %v3489_v56, 16 }
 0xa51   : > { %v3553_v62 = vshrl.u32 %v3490_v58, 16  ;;  %v3551_v1 = vpack.i.b16 %v3524_v19, %v3490_v58  ;;  %v3547_v3 = vpack.i.b16 %v3546_v61, %v3545_v60 }
 0xa52   : > { %v3539_v7 = vpack.i.b16 %v3538_v6, %v3537_v4 }
 0xa53   : > { %v3555_v2 = vpack.i.b16 %v3554_v37, %v3553_v62 }
 0xa54   : > { %3589 = vxpose.xlu0.c.b16.start.end [1/1] (short) (narrow) %v3535_v59, 16  ;;  %3573 = vxpose.xlu1.c.b16.start.end [1/1] (short) (narrow) %v3531_v38, 16 }
 0xa58   : > { %3637 = vxpose.xlu0.c.b16.start.end [1/1] (short) (narrow) %v3547_v3, 16 }
 0xa5c   : > { %3605 = vxpose.xlu0.c.b16.start.end [1/1] (short) (narrow) %v3539_v7, 16 }
 0xaa1   : > { %v2935_v8 = vpop.f32.mrf.mxu1 }
 0xaa2   : > { %3011 = vrot.lane.b32.xlu1 %v2935_v8, %s6296_s1  ;;  %3008 = vrot.lane.b32.xlu0 %v2935_v8, %s6294_s18  ;;  %s6304_s18 = smov [#allocation17]  }
 0xaa3   : > { %v5648_v13 = vpop.f32.mrf.mxu1 }
 0xaa5   : > { %v2938_v14 = vpop.f32.mrf.mxu1 }
 0xaa6   : > { %3014 = vrot.lane.b32.xlu1 %v2935_v8, %s6293_s30  ;;  %s7473_s30 = smov 24  }
 0xaa7   : > { %v5649_v12 = vpop.f32.mrf.mxu1 }
 0xab2   : > { %v3565_v17 = vpop.trf.xlu0  ;;  %v3629_v22 = vpop.trf.xlu1 }
 0xab3   : > { %v3685_v59 = vcombine.low %v3565_v17, %v3629_v22 }
 0xab5   : > { %v3692_v3 = vrot.slane %v3685_v59, %v6722_v21 }
 0xab6   : > { %v3597_v18 = vpop.trf.xlu0  ;;  %v3581_v24 = vpop.trf.xlu1 }
 0xaba   : > { %v3645_v23 = vpop.trf.xlu0 }
 0xabb   : > { %v3710_v16 = vcombine.low %v3581_v24, %v3645_v23 }
 0xabd   : > { %v3717_v42 = vrot.slane %v3710_v16, %v6722_v21 }
 0xabe   : > { %v3613_v25 = vpop.trf.xlu0 }
 0xac0   : > { %3669 = vxpose.xlu0.c.b16.start.end [1/1] (short) (narrow) %v3555_v2, 16 }
 0xac9   : > { %3653 = vxpose.xlu1.c.b16.start.end [1/1] (short) (narrow) %v3551_v1, 16  ;;  %3181 = vrot.lane.b32.xlu0 %v6986_v46, %s6295_s0 }
 0xacd   : > { %3179 = vrot.lane.b32.xlu1 %v6975_v32, %s6295_s0 }
 0xad1   : > { %3183 = vrot.lane.b32.xlu1 %v6994_v53, %s6295_s0 }
 0xb14   : > { %v3012_v26 = vpop.permute.xlu1 %3011  ;;  %v3009_v30 = vpop.permute.xlu0 %3008 }
 0xb15   : > { %v3017_v27 = vcombine.low %v2935_v8, %v3012_v26  ;;  %v3018_v29 = vcombine.high %v2935_v8, %v3012_v26 }
 0xb17   : > { %v3025_v46 = vrot.slane %v3017_v27, %v6722_v21  ;;  %v3032_v32 = vrot.slane %v3018_v29, %v6722_v21 }
 0xb18   : > { %v3015_v31 = vpop.permute.xlu1 %3014 }
 0xb19   : > { %v3033_v34 = vcombine.low %v3009_v30, %v3015_v31  ;;  %v3034_v35 = vcombine.high %v3009_v30, %v3015_v31 }
 0xb1b   : > { %v3041_v36 = vrot.slane %v3033_v34, %v6722_v21  ;;  %v3048_v53 = vrot.slane %v3034_v35, %v6722_v21 }
 0xb1d   : > { %v3049_v39 = vcombine.low %v3025_v46, %v3041_v36  ;;  %v3050_v11 = vcombine.high %v3025_v46, %v3041_v36  ;;  %v3065_v40 = vcombine.low %v3032_v32, %v3048_v53  ;;  %v3066_v10 = vcombine.high %v3032_v32, %v3048_v53 }
 0xb1f   : > { %v3057_v43 = vrot.slane %v3049_v39, %v6729_v33  ;;  %v3064_v44 = vrot.slane %v3050_v11, %v6729_v33  ;;  %v3073_v45 = vrot.slane %v3065_v40, %v6729_v33  ;;  %v3080_v48 = vrot.slane %v3066_v10, %v6729_v33 }
 0xb21   : > { %v3081_v49 = vcombine.high %v3057_v43, %v6291_v0  ;;  %v3082_v50 = vcombine.high %v3064_v44, %v6291_v0  ;;  %v3083_v51 = vcombine.high %v3073_v45, %v6291_v0  ;;  %v3084_v52 = vcombine.high %v3080_v48, %v6291_v0 }
 0xb22   : > { %v3677_v54 = vpop.trf.xlu0  ;;  %v5480_v56 = vpack.c.bf16 %v3073_v45, %v3057_v43  ;;  %v5481_v57 = vpack.c.bf16 %v3080_v48, %v3064_v44  ;;  %v855_v45 = vld [vmem:[%s7469_s6] sm:$0x1]  ;;  %s5181_s6 = sshll.u32 %s6896_s8, 4  ;;  %s7268_s6 = int_to_ptr.vmem [resolvable:$true] %s5181_s6 }
 0xb23   : > { %v3718_v41 = vcombine.low %v3613_v25, %v3677_v54  ;;  %v5482_v55 = vpack.c.bf16 %v3083_v51, %v3081_v49  ;;  %v5483_v5 = vpack.c.bf16 %v3084_v52, %v3082_v50  ;;  %vm856_vm10 = vcmp.ne.s32.totalorder %v855_v45, 0 }
 0xb24   : > { %v3274_v60 = vrot.slane %v5480_v56, %v6722_v21  ;;  %v3282_v61 = vrot.slane %v5481_v57, %v6722_v21  ;;  %v3935_v48 = vsel %vm856_vm10, 1, %v6299_v28 }
 0xb25   : > { %v3725_v19 = vrot.slane %v3718_v41, %v6722_v21  ;;  %v3299_v9 = vrot.slane %v5482_v55, %v6722_v21  ;;  %v3307_v58 = vrot.slane %v5483_v5, %v6722_v21  ;;  %v3939_v49 = vrot.slane %v3935_v48, %v850_v63 }
 0xb26   : > { %v3283_v6 = vcombine.low %v3274_v60, %v3282_v61 }
 0xb27   : > { %v3726_v37 = vcombine.low %v3717_v42, %v3725_v19  ;;  %v3308_v1 = vcombine.low %v3299_v9, %v3307_v58  ;;  %vm3940_vm11 = vcmp.eq.s32.totalorder %v3939_v49, 1 }
 0xb28   : > { %v3290_v12 = vrot.slane %v3283_v6, %v6729_v33 }
 0xb29   : > { %v3733_v2 = vrot.slane %v3726_v37, %v6729_v33  ;;  %v3315_v8 = vrot.slane %v3308_v1, %v6729_v33 }
 0xb2a   : > { %v3320_v35 = vshrl.u32 %v3290_v12, 16  ;;  %v3291_v11 = vcombine.high %v3290_v12, %v6299_v28 }
 0xb2b   : > { %v3661_v38 = vpop.trf.xlu1  ;;  %v3734_v13 = vcombine.high %v3733_v2, %v6299_v28  ;;  %v3321_v24 = vshrl.u32 %v3315_v8, 16  ;;  %v3319_v34 = vpack.i.b16 %v3315_v8, %v3290_v12  ;;  %v3316_v53 = vcombine.high %v3315_v8, %v6299_v28 }
 0xb2c   : > { %v3693_v62 = vcombine.low %v3597_v18, %v3661_v38  ;;  %v3739_v18 = vshrl.u32 %v3733_v2, 16  ;;  %v3326_v43 = vshrl.u32 %v3291_v11, 16 }
 0xb2d   : > { %v3745_v25 = vshrl.u32 %v3734_v13, 16  ;;  %v3322_v36 = vpack.i.b16 %v3321_v24, %v3320_v35  ;;  %v3327_v40 = vshrl.u32 %v3316_v53, 16  ;;  %v3325_v10 = vpack.i.b16 %v3316_v53, %v3291_v11 }
 0xb2e   : > { %v3700_v4 = vrot.slane %v3693_v62, %v6722_v21 }
 0xb2f   : > { %v3328_v44 = vpack.i.b16 %v3327_v40, %v3326_v43 }
 0xb30   : > { %v3701_v7 = vcombine.low %v3692_v3, %v3700_v4 }
 0xb32   : > { %v3708_v14 = vrot.slane %v3701_v7, %v6729_v33 }
 0xb34   : > { %v3737_v17 = vpack.i.b16 %v3733_v2, %v3708_v14  ;;  %v3738_v22 = vshrl.u32 %v3708_v14, 16  ;;  %v3709_v23 = vcombine.high %v3708_v14, %v6299_v28 }
 0xb36   : > { %v3751_v26 = vsel %vm1670_vm2, %v3737_v17, 0  ;;  %v3740_v27 = vpack.i.b16 %v3739_v18, %v3738_v22  ;;  %v3743_v29 = vpack.i.b16 %v3734_v13, %v3709_v23  ;;  %v3744_v30 = vshrl.u32 %v3709_v23, 16 }
 0xb37   : > { %5659 = vmatpush3.bf16.msra.mxu1 %v3751_v26 }
 0xb38   : > { %v3797_v31 = vsel %vm1670_vm2, %v3740_v27, 0  ;;  %5670 = vmatprep.subr.bf16.mxu1 %v6291_v0  ;;  %v3746_v46 = vpack.i.b16 %v3745_v25, %v3744_v30  ;;  %v3843_v32 = vsel %vm1670_vm2, %v3743_v29, 0 }
 0xb39   : > { %5665 = vmatpush3.bf16.msra.mxu0 %v3797_v31 }
 0xb3a   : > { %5661 = vmatmul.mubr.msk.bf16.vlgmr.msra.gmra.mxu1 %vm1666_vm3, %v3319_v34  ;;  %5676 = vmatprep.subr.bf16.mxu0 %v6291_v0  ;;  %v3889_v39 = vsel %vm1670_vm2, %v3746_v46, 0 }
 0xb3b   : > { %5671 = vmatpush3.bf16.msra.mxu1 %v3843_v32  ;;  %5672 = vmatprep.mubr.msk.bf16.mxu1 %vm6292_vm0, %v6291_v0  ;;  %v3182_v17 = vpop.permute.xlu0 %3181 }
 0xb3c   : > { %5667 = vmatmul.mubr.msk.bf16.vlgmr.msra.gmra.mxu0 %vm1666_vm3, %v3322_v36  ;;  %5682 = vmatprep.subr.bf16.mxu1 %v6291_v0 }
 0xb3d   : > { %5677 = vmatpush3.bf16.msra.mxu0 %v3889_v39  ;;  %5678 = vmatprep.mubr.msk.bf16.mxu0 %vm6292_vm0, %v6291_v0 }
 0xb3e   : > { %5688 = vmatprep.subr.bf16.mxu0 %v6291_v0 }
 0xb3f   : > { %v3180_v7 = vpop.permute.xlu1 %3179 }
 0xb42   : > { %5673 = vmatmul.mubr.msk.bf16.vlgmr.msra.gmra.mxu1 %vm1666_vm3, %v3325_v10 }
 0xb43   : > { %5684 = vmatprep.mubr.msk.bf16.mxu1 %vm6292_vm0, %v6291_v0  ;;  %v3184_v8 = vpop.permute.xlu1 %3183 }
 0xb44   : > { %5679 = vmatmul.mubr.msk.bf16.vlgmr.msra.gmra.mxu0 %vm1666_vm3, %v3328_v44  ;;  %v3191_v12 = vcombine.low %v3180_v7, %v3184_v8  ;;  %v3192_v18 = vcombine.high %v3180_v7, %v3184_v8 }
 0xb45   : > { %5690 = vmatprep.mubr.msk.bf16.mxu0 %vm6292_vm0, %v6291_v0 }
 0xb46   : > { %v3199_v25 = vrot.slane %v3191_v12, %v6722_v21 }
 0xbfa   : > { %v3787_v50 = vpop.f32.mrf.mxu1 }
 0xbfb   : > { %v3931_v51 = vmul.f32 0.35355338, %v3787_v50 }
 0xbfc   : > { %v5662_v52 = vpop.f32.mrf.mxu1  ;;  %v3833_v54 = vpop.f32.mrf.mxu0 }
 0xbfd   : > { %v3932_v16 = vmul.f32 0.35355338, %v3833_v54  ;;  %v7094_v41 = vsel %vm3940_vm11, %v3931_v51, -1e+09 }
 0xbfe   : > { %v3790_v55 = vpop.f32.mrf.mxu1  ;;  %v5668_v5 = vpop.f32.mrf.mxu0  ;;  %v3945_v19 = vsel %vm1666_vm3, %v7094_v41, -inf }
 0xbff   : > { %3946 = vmax.xlane.f32.xlu1 %v3945_v19  ;;  %v7099_v42 = vsel %vm3940_vm11, %v3932_v16, -1e+09 }
 0xc00   : > { %v5663_v15 = vpop.f32.mrf.mxu1  ;;  %v3836_v63 = vpop.f32.mrf.mxu0  ;;  %v3948_v56 = vsel %vm1666_vm3, %v7099_v42, -inf }
 0xc01   : > { %3949 = vmax.xlane.f32.xlu0 %v3948_v56 }
 0xc02   : > { %v5669_v57 = vpop.f32.mrf.mxu0  ;;  %v3879_v9 = vpop.f32.mrf.mxu1 }
 0xc03   : > { %v3933_v58 = vmul.f32 0.35355338, %v3879_v9 }
 0xc04   : > { %v5674_v37 = vpop.f32.mrf.mxu1  ;;  %v3925_v59 = vpop.f32.mrf.mxu0 }
 0xc05   : > { %v3934_v60 = vmul.f32 0.35355338, %v3925_v59  ;;  %v7104_v61 = vsel %vm3940_vm11, %v3933_v58, -1e+09 }
 0xc06   : > { %v3882_v38 = vpop.f32.mrf.mxu1  ;;  %v5680_v62 = vpop.f32.mrf.mxu0  ;;  %v3951_v1 = vsel %vm1666_vm3, %v7104_v61, -inf }
 0xc07   : > { %3952 = vmax.xlane.f32.xlu1 %v3951_v1  ;;  %v7109_v2 = vsel %vm3940_vm11, %v3934_v60, -1e+09 }
 0xc08   : > { %v5675_v3 = vpop.f32.mrf.mxu1  ;;  %v3928_v4 = vpop.f32.mrf.mxu0  ;;  %v3954_v40 = vsel %vm1666_vm3, %v7109_v2, -inf }
 0xc0a   : > { %v5681_v6 = vpop.f32.mrf.mxu0 }
 0xc18   : > { %3185 = vrot.lane.b32.xlu1 %v6988_v47, %s6295_s0  ;;  %v3206_v47 = vrot.slane %v3192_v18, %v6722_v21  ;;  %s6143_s0 = sshll.u32 %s6304_s18, 4  ;;  %s6144_s0 = int_to_ptr.vmem [resolvable:$false] %s6143_s0 }
 0xc19   : > { %s6145_s1 = scalar_lea.vmem %s6144_s0, 1024  ;;  %p6146_p7 = scmp.lt.s32.totalorder %s7268_s6, %s6144_s0 }
 0xc88   : > { %v7113_v13 = vpop.xlane.xlu1 %3946 }
 0xc89   : > { %v3957_v8 = vsub.f32 %v7094_v41, %v7113_v13 }
 0xc8a   : > { %v3950_v54 = vpop.xlane.xlu0 %3949 }
 0xc90   : > { %v7115_v14 = vpop.xlane.xlu1 %3952 }
 0xc94   : > { %v3186_v22 = vpop.permute.xlu1 %3185 }
 0xc95   : > { %v3207_v23 = vcombine.low %v3182_v17, %v3186_v22  ;;  %v3208_v24 = vcombine.high %v3182_v17, %v3186_v22  ;;  %v3958_v22 = vsub.f32 %v7099_v42, %v3950_v54 }
 0xc97   : > { %v3215_v26 = vrot.slane %v3207_v23, %v6722_v21  ;;  %v3222_v27 = vrot.slane %v3208_v24, %v6722_v21 }
 0xc99   : > { %v3223_v29 = vcombine.low %v3199_v25, %v3215_v26  ;;  %v3239_v31 = vcombine.low %v3206_v47, %v3222_v27  ;;  %v3240_v36 = vcombine.high %v3206_v47, %v3222_v27  ;;  %v3224_v10 = vcombine.high %v3199_v25, %v3215_v26 }
 0xc9a   : > { %v3961_v47 = vmul.f32 1.442695, %v3957_v8 }
 0xc9b   : > { %v3231_v30 = vrot.slane %v3223_v29, %v6729_v33  ;;  %v3247_v32 = vrot.slane %v3239_v31, %v6729_v33  ;;  %v3254_v39 = vrot.slane %v3240_v36, %v6729_v33  ;;  %v3238_v43 = vrot.slane %v3224_v10, %v6729_v33 }
 0xc9c   : > { %v3959_v29 = vsub.f32 %v7104_v61, %v7115_v14  ;;  %v3963_v31 = vmul.f32 1.442695, %v3958_v22  ;;  %5906 = vpow2.f32 %v3961_v47 }
 0xc9d   : > { %v3259_v34 = vpack.c.bf16 %v3231_v30, %v3231_v30  ;;  %v3255_v35 = vcombine.high %v3231_v30, %v6291_v0  ;;  %v3263_v53 = vpack.c.bf16 %v3247_v32, %v3247_v32  ;;  %v3265_v11 = vpack.c.bf16 %v3254_v39, %v3254_v39 }
 0xc9e   : > { %v3261_v44 = vpack.c.bf16 %v3238_v43, %v3238_v43  ;;  %v3256_v45 = vcombine.high %v3238_v43, %v6291_v0  ;;  %v3257_v49 = vcombine.high %v3247_v32, %v6291_v0  ;;  %v3258_v51 = vcombine.high %v3254_v39, %v6291_v0 }
 0xc9f   : > { %3997 = vxpose.xlu0.c.b16.start.end [1/1] (short) (narrow) %v3259_v34, 16  ;;  %v3260_v46 = vpack.c.bf16 %v3255_v35, %v3255_v35  ;;  %v3965_v32 = vmul.f32 1.442695, %v3959_v29  ;;  %5908 = vpow2.f32 %v3963_v31 }
 0xca0   : > { %v3262_v48 = vpack.c.bf16 %v3256_v45, %v3256_v45  ;;  %v3264_v50 = vpack.c.bf16 %v3257_v49, %v3257_v49  ;;  %v3266_v52 = vpack.c.bf16 %v3258_v51, %v3258_v51 }
 0xca1   : > { %4013 = vxpose.xlu1.c.b16.start.end [1/1] (short) (narrow) %v3260_v46, 16  ;;  %5910 = vpow2.f32 %v3965_v32 }
 0xca5   : > { %4061 = vxpose.xlu1.c.b16.start.end [1/1] (short) (narrow) %v3263_v53, 16 }
 0xca9   : > { %4093 = vxpose.xlu1.c.b16.start.end [1/1] (short) (narrow) %v3265_v11, 16 }
 0xcac   : > { %3955 = vmax.xlane.f32.xlu0 %v3954_v40 }
 0xcd9   : > { %4029 = vxpose.xlu0.c.b16.start.end [1/1] (short) (narrow) %v3261_v44, 16 }
 0xcdd   : > { %4045 = vxpose.xlu0.c.b16.start.end [1/1] (short) (narrow) %v3262_v48, 16 }
 0xce1   : > { %4077 = vxpose.xlu0.c.b16.start.end [1/1] (short) (narrow) %v3264_v50, 16 }
 0xce5   : > { %4109 = vxpose.xlu0.c.b16.start.end [1/1] (short) (narrow) %v3266_v52, 16 }
 0xd01   : > { %v4005_v16 = vpop.trf.xlu0 }
 0xd03   : > { %v4021_v55 = vpop.trf.xlu1 }
 0xd07   : > { %v4069_v19 = vpop.trf.xlu1 }
 0xd08   : > { %v4125_v9 = vcombine.low %v4005_v16, %v4069_v19 }
 0xd0a   : > { %v4132_v59 = vrot.slane %v4125_v9, %v6722_v21 }
 0xd0b   : > { %v4101_v63 = vpop.trf.xlu1 }
 0xd35   : > { %v3956_v5 = vpop.xlane.xlu0 %3955 }
 0xd36   : > { %v3960_v42 = vsub.f32 %v7109_v2, %v3956_v5  ;;  %v5907_v2 = vpop.eup %5906 }
 0xd37   : > { %v5909_v40 = vpop.eup %5908  ;;  %v3969_v10 = vsel %vm1666_vm3, %v5907_v2, 0.0 }
 0xd38   : > { %v3967_v61 = vmul.f32 1.442695, %v3960_v42  ;;  %v5911_v43 = vpop.eup %5910  ;;  %v3972_v44 = vsel %vm1666_vm3, %v5909_v40, 0.0 }
 0xd39   : > { %v3975_v48 = vsel %vm1666_vm3, %v5911_v43, 0.0 }
 0xd3a   : > { %5912 = vpow2.f32 %v3967_v61 }
 0xd3b   : > { %v4037_v15 = vpop.trf.xlu0 }
 0xd3c   : > { %v4133_v56 = vcombine.low %v4037_v15, %v4101_v63 }
 0xd3e   : > { %v4140_v58 = vrot.slane %v4133_v56, %v6722_v21 }
 0xd3f   : > { %v4053_v57 = vpop.trf.xlu0 }
 0xd40   : > { %v4141_v38 = vcombine.low %v4132_v59, %v4140_v58  ;;  %v4142_v18 = vcombine.high %v4132_v59, %v4140_v58 }
 0xd42   : > { %v4149_v6 = vrot.slane %v4141_v38, %v6729_v33  ;;  %v4156_v34 = vrot.slane %v4142_v18, %v6729_v33 }
 0xd43   : > { %v4085_v37 = vpop.trf.xlu0 }
 0xd44   : > { %v4159_v60 = vcombine.low %v4021_v55, %v4085_v37  ;;  %v4197_v23 = vshrl.u32 %v4149_v6, 16  ;;  %v4157_v26 = vcombine.high %v4149_v6, %v6299_v28  ;;  %v4213_v39 = vshrl.u32 %v4156_v34, 16 }
 0xd45   : > { %v4158_v51 = vcombine.high %v4156_v34, %v6299_v28 }
 0xd46   : > { %v4166_v3 = vrot.slane %v4159_v60, %v6722_v21  ;;  %v4205_v46 = vshrl.u32 %v4157_v26, 16 }
 0xd47   : > { %v4117_v62 = vpop.trf.xlu0  ;;  %v5913_v45 = vpop.eup %5912  ;;  %v4221_v16 = vshrl.u32 %v4158_v51, 16 }
 0xd48   : > { %v4167_v1 = vcombine.low %v4053_v57, %v4117_v62  ;;  %v3978_v49 = vsel %vm1666_vm3, %v5913_v45, 0.0 }
 0xd4a   : > { %v4174_v4 = vrot.slane %v4167_v1, %v6722_v21 }
 0xd4c   : > { %v4175_v7 = vcombine.low %v4166_v3, %v4174_v4  ;;  %v4176_v12 = vcombine.high %v4166_v3, %v4174_v4 }
 0xd4e   : > { %v4183_v17 = vrot.slane %v4175_v7, %v6729_v33  ;;  %v4190_v30 = vrot.slane %v4176_v12, %v6729_v33 }
 0xd50   : > { %v4195_v24 = vpack.i.b16 %v4183_v17, %v4149_v6  ;;  %v4198_v25 = vshrl.u32 %v4183_v17, 16  ;;  %v4191_v27 = vcombine.high %v4183_v17, %v6299_v28  ;;  %v4214_v53 = vshrl.u32 %v4190_v30, 16 }
 0xd51   : > { %v4211_v14 = vpack.i.b16 %v4190_v30, %v4156_v34  ;;  %v4192_v50 = vcombine.high %v4190_v30, %v6299_v28 }
 0xd52   : > { %4225 = vxpose.xlu1.c.b16.start.end [1/1] (short) (narrow) %v4195_v24, 16  ;;  %v4199_v41 = vpack.i.b16 %v4198_v25, %v4197_v23  ;;  %v4206_v13 = vshrl.u32 %v4191_v27, 16  ;;  %v4203_v35 = vpack.i.b16 %v4191_v27, %v4157_v26  ;;  %v4215_v11 = vpack.i.b16 %v4214_v53, %v4213_v39 }
 0xd53   : > { %v4222_v52 = vshrl.u32 %v4192_v50, 16  ;;  %v4219_v54 = vpack.i.b16 %v4192_v50, %v4158_v51 }
 0xd54   : > { %4241 = vxpose.xlu0.c.b16.start.end [1/1] (short) (narrow) %v4199_v41, 16  ;;  %v4207_v36 = vpack.i.b16 %v4206_v13, %v4205_v46 }
 0xd55   : > { %v4223_v55 = vpack.i.b16 %v4222_v52, %v4221_v16 }
 0xd56   : > { %4257 = vxpose.xlu1.c.b16.start.end [1/1] (short) (narrow) %v4203_v35, 16 }
 0xd58   : > { %4273 = vxpose.xlu0.c.b16.start.end [1/1] (short) (narrow) %v4207_v36, 16 }
 0xd5a   : > { %4289 = vxpose.xlu1.c.b16.start.end [1/1] (short) (narrow) %v4211_v14, 16 }
 0xd5c   : > { %4305 = vxpose.xlu0.c.b16.start.end [1/1] (short) (narrow) %v4215_v11, 16 }
 0xd67   : > { %3970 = vadd.xlane.f32.xlu1 %v3969_v10 }
 0xd69   : > { %3973 = vadd.xlane.f32.xlu0 %v3972_v44 }
 0xd6b   : > { %3976 = vadd.xlane.f32.xlu1 %v3975_v48 }
 0xd6d   : > { %3979 = vadd.xlane.f32.xlu0 %v3978_v49 }
 0xd98   : > { %4321 = vxpose.xlu1.c.b16.start.end [1/1] (short) (narrow) %v4219_v54, 16 }
 0xd9a   : > { %4337 = vxpose.xlu0.c.b16.start.end [1/1] (short) (narrow) %v4223_v55, 16 }
 0xdb4   : > { %v4233_v5 = vpop.trf.xlu1 }
 0xdb6   : > { %v4249_v19 = vpop.trf.xlu0 }
 0xdb8   : > { %v4265_v15 = vpop.trf.xlu1 }
 0xdba   : > { %v4281_v63 = vpop.trf.xlu0 }
 0xdbc   : > { %v4297_v56 = vpop.trf.xlu1 }
 0xdbd   : > { %v4353_v1 = vcombine.low %v4233_v5, %v4297_v56 }
 0xdbe   : > { %v4313_v57 = vpop.trf.xlu0 }
 0xdbf   : > { %v4378_v38 = vcombine.low %v4249_v19, %v4313_v57  ;;  %v4360_v18 = vrot.slane %v4353_v1, %v6722_v21 }
 0xdc1   : > { %v4385_v8 = vrot.slane %v4378_v38, %v6722_v21 }
 0xdf0   : > { %v3971_v9 = vpop.xlane.xlu1 %3970 }
 0xdf1   : > { %5914 = vrcp.f32 %v3971_v9 }
 0xdf2   : > { %v3974_v58 = vpop.xlane.xlu0 %3973 }
 0xdf3   : > { %5916 = vrcp.f32 %v3974_v58 }
 0xdf4   : > { %v3977_v37 = vpop.xlane.xlu1 %3976 }
 0xdf5   : > { %5918 = vrcp.f32 %v3977_v37 }
 0xdf6   : > { %v3980_v59 = vpop.xlane.xlu0 %3979 }
 0xdf7   : > { %5920 = vrcp.f32 %v3980_v59 }
 0xdfa   : > { %v4329_v60 = vpop.trf.xlu1 }
 0xdfb   : > { %v4361_v62 = vcombine.low %v4265_v15, %v4329_v60 }
 0xdfc   : > { %v4345_v3 = vpop.trf.xlu0 }
 0xdfd   : > { %v4386_v4 = vcombine.low %v4281_v63, %v4345_v3  ;;  %v4368_v7 = vrot.slane %v4361_v62, %v6722_v21 }
 0xdfe   : > { %v5915_v6 = vpop.eup %5914 }
 0xdff   : > { %v4393_v12 = vrot.slane %v4386_v4, %v6722_v21  ;;  %v3985_v17 = vmul.f32 %v5915_v6, %v5907_v2  ;;  %v4369_v27 = vcombine.low %v4360_v18, %v4368_v7  ;;  %v5880_v18 = vld [vmem:[#allocation13 + $0x8] sm:$0xff]  }
 0xe00   : > { %v5917_v22 = vpop.eup %5916 }
 0xe01   : > { %v4394_v23 = vcombine.low %v4385_v8, %v4393_v12  ;;  %3989 = vst.msk [vmem:[%s7159_s3] sm:$0xff] %vm1666_vm3, %v3985_v17  ;;  %v3993_v24 = vpack.c.bf16 %v3985_v17, %v3985_v17  ;;  %v3986_v25 = vmul.f32 %v5917_v22, %v5909_v40  ;;  %v4376_v31 = vrot.slane %v4369_v27, %v6729_v33 }
 0xe02   : > { %v5919_v26 = vpop.eup %5918 }
 0xe03   : > { %v4419_v47 = vsel %vm1666_vm3, %v3993_v24, 0  ;;  %3990 = vst.msk [vmem:[%s7159_s3 + $0x8] sm:$0xff] %vm1666_vm3, %v3986_v25  ;;  %v4401_v30 = vrot.slane %v4394_v23, %v6729_v33  ;;  %v3994_v41 = vpack.c.bf16 %v3986_v25, %v3986_v25  ;;  %v3987_v13 = vmul.f32 %v5919_v26, %v5911_v43 }
 0xe04   : > { %v5921_v29 = vpop.eup %5920  ;;  %5683 = vmatpush3.bf16.xpose.msra.mxu1 %v4419_v47  ;;  %v4406_v36 = vshrl.u32 %v4376_v31, 16  ;;  %v4377_v11 = vcombine.high %v4376_v31, %v6299_v28 }
 0xe05   : > { %5694 = vmatprep.subr.bf16.mxu1 %v6291_v0  ;;  %v4465_v42 = vsel %vm1666_vm3, %v3994_v41, 0  ;;  %3991 = vst.msk [vmem:[%s7159_s3 + $0x10] sm:$0xff] %vm1666_vm3, %v3987_v13  ;;  %v3988_v34 = vmul.f32 %v5921_v29, %v5913_v45  ;;  %v3995_v35 = vpack.c.bf16 %v3987_v13, %v3987_v13  ;;  %v4407_v46 = vshrl.u32 %v4401_v30, 16  ;;  %v5881_v41 = vld [vmem:[#allocation13] sm:$0xff]  }
 0xe06   : > { %5689 = vmatpush3.bf16.xpose.msra.mxu0 %v4465_v42  ;;  %v4405_v32 = vpack.i.b16 %v4401_v30, %v4376_v31  ;;  %v4402_v14 = vcombine.high %v4401_v30, %v6299_v28  ;;  %v4412_v43 = vshrl.u32 %v4377_v11, 16 }
 0xe07   : > { %5700 = vmatprep.subr.bf16.mxu0 %v6291_v0  ;;  %3992 = vst.msk [vmem:[%s7159_s3 + $0x18] sm:$0xff] %vm1666_vm3, %v3988_v34  ;;  %v3996_v53 = vpack.c.bf16 %v3988_v34, %v3988_v34  ;;  %v4511_v61 = vsel %vm1666_vm3, %v3995_v35, 0  ;;  %v4408_v39 = vpack.i.b16 %v4407_v46, %v4406_v36 }
 0xe08   : > { %v4413_v40 = vshrl.u32 %v4402_v14, 16  ;;  %v4411_v10 = vpack.i.b16 %v4402_v14, %v4377_v11 }
 0xe09   : > { %v4557_v2 = vsel %vm1666_vm3, %v3996_v53, 0 }
 0xe0a   : > { %v4414_v44 = vpack.i.b16 %v4413_v40, %v4412_v43 }
 0xe0b   : > { %5685 = vmatmul.mubr.msk.bf16.vlgmr.msra.gmra.mxu1 %vm1666_vm3, %v4405_v32 }
 0xe0c   : > { %5695 = vmatpush3.bf16.xpose.msra.mxu1 %v4511_v61  ;;  %5696 = vmatprep.mubr.msk.bf16.mxu1 %vm6292_vm0, %v6291_v0 }
 0xe0d   : > { %5706 = vmatprep.subr.bf16.mxu1 %v6291_v0  ;;  %5691 = vmatmul.mubr.msk.bf16.vlgmr.msra.gmra.mxu0 %vm1666_vm3, %v4408_v39 }
 0xe0e   : > { %5701 = vmatpush3.bf16.xpose.msra.mxu0 %v4557_v2  ;;  %5702 = vmatprep.mubr.msk.bf16.mxu0 %vm6292_vm0, %v6291_v0 }
 0xe0f   : > { %5714 = vmatprep.subr.bf16.mxu0 %v6291_v0 }
 0xe13   : > { %5697 = vmatmul.mubr.msk.bf16.vlgmr.msra.gmra.mxu1 %vm1666_vm3, %v4411_v10 }
 0xe14   : > { %5710 = vmatprep.mubr.msk.bf16.mxu1 %vm6292_vm0, %v6291_v0  ;;  %5707 = vmatpush3.bf16.msra.mxu1 %v5880_v18 }
 0xe15   : > { %5703 = vmatmul.mubr.msk.bf16.vlgmr.msra.gmra.mxu0 %vm1666_vm3, %v4414_v44  ;;  %5708 = vmatprep.subr.bf16.mxu1 %v6291_v0 }
 0xe16   : > { %5718 = vmatprep.mubr.msk.bf16.mxu0 %vm6292_vm0, %v6291_v0 }
 0xe18   : > { %5709 = vmatpush3.bf16.msra.mxu1 %v5881_v41 }
 0xe19   : > { %5722 = vmatprep.subr.bf16.mxu1 %v6291_v0 }
 0xecb   : > { %v4455_v28 = vpop.f32.mrf.mxu1 }
 0xecc   : > { %4599 = vxpose.xlu1.b32.start.end [1/1] (short) (narrow) %v4455_v28, 8 }
 0xecd   : > { %v5686_v45 = vpop.f32.mrf.mxu1  ;;  %v4501_v48 = vpop.f32.mrf.mxu0 }
 0xece   : > { %4631 = vxpose.xlu0.b32.start.end [1/1] (short) (narrow) %v4501_v48, 8 }
 0xecf   : > { %v4458_v49 = vpop.f32.mrf.mxu1  ;;  %v5692_v50 = vpop.f32.mrf.mxu0 }
 0xed1   : > { %v5687_v51 = vpop.f32.mrf.mxu1  ;;  %v4504_v52 = vpop.f32.mrf.mxu0 }
 0xed3   : > { %v4547_v54 = vpop.f32.mrf.mxu1  ;;  %v5693_v16 = vpop.f32.mrf.mxu0 }
 0xed4   : > { %4663 = vxpose.xlu0.b32.start.end [1/1] (short) (narrow) %v4547_v54, 8 }
 0xed5   : > { %v5698_v55 = vpop.f32.mrf.mxu1  ;;  %v4593_v5 = vpop.f32.mrf.mxu0 }
 0xed6   : > { %4695 = vxpose.xlu1.b32.start.end [1/1] (short) (narrow) %v4593_v5, 8 }
 0xed7   : > { %v4550_v19 = vpop.f32.mrf.mxu1  ;;  %v5704_v15 = vpop.f32.mrf.mxu0 }
 0xed9   : > { %v5699_v63 = vpop.f32.mrf.mxu1  ;;  %v4596_v56 = vpop.f32.mrf.mxu0 }
 0xeda   : > { %v5882_v56 = vld [vmem:[#allocation14 + $0x8] sm:$0xff]  }
 0xedb   : > { %v5705_v57 = vpop.f32.mrf.mxu0  ;;  %5715 = vmatpush3.bf16.msra.mxu0 %v5882_v56 }
 0xedc   : > { %v5883_v57 = vld [vmem:[#allocation14] sm:$0xff]   ;;  %5716 = vmatprep.subr.bf16.mxu0 %v6291_v0 }
 0xedf   : > { %5717 = vmatpush3.bf16.msra.mxu0 %v5883_v57 }
 0xf48   : > { %v4615_v58 = vpop.trf.xlu1 }
 0xf4a   : > { %v4647_v9 = vpop.trf.xlu0 }
 0xf50   : > { %v4679_v37 = vpop.trf.xlu0 }
 0xf51   : > { %v4727_v59 = vcombine.low %v4615_v58, %v4679_v37  ;;  %v4728_v60 = vcombine.high %v4615_v58, %v4679_v37 }
 0xf52   : > { %v4711_v38 = vpop.trf.xlu1 }
 0xf53   : > { %v4743_v62 = vcombine.low %v4647_v9, %v4711_v38  ;;  %v4744_v1 = vcombine.high %v4647_v9, %v4711_v38  ;;  %v4735_v3 = vrot.slane %v4727_v59, %v6722_v21  ;;  %v4742_v4 = vrot.slane %v4728_v60, %v6722_v21  ;;  %v5885_v9 = vld [vmem:[%s7388_s15 + $0x10] sm:$0xff]   ;;  %v5497_v38 = vld [vmem:[%s7384_s11] ss:$0 sm:$0xff] }
 0xf55   : > { %v4751_v6 = vrot.slane %v4743_v62, %v6722_v21  ;;  %v4758_v7 = vrot.slane %v4744_v1, %v6722_v21  ;;  %v5498_v1 = vld [vmem:[%s7385_s12] ss:$0 sm:$0xff] }
 0xf57   : > { %v4759_v8 = vcombine.low %v4735_v3, %v4751_v6  ;;  %v4760_v12 = vcombine.high %v4735_v3, %v4751_v6  ;;  %v4775_v17 = vcombine.low %v4742_v4, %v4758_v7  ;;  %v4776_v22 = vcombine.high %v4742_v4, %v4758_v7  ;;  %v5886_v7 = vld [vmem:[%s7388_s15 + $0x8] sm:$0xff]  }
 0xf59   : > { %v4767_v23 = vrot.slane %v4759_v8, %v6729_v33  ;;  %v4774_v24 = vrot.slane %v4760_v12, %v6729_v33  ;;  %v4783_v25 = vrot.slane %v4775_v17, %v6729_v33  ;;  %v4790_v26 = vrot.slane %v4776_v22, %v6729_v33  ;;  %v5887_v8 = vld [vmem:[%s7388_s15] sm:$0xff]  }
 0xf5a   : > { %v5499_v12 = vld [vmem:[%s7387_s14] ss:$0 sm:$0xff] }
 0xf5b   : > { %v4795_v27 = vcombine.low %v4767_v23, %v4774_v24  ;;  %v5492_v47 = vcombine.high %v4767_v23, %v4774_v24  ;;  %v4811_v29 = vcombine.low %v4783_v25, %v4790_v26  ;;  %v5493_v30 = vcombine.high %v4783_v25, %v4790_v26 }
 0xf5d   : > { %v4802_v13 = vrot.slane %v4795_v27, %v6722_v21  ;;  %v4810_v31 = vrot.slane %v5492_v47, %v6722_v21  ;;  %v4818_v42 = vrot.slane %v4811_v29, %v6722_v21  ;;  %v4826_v34 = vrot.slane %v5493_v30, %v6722_v21 }
 0xf5f   : > { %v4828_v35 = vcombine.high %v4802_v13, %v4810_v31  ;;  %v4844_v46 = vcombine.high %v4818_v42, %v4826_v34  ;;  %v4827_v32 = vcombine.low %v4802_v13, %v4810_v31  ;;  %v4843_v36 = vcombine.low %v4818_v42, %v4826_v34 }
 0xf61   : > { %v4842_v53 = vrot.slane %v4828_v35, %v6729_v33  ;;  %v4858_v61 = vrot.slane %v4844_v46, %v6729_v33  ;;  %v4835_v14 = vrot.slane %v4827_v32, %v6729_v33  ;;  %v4851_v39 = vrot.slane %v4843_v36, %v6729_v33 }
 0xf63   : > { %v4861_v11 = vcombine.low %v4842_v53, %v4858_v61  ;;  %v4860_v2 = vcombine.high %v4835_v14, %v4851_v39  ;;  %v4859_v40 = vcombine.low %v4835_v14, %v4851_v39  ;;  %v4862_v21 = vcombine.high %v4842_v53, %v4858_v61 }
 0xf65   : > { %4868 = vrot.lane.b32.xlu1 %v4861_v11, %s7471_s26  ;;  %4864 = vrot.lane.b32.xlu0 %v4860_v2, %s7472_s17  ;;  %s7272_s26 = scalar_lea.sflag [#allocation18], %s7475_s22 }
 0xf69   : > { %4872 = vrot.lane.b32.xlu1 %v4862_v21, %s7473_s30  ;;  %s6139_s30 = scalar_lea.vmem %s7268_s6, 512 }
 0xf6a   : > { %p6140_p10 = scmp.ne.s32.totalorder %s7268_s6, %s6139_s30  ;;  %p6147_p6 = scmp.lt.s32.totalorder %s6145_s1, %s6139_s30 }
 0xf6c   : > { %p6141_p1 = pnand %p6140_p10, %p7476_p3  ;;  %p6148_p2 = por %p6147_p6, %p6146_p7 }
 0xf6e   : > { %p6142_p8 = pneg %p6141_p1 }
 0xf70   : > { %p6149_p11 = pnand %p6148_p2, %p6142_p8 }
 0xfd7   : > { %v4869_v10 = vpop.permute.xlu1 %4868  ;;  %v4865_v43 = vpop.permute.xlu0 %4864 }
 0xfd8   : > { %v4875_v44 = vsel %vm1666_vm3, %v4859_v40, %v4865_v43 }
 0xfd9   : > { %v4876_v45 = vsel %vm2793_vm8, %v4875_v44, %v4869_v10 }
 0xfdb   : > { %v4873_v28 = vpop.permute.xlu1 %4872 }
 0xfdc   : > { %v4877_v48 = vsel %vm2795_vm9, %v4876_v45, %v4873_v28 }
 0xfdd   : > { %v4878_v33 = vpack.c.bf16 %v4877_v48, %v4877_v48 }
 0xfdf   : > { %5711 = vmatmul.mubr.msk.bf16.vlgmr.msra.gmra.mxu1 %vm874_vm1, %v4878_v33 }
 0xfe0   : > { %5730 = vmatprep.mubr.msk.bf16.mxu1 %vm6292_vm0, %v6291_v0 }
0x109f   : > { %v4928_v49 = vpop.f32.mrf.mxu1 }
0x10a0   : > { %v4929_v50 = vadd.f32 %v4928_v49, %v7012_v20  ;;  %v5884_v20 = vld [vmem:[%s7388_s15 + $0x18] sm:$0xff]  }
0x10a1   : > { %v5712_v51 = vpop.f32.mrf.mxu1  ;;  %5723 = vmatpush3.bf16.msra.mxu1 %v5884_v20 }
0x10a2   : > { %v4934_v52 = vsel %vm874_vm1, %v4929_v50, 0.0  ;;  %5724 = vmatprep.subr.bf16.mxu1 %v6291_v0 }
0x10a3   : > { %4935 = vadd.xlane.f32.xlu1 %v4934_v52  ;;  %v4931_v54 = vpop.f32.mrf.mxu1 }
0x10a5   : > { %v5713_v16 = vpop.f32.mrf.mxu1  ;;  %5725 = vmatpush3.bf16.msra.mxu1 %v5885_v9 }
0x10a6   : > { %5726 = vmatprep.subr.bf16.mxu1 %v6291_v0 }
0x10a9   : > { %5727 = vmatpush3.bf16.msra.mxu1 %v5886_v7 }
0x10aa   : > { %5728 = vmatprep.subr.bf16.mxu1 %v6291_v0  ;;  %v5503_v0 = vld [vmem:[%s7389_s16] ss:$0 sm:$0xff] }
0x10ad   : > { %5729 = vmatpush3.bf16.msra.mxu1 %v5887_v8 }
0x112c   : > { %v4936_v55 = vpop.xlane.xlu1 %4935 }
0x112d   : > { %v4937_v5 = vmul.f32 0.03125, %v4936_v55 }
0x112f   : > { %v4938_v19 = vsub.f32 %v4929_v50, %v4937_v5 }
0x1131   : > { %v4939_v15 = vmul.f32 %v4938_v19, %v4938_v19 }
0x1133   : > { %v4940_v63 = vsel %vm874_vm1, %v4939_v15, 0.0 }
0x1134   : > { %4941 = vadd.xlane.f32.xlu0 %v4940_v63 }
0x11bd   : > { %v4942_v58 = vpop.xlane.xlu0 %4941 }
0x11be   : > { %v4943_v37 = vmul.f32 0.03125, %v4942_v58 }
0x11c0   : > { %v4944_v59 = vadd.f32 1e-05, %v4943_v37 }
0x11c2   : > { %5922 = vrsqrt.f32 %v4944_v59 }
0x11cf   : > { %v5923_v60 = vpop.eup %5922 }
0x11d0   : > { %v4946_v62 = vmul.f32 %v5923_v60, %v4938_v19 }
0x11d2   : > { %v4953_v3 = vmul.f32 %v5497_v38, %v4946_v62 }
0x11d4   : > { %v4960_v4 = vadd.f32 %v5498_v1, %v4953_v3 }
0x11d6   : > { %v4961_v6 = vpack.c.bf16 %v4960_v4, %v4960_v4 }
0x11d8   : > { %5719 = vmatmul.mubr.msk.bf16.vlgmr.msra.gmra.mxu0 %vm874_vm1, %v4961_v6 }
0x1298   : > { %v5022_v17 = vpop.f32.mrf.mxu0 }
0x1299   : > { %v5023_v22 = vadd.f32 %v5499_v12, %v5022_v17 }
0x129a   : > { %v5720_v18 = vpop.f32.mrf.mxu0 }
0x129b   : > { %v5028_v23 = vmax.f32 %v5023_v22, 0.0 }
0x129c   : > { %v5025_v24 = vpop.f32.mrf.mxu0 }
0x129d   : > { %v5029_v25 = vpack.c.bf16 %v5028_v23, %v5028_v23 }
0x129e   : > { %v5721_v26 = vpop.f32.mrf.mxu0 }
0x129f   : > { %5731 = vmatmul.mubr.msk.bf16.vlgmr.msra.gmra.mxu1 %vm5069_vm12, %v5029_v25 }
0x135f   : > { %v5107_v27 = vpop.f32.mrf.mxu1 }
0x1360   : > { %v5108_v47 = vadd.f32 %v5503_v0, %v5107_v27 }
0x1361   : > { %v5732_v29 = vpop.f32.mrf.mxu1 }
0x1362   : > { %v5113_v30 = vadd.f32 %v5108_v47, %v4960_v4 }
0x1363   : > { %v5110_v41 = vpop.f32.mrf.mxu1 }
0x1364   : > { %v5116_v13 = vsel %vm874_vm1, %v5113_v30, 0.0 }
0x1365   : > { %5117 = vadd.xlane.f32.xlu0 %v5116_v13  ;;  %v5733_v31 = vpop.f32.mrf.mxu1 }
0x13ee   : > { %v5118_v42 = vpop.xlane.xlu0 %5117 }
0x13ef   : > { %v5119_v34 = vmul.f32 0.03125, %v5118_v42 }
0x13f1   : > { %v7253_v35 = vsub.f32 %v5113_v30, %v5119_v34 }
0x13f3   : > { %v5121_v46 = vmul.f32 %v7253_v35, %v7253_v35 }
0x13f5   : > { %v5122_v32 = vsel %vm874_vm1, %v5121_v46, 0.0 }
0x13f6   : > { %5123 = vadd.xlane.f32.xlu1 %v5122_v32 }
0x13f7   : > { %6152 = shalt.err (!%p6149_p11)
}
0x13f8   : > { %s6153_s8 = scalar_lea.hbm %s7265_s7, 512  ;;  %s6157_s22 = scalar_lea.hbm %s7474_s24, 1024 }
0x13f9   : > { %p6154_p12 = scmp.ne.s32.totalorder %s7265_s7, %s6153_s8  ;;  %p6158_p4 = scmp.lt.s32.totalorder %s7265_s7, %s7474_s24 }
0x13fa   : > { %p6159_p5 = scmp.lt.s32.totalorder %s6157_s22, %s6153_s8 }
0x13fb   : > { %p6155_p13 = pnand %p6154_p12, %p7476_p3 }
0x13fc   : > { %p6160_p9 = por %p6159_p5, %p6158_p4 }
0x13fd   : > { %p6156_p0 = pneg %p6155_p13 }
0x13ff   : > { %p6161_p10 = pnand %p6160_p9, %p6156_p0 }
0x1401   : > { %6164 = shalt.err (!%p6161_p10)
}
0x1402   : > { %s7417_s30 = smov 128   ;;  %s7477_s28 = sshll.u32 %s6439_s29, 9 }
0x1403   : > { %5763 = dma.vmem_to_hbm [thread:$0]  (%p7476_p3), %s7268_s6, 512, %s7265_s7, %s7272_s26, %s7417_s30, %s7417_s30, %s7472_s17  }
0x1404   : > { %s7478_s8 = sld [smem:[#allocation46_spill]]  ;;  %s6165_s4 = scalar_lea.vmem %s7300_s13, 512 }
0x1405   : > { %p6166_p1 = scmp.ne.s32.totalorder %s7300_s13, %s6165_s4  ;;  %s6306_s22 = smov [#allocation19]  }
0x1406   : > { %s6169_s18 = sshll.u32 %s6306_s22, 4  ;;  %s6170_s18 = int_to_ptr.vmem [resolvable:$false] %s6169_s18 }
0x1407   : > { %p6167_p8 = pnand %p6166_p1, %p7476_p3  ;;  %s6171_s7 = scalar_lea.vmem %s6170_s18, 1024 }
0x1408   : > { %p6172_p6 = scmp.lt.s32.totalorder %s7300_s13, %s6170_s18  ;;  %p6173_p2 = scmp.lt.s32.totalorder %s6171_s7, %s6165_s4 }
0x1409   : > { %p6168_p7 = pneg %p6167_p8 }
0x140a   : > { %s5196_s19 = scalar_lea.hbm %s7478_s8, %s7477_s28  ;;  %p6174_p11 = por %p6173_p2, %p6172_p6 }
0x140c   : > { %p6175_p12 = pnand %p6174_p11, %p6168_p7 }
0x140e   : > { %6178 = shalt.err (!%p6175_p12)
}
0x140f   : > { %s6179_s3 = scalar_lea.hbm %s5196_s19, 512  ;;  %s6183_s0 = scalar_lea.hbm %s7478_s8, 1024 }
0x1410   : > { %p6180_p13 = scmp.ne.s32.totalorder %s5196_s19, %s6179_s3  ;;  %p6184_p5 = scmp.lt.s32.totalorder %s5196_s19, %s7478_s8 }
0x1411   : > { %p6185_p9 = scmp.lt.s32.totalorder %s6183_s0, %s6179_s3 }
0x1412   : > { %p6181_p0 = pnand %p6180_p13, %p7476_p3 }
0x1413   : > { %p6186_p10 = por %p6185_p9, %p6184_p5 }
0x1414   : > { %p6182_p4 = pneg %p6181_p0 }
0x1416   : > { %p6187_p1 = pnand %p6186_p10, %p6182_p4 }
0x1418   : > { %6190 = shalt.err (!%p6187_p1)
}
0x1419   : > { %s7479_s4 = smov 128   ;;  %s5447_s30 = sshll.u32 %s6634_s23, 3 }
0x141a   : > { %5764 = dma.vmem_to_hbm [thread:$0]  (%p7476_p3), %s7300_s13, 512, %s5196_s19, %s7272_s26, %s7479_s4, %s7479_s4, %s7472_s17  }
0x141b   : > { %s7480_s7 = sld [smem:[#allocation42_spill]]  ;;  %s5514_s0 = sshll.u32 %s6439_s29, 7 }
0x141c   : > { %s7481_s28 = sld [smem:[#allocation43_spill]]  ;;  %s815_s17 = scalar_lea.vmem [#allocation16], %s5447_s30 }
0x141d   : > { %s5168_s13 = sshll.u32 %s815_s17, 4  ;;  %s7482_s1 = sld [smem:[#allocation44_spill]]  ;;  %s5169_s13 = int_to_ptr.vmem [resolvable:$true] %s5168_s13 }
0x141e   : > { %s5145_s22 = scalar_lea.sflag [#allocation4], %s6634_s23  ;;  %s6191_s18 = scalar_lea.vmem %s5169_s13, 128 }
0x141f   : > { %p6192_p8 = scmp.ne.s32.totalorder %s5169_s13, %s6191_s18 }
0x1421   : > { %v5509_v39 = vld [vmem:[%s7480_s7] ss:$0 sm:$0xff]  ;;  %p6193_p7 = pnand %p6192_p8, %p7476_p3  ;;  %s6307_s7 = smov [#allocation16]  }
0x1422   : > { %v5510_v2 = vld [vmem:[%s7481_s28] ss:$0 sm:$0xff]  ;;  %s6195_s3 = sshll.u32 %s6307_s7, 4  ;;  %s6196_s3 = int_to_ptr.vmem [resolvable:$false] %s6195_s3 }
0x1423   : > { %s5166_s4 = scalar_lea.hbm %s7482_s1, %s5514_s0  ;;  %p6194_p6 = pneg %p6193_p7 }
0x1424   : > { %s6197_s29 = scalar_lea.vmem %s6196_s3, 256  ;;  %p6198_p2 = scmp.lt.s32.totalorder %s5169_s13, %s6196_s3 }
0x1425   : > { %p6199_p11 = scmp.lt.s32.totalorder %s6197_s29, %s6191_s18 }
0x1427   : > { %p6200_p12 = por %p6199_p11, %p6198_p2 }
0x1429   : > { %p6201_p13 = pnand %p6200_p12, %p6194_p6 }
0x147f   : > { %v5124_v36 = vpop.xlane.xlu1 %5123 }
0x1480   : > { %v5125_v53 = vmul.f32 0.03125, %v5124_v36 }
0x1482   : > { %v5126_v61 = vadd.f32 1e-05, %v5125_v53 }
0x1484   : > { %5924 = vrsqrt.f32 %v5126_v61 }
0x1491   : > { %v5925_v14 = vpop.eup %5924 }
0x1492   : > { %v5128_v11 = vmul.f32 %v5925_v14, %v7253_v35 }
0x1494   : > { %v5135_v40 = vmul.f32 %v5509_v39, %v5128_v11 }
0x1496   : > { %v5142_v21 = vadd.f32 %v5510_v2, %v5135_v40 }
0x1498   : > { %5143 = vst.msk [vmem:[%s815_s17] sm:$0xff] %vm874_vm1, %v5142_v21 }
0x1499   : > { %6204 = shalt.err (!%p6201_p13)
}
0x149a   : > { %s6205_s30 = scalar_lea.hbm %s5166_s4, 128  ;;  %s6209_s28 = scalar_lea.hbm %s7482_s1, 256 }
0x149b   : > { %p6206_p0 = scmp.ne.s32.totalorder %s5166_s4, %s6205_s30  ;;  %p6210_p9 = scmp.lt.s32.totalorder %s5166_s4, %s7482_s1 }
0x149c   : > { %p6211_p10 = scmp.lt.s32.totalorder %s6209_s28, %s6205_s30 }
0x149d   : > { %p6207_p4 = pnand %p6206_p0, %p7476_p3 }
0x149e   : > { %p6212_p1 = por %p6211_p10, %p6210_p9 }
0x149f   : > { %p6208_p5 = pneg %p6207_p4 }
0x14a1   : > { %p6213_p8 = pnand %p6212_p1, %p6208_p5 }
0x14a3   : > { %6216 = shalt.err (!%p6213_p8)
}
0x14a4   : > { %5762 = dma.vmem_to_hbm [thread:$0]  (%p7476_p3), %s5169_s13, 128, %s5166_s4, %s5145_s22  }
0x14a5 PF: > { %s5212_s26 = sand.u32 1, %s6267_s2   ;;  %p7483_p7 = scmp.ne.s32.totalorder %s7450_s21, 0 }
0x14a6   : > { %p7484_p6 = scmp.ge.s32.totalorder %s6279_s27, 2  ;;  %s5213_s19 = scalar_lea.sflag [#allocation4], %s5212_s26 }
0x14a8   : > { %p5795_p2 = pnand %p7484_p6, %p7483_p7 }
0x14aa   : > { %p5796_p11 = pneg %p5795_p2 }
0x14ac   : > { %6258 = dma.done.wait (%p5796_p11), %s5213_s19, 128  }
0x14ad   : > { %6260 = vsyncadd (%p5796_p11), %s5213_s19, 4294967168  ;;  %s7485_s18 = sadd.s32 4294967294, %s6279_s27  }
0x14ae   : > { %s5221_s7 = sand.u32 1, %s7485_s18  }
0x14af   : > { %s5222_s3 = scalar_lea.sflag [#allocation18], %s5221_s7 }
0x14b0   : > { %6262 = dma.done.wait (%p5796_p11), %s5222_s3, 1024  }
0x14b1   : > { %6264 = vsyncadd (%p5796_p11), %s5222_s3, 4294966272  ;;  %s7486_s27 = sld [smem:[#allocation29_spill]]  ;;  %s7489_s2 = smov %s6271_s25 }
0x14b2   : > { %s7487_s20 = sld [smem:[#allocation28_spill]] }
0x14b3   : > { %s7488_s26 = sld [smem:[#allocation30_spill]] }
0x14b7   : > { %p44_p3 = scmp.ge.s32.totalorder %s7486_s27, 4  }
0x14b8   : > { %s7490_s25 = smov %s7487_s20 }
0x14b9   :  { %46 = sbr.rel (!%p44_p3) target bundleno = 29 (0x1d), region = 216 }
0x14be   :  { %5236 = vsyncpa [#allocation3], 1 }
0x14bf   :  { %5238 = vsyncpa [#allocation3 + $0x1], 1 }
0x14c0   :  { %5239 = vsyncpa [#allocation6], 1 }
0x14c1   :  { %5241 = vsyncpa [#allocation6 + $0x1], 1 }
0x14c2   :  { %5242 = vsyncpa [#allocation9], 1 }
0x14c3   :  { %5243 = vsyncpa [#allocation12], 1 }
0x14c4   :  { %5244 = vsyncpa [#allocation15], 1 }
0x14c5   :  { %5245 = vsyncpa [#allocation4], 1 }
0x14c6   :  { %5247 = vsyncpa [#allocation4 + $0x1], 1 }
0x14c7   :  { %5248 = vsyncpa [#allocation18], 1 }
0x14c8   :  { %5250 = vsyncpa [#allocation18 + $0x1], 1 }

</bundles_post_ra>
